<compile_context>
chip_gen: v5e
topology: v5e:2x2
jax: 0.10.0
libtpu: 0.0.40
codegen_flags: <defaults>
</compile_context>

<pallas_src>
import functools

import jax
import jax.numpy as jnp
from jax.experimental import pallas as pl
from jax.experimental.pallas import tpu as pltpu


# ------------------------------ fused kernel ------------------------------- #
def _dqn_fused_kernel(x2_ref, w1_ref, b1_ref, w2_ref, b2_ref, w3_ref, b3_ref,
                      wf1_ref, bf1_ref, wf2_ref, bf2_ref, out_ref,
                      s1_ref, act1_ref, s2_ref, act2_ref, s3_ref,
                      *, OH1, OW1, OH2, OW2, OH3, OW3, Q):
    """One batch element per grid step; everything stays in VMEM/vregs."""
    f32, bf16 = jnp.float32, jnp.bfloat16
    M1, M2, M3 = OH1 * OW1, OH2 * OW2, OH3 * OW3
    C0 = x2_ref.shape[-1]          # 64 = 4x4 spatial taps x 4 input frames (s2d)
    OC1 = w1_ref.shape[-1]         # 32
    OC2 = w2_ref.shape[-1]         # 64
    OC3 = w3_ref.shape[-1]         # 64
    NH = wf1_ref.shape[-1]         # 256

    # ---- conv1: 8x8 stride-4 conv == 2x2 stride-1 conv over s2d input ------
    # Gather each of the 4 taps into a full-lane-width staging slab, then do
    # 4 accumulating MXU matmuls (in-kernel im2col, no HBM patch tensor).
    for th in range(2):
        for tw in range(2):
            t = th * 2 + tw
            for oh in range(OH1):
                s1_ref[t, pl.ds(oh * OW1, OW1), :] = (
                    x2_ref[pl.ds((oh + th) * Q + tw, OW1), :])
    acc1 = jnp.zeros((M1, OC1), f32)
    for t in range(4):
        acc1 = acc1 + jnp.dot(s1_ref[t].astype(bf16),
                              w1_ref[pl.ds(t * C0, C0), :],
                              preferred_element_type=f32)
    act1_ref[...] = jnp.maximum(acc1 + b1_ref[...], 0.0)        # f32 epilogue

    # ---- conv2: 4x4 stride-2 conv ------------------------------------------
    IC2 = act1_ref.shape[-1]       # 32
    for kh in range(4):
        for kw in range(4):
            t = kh * 4 + kw
            for oh in range(OH2):
                for ow in range(OW2):
                    r = (2 * oh + kh) * OW1 + (2 * ow + kw)
                    s2_ref[t, pl.ds(oh * OW2 + ow, 1), :] = (
                        act1_ref[pl.ds(r, 1), :])
    acc2 = jnp.zeros((M2, OC2), f32)
    for t in range(16):
        acc2 = acc2 + jnp.dot(s2_ref[t].astype(bf16),
                              w2_ref[pl.ds(t * IC2, IC2), :],
                              preferred_element_type=f32)
    act2_ref[...] = jnp.maximum(acc2 + b2_ref[...], 0.0)

    # ---- conv3: 3x3 stride-1 conv ------------------------------------------
    IC3 = act2_ref.shape[-1]       # 64
    for kh in range(3):
        for kw in range(3):
            t = kh * 3 + kw
            for oh in range(OH3):
                s3_ref[t, pl.ds(oh * OW3, OW3), :] = (
                    act2_ref[pl.ds((oh + kh) * OW2 + kw, OW3), :])
    acc3 = jnp.zeros((M3, OC3), f32)
    for t in range(9):
        acc3 = acc3 + jnp.dot(s3_ref[t].astype(bf16),
                              w3_ref[pl.ds(t * IC3, IC3), :],
                              preferred_element_type=f32)
    act3 = jnp.maximum(acc3 + b3_ref[...], 0.0)                  # [M3, 64] vregs

    # ---- fc1 (torch NCHW flatten folded into wfc1 row order) + ReLU ---------
    acc4 = jnp.zeros((1, NH), f32)
    for r in range(M3):
        acc4 = acc4 + jnp.dot(act3[r:r + 1, :].astype(bf16),
                              wf1_ref[pl.ds(r * OC3, OC3), :],
                              preferred_element_type=f32)
    y1 = jnp.maximum(acc4 + bf1_ref[...], 0.0)

    # ---- fc2 (result stays vreg-resident until this single store) -----------
    y2 = jnp.dot(y1.astype(bf16), wf2_ref[...], preferred_element_type=f32)
    out_ref[...] = y2 + bf2_ref[...]


# --------------------------------- wrapper --------------------------------- #
def dqn_forward(prep, x_nchw):
    B, C, H, W = x_nchw.shape
    assert C == 4, "DQN expects 4 stacked frames"
    OH1, OW1 = (H - 8) // 4 + 1, (W - 8) // 4 + 1
    OH2, OW2 = (OH1 - 4) // 2 + 1, (OW1 - 4) // 2 + 1
    OH3, OW3 = OH2 - 2, OW2 - 2
    M1, M2, M3 = OH1 * OW1, OH2 * OW2, OH3 * OW3
    P, Q = OH1 + 1, OW1 + 1
    C0 = 16 * C                                   # s2d channel depth (= 64)

    # Duplication-free space-to-depth relayout (replaces the old XLA im2col):
    # conv1 (8x8 stride 4) becomes a 2x2 stride-1 conv over [P, Q, 64].
    x = x_nchw[:, :, :4 * P, :4 * Q]
    x = x.reshape(B, C, P, 4, Q, 4)
    x = jnp.transpose(x, (0, 2, 4, 3, 5, 1)).reshape(B, P * Q, C0)

    kern = functools.partial(_dqn_fused_kernel, OH1=OH1, OW1=OW1, OH2=OH2,
                             OW2=OW2, OH3=OH3, OW3=OW3, Q=Q)

    flops = 2 * B * (M1 * (4 * C0) * 32 + M2 * (16 * 32) * 64
                     + M3 * (9 * 64) * 64 + (M3 * 64) * 256 + 256 * 2)
    bytes_accessed = int(x.size) * 4 + B * 2 * 4 + sum(
        int(v.size) * v.dtype.itemsize for v in jax.tree_util.tree_leaves(prep))

    def wspec(a):
        return pl.BlockSpec(a.shape, lambda *_: (0,) * a.ndim)

    out = pl.pallas_call(
        kern,
        out_shape=jax.ShapeDtypeStruct((B, 1, 2), jnp.float32),
        grid=(B,),
        in_specs=[
            pl.BlockSpec((None, P * Q, C0), lambda b: (b, 0, 0)),
            wspec(prep["w1"]), wspec(prep["b1"]),
            wspec(prep["w2"]), wspec(prep["b2"]),
            wspec(prep["w3"]), wspec(prep["b3"]),
            wspec(prep["wfc1"]), wspec(prep["bfc1"]),
            wspec(prep["wfc2"]), wspec(prep["bfc2"]),
        ],
        out_specs=pl.BlockSpec((None, 1, 2), lambda b: (b, 0, 0)),
        scratch_shapes=[
            pltpu.VMEM((4, M1, C0), jnp.float32),    # conv1 tap staging
            pltpu.VMEM((M1, 32), jnp.float32),       # conv1 activations
            pltpu.VMEM((16, M2, 32), jnp.float32),   # conv2 tap staging
            pltpu.VMEM((M2, 64), jnp.float32),       # conv2 activations
            pltpu.VMEM((9, M3, 64), jnp.float32),    # conv3 tap staging
        ],
        compiler_params=pltpu.CompilerParams(
            dimension_semantics=("parallel",)),      # megacore: batch across TCs
        cost_estimate=pl.CostEstimate(flops=flops, transcendentals=0,
                                      bytes_accessed=bytes_accessed),
    )(x, prep["w1"], prep["b1"], prep["w2"], prep["b2"], prep["w3"],
      prep["b3"], prep["wfc1"], prep["bfc1"], prep["wfc2"], prep["bfc2"])
    return out.reshape(B, 2)


# ------------------------ parameter init / preparation --------------------- #
def init_params(key, in_hw=36):
    """Torch-layout params, mimicking PyTorch's U(-1/sqrt(fan_in), ...) init."""
    keys = jax.random.split(key, 10)

    def u(k, shape, fan_in):
        bound = 1.0 / (fan_in ** 0.5)
        return jax.random.uniform(k, shape, jnp.float32, -bound, bound)

    h1 = (in_hw - 8) // 4 + 1
    h2 = (h1 - 4) // 2 + 1
    h3 = (h2 - 3) // 1 + 1
    fc1_in = 64 * h3 * h3                          # LazyLinear inferred dim

    return {
        "w1": u(keys[0], (32, 4, 8, 8), 4 * 8 * 8),
        "b1": u(keys[1], (32,), 4 * 8 * 8),
        "w2": u(keys[2], (64, 32, 4, 4), 32 * 4 * 4),
        "b2": u(keys[3], (64,), 32 * 4 * 4),
        "w3": u(keys[4], (64, 64, 3, 3), 64 * 3 * 3),
        "b3": u(keys[5], (64,), 64 * 3 * 3),
        "wfc1": u(keys[6], (256, fc1_in), fc1_in),  # torch Linear [out, in]
        "bfc1": u(keys[7], (256,), fc1_in),
        "wfc2": u(keys[8], (2, 256), 256),
        "bfc2": u(keys[9], (2,), 256),
    }


def prepare_params(params):
    """One-time relayout of torch-layout weights into kernel GEMM layouts (bf16)."""
    bf16 = jnp.bfloat16
    w1, w2, w3 = params["w1"], params["w2"], params["w3"]
    oc1, ic1 = w1.shape[0], w1.shape[1]
    # conv1 in space-to-depth tap-major order: row = (th*2+tw)*64 + dh*16+dw*4+ic
    w1p = jnp.transpose(w1.reshape(oc1, ic1, 2, 4, 2, 4),
                        (2, 4, 3, 5, 1, 0)).reshape(4 * 16 * ic1, oc1)
    w2p = jnp.transpose(w2, (2, 3, 1, 0)).reshape(16 * w2.shape[1], w2.shape[0])
    w3p = jnp.transpose(w3, (2, 3, 1, 0)).reshape(9 * w3.shape[1], w3.shape[0])
    # fc1: fold torch's channel-major flatten (view(B,-1) on NCHW) into the rows
    # so the kernel consumes the NHWC conv3 activations directly.
    wfc1 = params["wfc1"]
    n_out, fc1_in = wfc1.shape
    s3 = fc1_in // 64
    wf1p = jnp.transpose(wfc1.T.reshape(64, s3, n_out),
                         (1, 0, 2)).reshape(fc1_in, n_out)
    wf2p = params["wfc2"].T
    return {
        "w1": w1p.astype(bf16), "b1": params["b1"].reshape(1, -1),
        "w2": w2p.astype(bf16), "b2": params["b2"].reshape(1, -1),
        "w3": w3p.astype(bf16), "b3": params["b3"].reshape(1, -1),
        "wfc1": wf1p.astype(bf16), "bfc1": params["bfc1"].reshape(1, -1),
        "wfc2": wf2p.astype(bf16), "bfc2": params["bfc2"].reshape(1, -1),
    }


# ------------------------------ pure-JAX reference ------------------------- #
def reference(params, x_nchw):
    """Mirrors the kernel math: bf16 matmul/conv operands, f32 accumulate+epilogue."""
    def conv(x, w, b, s):
        y = jax.lax.conv_general_dilated(
            x.astype(jnp.bfloat16), w.astype(jnp.bfloat16),
            window_strides=(s, s), padding="VALID",
            dimension_numbers=("NCHW", "OIHW", "NCHW"),
            preferred_element_type=jnp.float32)
        return jnp.maximum(y + b[None, :, None, None], 0.0)

    x = conv(x_nchw, params["w1"], params["b1"], 4)
    x = conv(x, params["w2"], params["b2"], 2)
    x = conv(x, params["w3"], params["b3"], 1)
    x = x.reshape(x.shape[0], -1)                      # torch .view(B, -1) (NCHW)
    x = jnp.maximum(
        jnp.dot(x.astype(jnp.bfloat16), params["wfc1"].T.astype(jnp.bfloat16),
                preferred_element_type=jnp.float32) + params["bfc1"], 0.0)
    return jnp.dot(x.astype(jnp.bfloat16), params["wfc2"].T.astype(jnp.bfloat16),
                   preferred_element_type=jnp.float32) + params["bfc2"]


# ----------------------------------- main ----------------------------------- #
if __name__ == "__main__":
    key = jax.random.PRNGKey(0)
    kx, kp = jax.random.split(key)

    # Smallest valid spatial size for this conv stack is 36 (-> conv3 out 1x1).
    x = jax.random.normal(kx, (2, 4, 36, 36), jnp.float32)
    params = init_params(kp, in_hw=36)
    prep = prepare_params(params)

    fwd = jax.jit(dqn_forward)
    out = jax.block_until_ready(fwd(prep, x))

    assert out.shape == (2, 2), out.shape
    ref = reference(params, x)
    assert jnp.allclose(out, ref, rtol=1e-2, atol=1e-2), (
        "mismatch vs reference, max abs err = "
        f"{float(jnp.max(jnp.abs(out - ref))):.3e}")
    print("KERNEL_OK")
</pallas_src>

<mosaic_0001>
module attributes {stable_mosaic.version = 11 : i64} {
  func.func @_dqn_fused_kernel(%arg0: i32, %arg1: memref<1x81x64xf32, #tpu.memory_space<vmem>>, %arg2: memref<256x32xbf16, #tpu.memory_space<vmem>>, %arg3: memref<1x32xf32, #tpu.memory_space<vmem>>, %arg4: memref<512x64xbf16, #tpu.memory_space<vmem>>, %arg5: memref<1x64xf32, #tpu.memory_space<vmem>>, %arg6: memref<576x64xbf16, #tpu.memory_space<vmem>>, %arg7: memref<1x64xf32, #tpu.memory_space<vmem>>, %arg8: memref<64x256xbf16, #tpu.memory_space<vmem>>, %arg9: memref<1x256xf32, #tpu.memory_space<vmem>>, %arg10: memref<256x2xbf16, #tpu.memory_space<vmem>>, %arg11: memref<1x2xf32, #tpu.memory_space<vmem>>, %arg12: memref<1x1x2xf32, #tpu.memory_space<vmem>>, %arg13: memref<4x64x64xf32, #tpu.memory_space<vmem>>, %arg14: memref<64x32xf32, #tpu.memory_space<vmem>>, %arg15: memref<16x9x32xf32, #tpu.memory_space<vmem>>, %arg16: memref<9x64xf32, #tpu.memory_space<vmem>>, %arg17: memref<9x1x64xf32, #tpu.memory_space<vmem>>) attributes {dimension_semantics = [#tpu.dimension_semantics<parallel>], iteration_bounds = array<i64: 2>, scalar_prefetch = 0 : i64, scratch_operands = 5 : i64, tpu.core_type = #tpu.core_type<tc>, window_params = [{transform_indices = @transform_0, window_bounds = array<i64: 1, 81, 64>}, {pipeline_mode = #tpu.pipeline_mode<synchronous>, transform_indices = @transform_1, window_bounds = array<i64: 256, 32>}, {pipeline_mode = #tpu.pipeline_mode<synchronous>, transform_indices = @transform_2, window_bounds = array<i64: 1, 32>}, {pipeline_mode = #tpu.pipeline_mode<synchronous>, transform_indices = @transform_3, window_bounds = array<i64: 512, 64>}, {pipeline_mode = #tpu.pipeline_mode<synchronous>, transform_indices = @transform_4, window_bounds = array<i64: 1, 64>}, {pipeline_mode = #tpu.pipeline_mode<synchronous>, transform_indices = @transform_5, window_bounds = array<i64: 576, 64>}, {pipeline_mode = #tpu.pipeline_mode<synchronous>, transform_indices = @transform_6, window_bounds = array<i64: 1, 64>}, {pipeline_mode = #tpu.pipeline_mode<synchronous>, transform_indices = @transform_7, window_bounds = array<i64: 64, 256>}, {pipeline_mode = #tpu.pipeline_mode<synchronous>, transform_indices = @transform_8, window_bounds = array<i64: 1, 256>}, {pipeline_mode = #tpu.pipeline_mode<synchronous>, transform_indices = @transform_9, window_bounds = array<i64: 256, 2>}, {pipeline_mode = #tpu.pipeline_mode<synchronous>, transform_indices = @transform_10, window_bounds = array<i64: 1, 2>}, {transform_indices = @transform_11, window_bounds = array<i64: 1, 1, 2>}]} {
    %c0 = arith.constant 0 : index
    %c0_0 = arith.constant 0 : index
    %c0_1 = arith.constant 0 : index
    %0 = vector.load %arg1[%c0, %c0_0, %c0_1] : memref<1x81x64xf32, #tpu.memory_space<vmem>>, vector<1x8x64xf32>
    %1 = vector.shape_cast %0 : vector<1x8x64xf32> to vector<8x64xf32>
    %c0_2 = arith.constant 0 : index
    %c0_3 = arith.constant 0 : index
    %c0_4 = arith.constant 0 : index
    %2 = vector.load %arg13[%c0_2, %c0_3, %c0_4] : memref<4x64x64xf32, #tpu.memory_space<vmem>>, vector<1x8x64xf32>
    %3 = vector.shape_cast %2 : vector<1x8x64xf32> to vector<8x64xf32>
    %4 = vector.shape_cast %1 : vector<8x64xf32> to vector<1x8x64xf32>
    tpu.vector_store %arg13[%c0_2, %c0_3, %c0_4], %4 {strides = array<i32>} : memref<4x64x64xf32, #tpu.memory_space<vmem>>, vector<1x8x64xf32>,
    %c0_5 = arith.constant 0 : index
    %c9 = arith.constant 9 : index
    %c0_6 = arith.constant 0 : index
    %5 = vector.load %arg1[%c0_5, %c9, %c0_6] : memref<1x81x64xf32, #tpu.memory_space<vmem>>, vector<1x8x64xf32>
    %6 = vector.shape_cast %5 : vector<1x8x64xf32> to vector<8x64xf32>
    %c0_7 = arith.constant 0 : index
    %c8 = arith.constant 8 : index
    %c0_8 = arith.constant 0 : index
    %7 = vector.load %arg13[%c0_7, %c8, %c0_8] : memref<4x64x64xf32, #tpu.memory_space<vmem>>, vector<1x8x64xf32>
    %8 = vector.shape_cast %7 : vector<1x8x64xf32> to vector<8x64xf32>
    %9 = vector.shape_cast %6 : vector<8x64xf32> to vector<1x8x64xf32>
    tpu.vector_store %arg13[%c0_7, %c8, %c0_8], %9 {strides = array<i32>} : memref<4x64x64xf32, #tpu.memory_space<vmem>>, vector<1x8x64xf32>,
    %c0_9 = arith.constant 0 : index
    %c18 = arith.constant 18 : index
    %c0_10 = arith.constant 0 : index
    %10 = vector.load %arg1[%c0_9, %c18, %c0_10] : memref<1x81x64xf32, #tpu.memory_space<vmem>>, vector<1x8x64xf32>
    %11 = vector.shape_cast %10 : vector<1x8x64xf32> to vector<8x64xf32>
    %c0_11 = arith.constant 0 : index
    %c16 = arith.constant 16 : index
    %c0_12 = arith.constant 0 : index
    %12 = vector.load %arg13[%c0_11, %c16, %c0_12] : memref<4x64x64xf32, #tpu.memory_space<vmem>>, vector<1x8x64xf32>
    %13 = vector.shape_cast %12 : vector<1x8x64xf32> to vector<8x64xf32>
    %14 = vector.shape_cast %11 : vector<8x64xf32> to vector<1x8x64xf32>
    tpu.vector_store %arg13[%c0_11, %c16, %c0_12], %14 {strides = array<i32>} : memref<4x64x64xf32, #tpu.memory_space<vmem>>, vector<1x8x64xf32>,
    %c0_13 = arith.constant 0 : index
    %c27 = arith.constant 27 : index
    %c0_14 = arith.constant 0 : index
    %15 = vector.load %arg1[%c0_13, %c27, %c0_14] : memref<1x81x64xf32, #tpu.memory_space<vmem>>, vector<1x8x64xf32>
    %16 = vector.shape_cast %15 : vector<1x8x64xf32> to vector<8x64xf32>
    %c0_15 = arith.constant 0 : index
    %c24 = arith.constant 24 : index
    %c0_16 = arith.constant 0 : index
    %17 = vector.load %arg13[%c0_15, %c24, %c0_16] : memref<4x64x64xf32, #tpu.memory_space<vmem>>, vector<1x8x64xf32>
    %18 = vector.shape_cast %17 : vector<1x8x64xf32> to vector<8x64xf32>
    %19 = vector.shape_cast %16 : vector<8x64xf32> to vector<1x8x64xf32>
    tpu.vector_store %arg13[%c0_15, %c24, %c0_16], %19 {strides = array<i32>} : memref<4x64x64xf32, #tpu.memory_space<vmem>>, vector<1x8x64xf32>,
    %c0_17 = arith.constant 0 : index
    %c36 = arith.constant 36 : index
    %c0_18 = arith.constant 0 : index
    %20 = vector.load %arg1[%c0_17, %c36, %c0_18] : memref<1x81x64xf32, #tpu.memory_space<vmem>>, vector<1x8x64xf32>
    %21 = vector.shape_cast %20 : vector<1x8x64xf32> to vector<8x64xf32>
    %c0_19 = arith.constant 0 : index
    %c32 = arith.constant 32 : index
    %c0_20 = arith.constant 0 : index
    %22 = vector.load %arg13[%c0_19, %c32, %c0_20] : memref<4x64x64xf32, #tpu.memory_space<vmem>>, vector<1x8x64xf32>
    %23 = vector.shape_cast %22 : vector<1x8x64xf32> to vector<8x64xf32>
    %24 = vector.shape_cast %21 : vector<8x64xf32> to vector<1x8x64xf32>
    tpu.vector_store %arg13[%c0_19, %c32, %c0_20], %24 {strides = array<i32>} : memref<4x64x64xf32, #tpu.memory_space<vmem>>, vector<1x8x64xf32>,
    %c0_21 = arith.constant 0 : index
    %c45 = arith.constant 45 : index
    %c0_22 = arith.constant 0 : index
    %25 = vector.load %arg1[%c0_21, %c45, %c0_22] : memref<1x81x64xf32, #tpu.memory_space<vmem>>, vector<1x8x64xf32>
    %26 = vector.shape_cast %25 : vector<1x8x64xf32> to vector<8x64xf32>
    %c0_23 = arith.constant 0 : index
    %c40 = arith.constant 40 : index
    %c0_24 = arith.constant 0 : index
    %27 = vector.load %arg13[%c0_23, %c40, %c0_24] : memref<4x64x64xf32, #tpu.memory_space<vmem>>, vector<1x8x64xf32>
    %28 = vector.shape_cast %27 : vector<1x8x64xf32> to vector<8x64xf32>
    %29 = vector.shape_cast %26 : vector<8x64xf32> to vector<1x8x64xf32>
    tpu.vector_store %arg13[%c0_23, %c40, %c0_24], %29 {strides = array<i32>} : memref<4x64x64xf32, #tpu.memory_space<vmem>>, vector<1x8x64xf32>,
    %c0_25 = arith.constant 0 : index
    %c54 = arith.constant 54 : index
    %c0_26 = arith.constant 0 : index
    %30 = vector.load %arg1[%c0_25, %c54, %c0_26] : memref<1x81x64xf32, #tpu.memory_space<vmem>>, vector<1x8x64xf32>
    %31 = vector.shape_cast %30 : vector<1x8x64xf32> to vector<8x64xf32>
    %c0_27 = arith.constant 0 : index
    %c48 = arith.constant 48 : index
    %c0_28 = arith.constant 0 : index
    %32 = vector.load %arg13[%c0_27, %c48, %c0_28] : memref<4x64x64xf32, #tpu.memory_space<vmem>>, vector<1x8x64xf32>
    %33 = vector.shape_cast %32 : vector<1x8x64xf32> to vector<8x64xf32>
    %34 = vector.shape_cast %31 : vector<8x64xf32> to vector<1x8x64xf32>
    tpu.vector_store %arg13[%c0_27, %c48, %c0_28], %34 {strides = array<i32>} : memref<4x64x64xf32, #tpu.memory_space<vmem>>, vector<1x8x64xf32>,
    %c0_29 = arith.constant 0 : index
    %c63 = arith.constant 63 : index
    %c0_30 = arith.constant 0 : index
    %35 = vector.load %arg1[%c0_29, %c63, %c0_30] : memref<1x81x64xf32, #tpu.memory_space<vmem>>, vector<1x8x64xf32>
    %36 = vector.shape_cast %35 : vector<1x8x64xf32> to vector<8x64xf32>
    %c0_31 = arith.constant 0 : index
    %c56 = arith.constant 56 : index
    %c0_32 = arith.constant 0 : index
    %37 = vector.load %arg13[%c0_31, %c56, %c0_32] : memref<4x64x64xf32, #tpu.memory_space<vmem>>, vector<1x8x64xf32>
    %38 = vector.shape_cast %37 : vector<1x8x64xf32> to vector<8x64xf32>
    %39 = vector.shape_cast %36 : vector<8x64xf32> to vector<1x8x64xf32>
    tpu.vector_store %arg13[%c0_31, %c56, %c0_32], %39 {strides = array<i32>} : memref<4x64x64xf32, #tpu.memory_space<vmem>>, vector<1x8x64xf32>,
    %c0_33 = arith.constant 0 : index
    %c1 = arith.constant 1 : index
    %c0_34 = arith.constant 0 : index
    %40 = vector.load %arg1[%c0_33, %c1, %c0_34] : memref<1x81x64xf32, #tpu.memory_space<vmem>>, vector<1x8x64xf32>
    %41 = vector.shape_cast %40 : vector<1x8x64xf32> to vector<8x64xf32>
    %c1_35 = arith.constant 1 : index
    %c0_36 = arith.constant 0 : index
    %c0_37 = arith.constant 0 : index
    %42 = vector.load %arg13[%c1_35, %c0_36, %c0_37] : memref<4x64x64xf32, #tpu.memory_space<vmem>>, vector<1x8x64xf32>
    %43 = vector.shape_cast %42 : vector<1x8x64xf32> to vector<8x64xf32>
    %44 = vector.shape_cast %41 : vector<8x64xf32> to vector<1x8x64xf32>
    tpu.vector_store %arg13[%c1_35, %c0_36, %c0_37], %44 {strides = array<i32>} : memref<4x64x64xf32, #tpu.memory_space<vmem>>, vector<1x8x64xf32>,
    %c0_38 = arith.constant 0 : index
    %c10 = arith.constant 10 : index
    %c0_39 = arith.constant 0 : index
    %45 = vector.load %arg1[%c0_38, %c10, %c0_39] : memref<1x81x64xf32, #tpu.memory_space<vmem>>, vector<1x8x64xf32>
    %46 = vector.shape_cast %45 : vector<1x8x64xf32> to vector<8x64xf32>
    %c1_40 = arith.constant 1 : index
    %c8_41 = arith.constant 8 : index
    %c0_42 = arith.constant 0 : index
    %47 = vector.load %arg13[%c1_40, %c8_41, %c0_42] : memref<4x64x64xf32, #tpu.memory_space<vmem>>, vector<1x8x64xf32>
    %48 = vector.shape_cast %47 : vector<1x8x64xf32> to vector<8x64xf32>
    %49 = vector.shape_cast %46 : vector<8x64xf32> to vector<1x8x64xf32>
    tpu.vector_store %arg13[%c1_40, %c8_41, %c0_42], %49 {strides = array<i32>} : memref<4x64x64xf32, #tpu.memory_space<vmem>>, vector<1x8x64xf32>,
    %c0_43 = arith.constant 0 : index
    %c19 = arith.constant 19 : index
    %c0_44 = arith.constant 0 : index
    %50 = vector.load %arg1[%c0_43, %c19, %c0_44] : memref<1x81x64xf32, #tpu.memory_space<vmem>>, vector<1x8x64xf32>
    %51 = vector.shape_cast %50 : vector<1x8x64xf32> to vector<8x64xf32>
    %c1_45 = arith.constant 1 : index
    %c16_46 = arith.constant 16 : index
    %c0_47 = arith.constant 0 : index
    %52 = vector.load %arg13[%c1_45, %c16_46, %c0_47] : memref<4x64x64xf32, #tpu.memory_space<vmem>>, vector<1x8x64xf32>
    %53 = vector.shape_cast %52 : vector<1x8x64xf32> to vector<8x64xf32>
    %54 = vector.shape_cast %51 : vector<8x64xf32> to vector<1x8x64xf32>
    tpu.vector_store %arg13[%c1_45, %c16_46, %c0_47], %54 {strides = array<i32>} : memref<4x64x64xf32, #tpu.memory_space<vmem>>, vector<1x8x64xf32>,
    %c0_48 = arith.constant 0 : index
    %c28 = arith.constant 28 : index
    %c0_49 = arith.constant 0 : index
    %55 = vector.load %arg1[%c0_48, %c28, %c0_49] : memref<1x81x64xf32, #tpu.memory_space<vmem>>, vector<1x8x64xf32>
    %56 = vector.shape_cast %55 : vector<1x8x64xf32> to vector<8x64xf32>
    %c1_50 = arith.constant 1 : index
    %c24_51 = arith.constant 24 : index
    %c0_52 = arith.constant 0 : index
    %57 = vector.load %arg13[%c1_50, %c24_51, %c0_52] : memref<4x64x64xf32, #tpu.memory_space<vmem>>, vector<1x8x64xf32>
    %58 = vector.shape_cast %57 : vector<1x8x64xf32> to vector<8x64xf32>
    %59 = vector.shape_cast %56 : vector<8x64xf32> to vector<1x8x64xf32>
    tpu.vector_store %arg13[%c1_50, %c24_51, %c0_52], %59 {strides = array<i32>} : memref<4x64x64xf32, #tpu.memory_space<vmem>>, vector<1x8x64xf32>,
    %c0_53 = arith.constant 0 : index
    %c37 = arith.constant 37 : index
    %c0_54 = arith.constant 0 : index
    %60 = vector.load %arg1[%c0_53, %c37, %c0_54] : memref<1x81x64xf32, #tpu.memory_space<vmem>>, vector<1x8x64xf32>
    %61 = vector.shape_cast %60 : vector<1x8x64xf32> to vector<8x64xf32>
    %c1_55 = arith.constant 1 : index
    %c32_56 = arith.constant 32 : index
    %c0_57 = arith.constant 0 : index
    %62 = vector.load %arg13[%c1_55, %c32_56, %c0_57] : memref<4x64x64xf32, #tpu.memory_space<vmem>>, vector<1x8x64xf32>
    %63 = vector.shape_cast %62 : vector<1x8x64xf32> to vector<8x64xf32>
    %64 = vector.shape_cast %61 : vector<8x64xf32> to vector<1x8x64xf32>
    tpu.vector_store %arg13[%c1_55, %c32_56, %c0_57], %64 {strides = array<i32>} : memref<4x64x64xf32, #tpu.memory_space<vmem>>, vector<1x8x64xf32>,
    %c0_58 = arith.constant 0 : index
    %c46 = arith.constant 46 : index
    %c0_59 = arith.constant 0 : index
    %65 = vector.load %arg1[%c0_58, %c46, %c0_59] : memref<1x81x64xf32, #tpu.memory_space<vmem>>, vector<1x8x64xf32>
    %66 = vector.shape_cast %65 : vector<1x8x64xf32> to vector<8x64xf32>
    %c1_60 = arith.constant 1 : index
    %c40_61 = arith.constant 40 : index
    %c0_62 = arith.constant 0 : index
    %67 = vector.load %arg13[%c1_60, %c40_61, %c0_62] : memref<4x64x64xf32, #tpu.memory_space<vmem>>, vector<1x8x64xf32>
    %68 = vector.shape_cast %67 : vector<1x8x64xf32> to vector<8x64xf32>
    %69 = vector.shape_cast %66 : vector<8x64xf32> to vector<1x8x64xf32>
    tpu.vector_store %arg13[%c1_60, %c40_61, %c0_62], %69 {strides = array<i32>} : memref<4x64x64xf32, #tpu.memory_space<vmem>>, vector<1x8x64xf32>,
    %c0_63 = arith.constant 0 : index
    %c55 = arith.constant 55 : index
    %c0_64 = arith.constant 0 : index
    %70 = vector.load %arg1[%c0_63, %c55, %c0_64] : memref<1x81x64xf32, #tpu.memory_space<vmem>>, vector<1x8x64xf32>
    %71 = vector.shape_cast %70 : vector<1x8x64xf32> to vector<8x64xf32>
    %c1_65 = arith.constant 1 : index
    %c48_66 = arith.constant 48 : index
    %c0_67 = arith.constant 0 : index
    %72 = vector.load %arg13[%c1_65, %c48_66, %c0_67] : memref<4x64x64xf32, #tpu.memory_space<vmem>>, vector<1x8x64xf32>
    %73 = vector.shape_cast %72 : vector<1x8x64xf32> to vector<8x64xf32>
    %74 = vector.shape_cast %71 : vector<8x64xf32> to vector<1x8x64xf32>
    tpu.vector_store %arg13[%c1_65, %c48_66, %c0_67], %74 {strides = array<i32>} : memref<4x64x64xf32, #tpu.memory_space<vmem>>, vector<1x8x64xf32>,
    %c0_68 = arith.constant 0 : index
    %c64 = arith.constant 64 : index
    %c0_69 = arith.constant 0 : index
    %75 = vector.load %arg1[%c0_68, %c64, %c0_69] : memref<1x81x64xf32, #tpu.memory_space<vmem>>, vector<1x8x64xf32>
    %76 = vector.shape_cast %75 : vector<1x8x64xf32> to vector<8x64xf32>
    %c1_70 = arith.constant 1 : index
    %c56_71 = arith.constant 56 : index
    %c0_72 = arith.constant 0 : index
    %77 = vector.load %arg13[%c1_70, %c56_71, %c0_72] : memref<4x64x64xf32, #tpu.memory_space<vmem>>, vector<1x8x64xf32>
    %78 = vector.shape_cast %77 : vector<1x8x64xf32> to vector<8x64xf32>
    %79 = vector.shape_cast %76 : vector<8x64xf32> to vector<1x8x64xf32>
    tpu.vector_store %arg13[%c1_70, %c56_71, %c0_72], %79 {strides = array<i32>} : memref<4x64x64xf32, #tpu.memory_space<vmem>>, vector<1x8x64xf32>,
    %c0_73 = arith.constant 0 : index
    %c9_74 = arith.constant 9 : index
    %c0_75 = arith.constant 0 : index
    %80 = vector.load %arg1[%c0_73, %c9_74, %c0_75] : memref<1x81x64xf32, #tpu.memory_space<vmem>>, vector<1x8x64xf32>
    %81 = vector.shape_cast %80 : vector<1x8x64xf32> to vector<8x64xf32>
    %c2 = arith.constant 2 : index
    %c0_76 = arith.constant 0 : index
    %c0_77 = arith.constant 0 : index
    %82 = vector.load %arg13[%c2, %c0_76, %c0_77] : memref<4x64x64xf32, #tpu.memory_space<vmem>>, vector<1x8x64xf32>
    %83 = vector.shape_cast %82 : vector<1x8x64xf32> to vector<8x64xf32>
    %84 = vector.shape_cast %81 : vector<8x64xf32> to vector<1x8x64xf32>
    tpu.vector_store %arg13[%c2, %c0_76, %c0_77], %84 {strides = array<i32>} : memref<4x64x64xf32, #tpu.memory_space<vmem>>, vector<1x8x64xf32>,
    %c0_78 = arith.constant 0 : index
    %c18_79 = arith.constant 18 : index
    %c0_80 = arith.constant 0 : index
    %85 = vector.load %arg1[%c0_78, %c18_79, %c0_80] : memref<1x81x64xf32, #tpu.memory_space<vmem>>, vector<1x8x64xf32>
    %86 = vector.shape_cast %85 : vector<1x8x64xf32> to vector<8x64xf32>
    %c2_81 = arith.constant 2 : index
    %c8_82 = arith.constant 8 : index
    %c0_83 = arith.constant 0 : index
    %87 = vector.load %arg13[%c2_81, %c8_82, %c0_83] : memref<4x64x64xf32, #tpu.memory_space<vmem>>, vector<1x8x64xf32>
    %88 = vector.shape_cast %87 : vector<1x8x64xf32> to vector<8x64xf32>
    %89 = vector.shape_cast %86 : vector<8x64xf32> to vector<1x8x64xf32>
    tpu.vector_store %arg13[%c2_81, %c8_82, %c0_83], %89 {strides = array<i32>} : memref<4x64x64xf32, #tpu.memory_space<vmem>>, vector<1x8x64xf32>,
    %c0_84 = arith.constant 0 : index
    %c27_85 = arith.constant 27 : index
    %c0_86 = arith.constant 0 : index
    %90 = vector.load %arg1[%c0_84, %c27_85, %c0_86] : memref<1x81x64xf32, #tpu.memory_space<vmem>>, vector<1x8x64xf32>
    %91 = vector.shape_cast %90 : vector<1x8x64xf32> to vector<8x64xf32>
    %c2_87 = arith.constant 2 : index
    %c16_88 = arith.constant 16 : index
    %c0_89 = arith.constant 0 : index
    %92 = vector.load %arg13[%c2_87, %c16_88, %c0_89] : memref<4x64x64xf32, #tpu.memory_space<vmem>>, vector<1x8x64xf32>
    %93 = vector.shape_cast %92 : vector<1x8x64xf32> to vector<8x64xf32>
    %94 = vector.shape_cast %91 : vector<8x64xf32> to vector<1x8x64xf32>
    tpu.vector_store %arg13[%c2_87, %c16_88, %c0_89], %94 {strides = array<i32>} : memref<4x64x64xf32, #tpu.memory_space<vmem>>, vector<1x8x64xf32>,
    %c0_90 = arith.constant 0 : index
    %c36_91 = arith.constant 36 : index
    %c0_92 = arith.constant 0 : index
    %95 = vector.load %arg1[%c0_90, %c36_91, %c0_92] : memref<1x81x64xf32, #tpu.memory_space<vmem>>, vector<1x8x64xf32>
    %96 = vector.shape_cast %95 : vector<1x8x64xf32> to vector<8x64xf32>
    %c2_93 = arith.constant 2 : index
    %c24_94 = arith.constant 24 : index
    %c0_95 = arith.constant 0 : index
    %97 = vector.load %arg13[%c2_93, %c24_94, %c0_95] : memref<4x64x64xf32, #tpu.memory_space<vmem>>, vector<1x8x64xf32>
    %98 = vector.shape_cast %97 : vector<1x8x64xf32> to vector<8x64xf32>
    %99 = vector.shape_cast %96 : vector<8x64xf32> to vector<1x8x64xf32>
    tpu.vector_store %arg13[%c2_93, %c24_94, %c0_95], %99 {strides = array<i32>} : memref<4x64x64xf32, #tpu.memory_space<vmem>>, vector<1x8x64xf32>,
    %c0_96 = arith.constant 0 : index
    %c45_97 = arith.constant 45 : index
    %c0_98 = arith.constant 0 : index
    %100 = vector.load %arg1[%c0_96, %c45_97, %c0_98] : memref<1x81x64xf32, #tpu.memory_space<vmem>>, vector<1x8x64xf32>
    %101 = vector.shape_cast %100 : vector<1x8x64xf32> to vector<8x64xf32>
    %c2_99 = arith.constant 2 : index
    %c32_100 = arith.constant 32 : index
    %c0_101 = arith.constant 0 : index
    %102 = vector.load %arg13[%c2_99, %c32_100, %c0_101] : memref<4x64x64xf32, #tpu.memory_space<vmem>>, vector<1x8x64xf32>
    %103 = vector.shape_cast %102 : vector<1x8x64xf32> to vector<8x64xf32>
    %104 = vector.shape_cast %101 : vector<8x64xf32> to vector<1x8x64xf32>
    tpu.vector_store %arg13[%c2_99, %c32_100, %c0_101], %104 {strides = array<i32>} : memref<4x64x64xf32, #tpu.memory_space<vmem>>, vector<1x8x64xf32>,
    %c0_102 = arith.constant 0 : index
    %c54_103 = arith.constant 54 : index
    %c0_104 = arith.constant 0 : index
    %105 = vector.load %arg1[%c0_102, %c54_103, %c0_104] : memref<1x81x64xf32, #tpu.memory_space<vmem>>, vector<1x8x64xf32>
    %106 = vector.shape_cast %105 : vector<1x8x64xf32> to vector<8x64xf32>
    %c2_105 = arith.constant 2 : index
    %c40_106 = arith.constant 40 : index
    %c0_107 = arith.constant 0 : index
    %107 = vector.load %arg13[%c2_105, %c40_106, %c0_107] : memref<4x64x64xf32, #tpu.memory_space<vmem>>, vector<1x8x64xf32>
    %108 = vector.shape_cast %107 : vector<1x8x64xf32> to vector<8x64xf32>
    %109 = vector.shape_cast %106 : vector<8x64xf32> to vector<1x8x64xf32>
    tpu.vector_store %arg13[%c2_105, %c40_106, %c0_107], %109 {strides = array<i32>} : memref<4x64x64xf32, #tpu.memory_space<vmem>>, vector<1x8x64xf32>,
    %c0_108 = arith.constant 0 : index
    %c63_109 = arith.constant 63 : index
    %c0_110 = arith.constant 0 : index
    %110 = vector.load %arg1[%c0_108, %c63_109, %c0_110] : memref<1x81x64xf32, #tpu.memory_space<vmem>>, vector<1x8x64xf32>
    %111 = vector.shape_cast %110 : vector<1x8x64xf32> to vector<8x64xf32>
    %c2_111 = arith.constant 2 : index
    %c48_112 = arith.constant 48 : index
    %c0_113 = arith.constant 0 : index
    %112 = vector.load %arg13[%c2_111, %c48_112, %c0_113] : memref<4x64x64xf32, #tpu.memory_space<vmem>>, vector<1x8x64xf32>
    %113 = vector.shape_cast %112 : vector<1x8x64xf32> to vector<8x64xf32>
    %114 = vector.shape_cast %111 : vector<8x64xf32> to vector<1x8x64xf32>
    tpu.vector_store %arg13[%c2_111, %c48_112, %c0_113], %114 {strides = array<i32>} : memref<4x64x64xf32, #tpu.memory_space<vmem>>, vector<1x8x64xf32>,
    %c0_114 = arith.constant 0 : index
    %c72 = arith.constant 72 : index
    %c0_115 = arith.constant 0 : index
    %115 = vector.load %arg1[%c0_114, %c72, %c0_115] : memref<1x81x64xf32, #tpu.memory_space<vmem>>, vector<1x8x64xf32>
    %116 = vector.shape_cast %115 : vector<1x8x64xf32> to vector<8x64xf32>
    %c2_116 = arith.constant 2 : index
    %c56_117 = arith.constant 56 : index
    %c0_118 = arith.constant 0 : index
    %117 = vector.load %arg13[%c2_116, %c56_117, %c0_118] : memref<4x64x64xf32, #tpu.memory_space<vmem>>, vector<1x8x64xf32>
    %118 = vector.shape_cast %117 : vector<1x8x64xf32> to vector<8x64xf32>
    %119 = vector.shape_cast %116 : vector<8x64xf32> to vector<1x8x64xf32>
    tpu.vector_store %arg13[%c2_116, %c56_117, %c0_118], %119 {strides = array<i32>} : memref<4x64x64xf32, #tpu.memory_space<vmem>>, vector<1x8x64xf32>,
    %c0_119 = arith.constant 0 : index
    %c10_120 = arith.constant 10 : index
    %c0_121 = arith.constant 0 : index
    %120 = vector.load %arg1[%c0_119, %c10_120, %c0_121] : memref<1x81x64xf32, #tpu.memory_space<vmem>>, vector<1x8x64xf32>
    %121 = vector.shape_cast %120 : vector<1x8x64xf32> to vector<8x64xf32>
    %c3 = arith.constant 3 : index
    %c0_122 = arith.constant 0 : index
    %c0_123 = arith.constant 0 : index
    %122 = vector.load %arg13[%c3, %c0_122, %c0_123] : memref<4x64x64xf32, #tpu.memory_space<vmem>>, vector<1x8x64xf32>
    %123 = vector.shape_cast %122 : vector<1x8x64xf32> to vector<8x64xf32>
    %124 = vector.shape_cast %121 : vector<8x64xf32> to vector<1x8x64xf32>
    tpu.vector_store %arg13[%c3, %c0_122, %c0_123], %124 {strides = array<i32>} : memref<4x64x64xf32, #tpu.memory_space<vmem>>, vector<1x8x64xf32>,
    %c0_124 = arith.constant 0 : index
    %c19_125 = arith.constant 19 : index
    %c0_126 = arith.constant 0 : index
    %125 = vector.load %arg1[%c0_124, %c19_125, %c0_126] : memref<1x81x64xf32, #tpu.memory_space<vmem>>, vector<1x8x64xf32>
    %126 = vector.shape_cast %125 : vector<1x8x64xf32> to vector<8x64xf32>
    %c3_127 = arith.constant 3 : index
    %c8_128 = arith.constant 8 : index
    %c0_129 = arith.constant 0 : index
    %127 = vector.load %arg13[%c3_127, %c8_128, %c0_129] : memref<4x64x64xf32, #tpu.memory_space<vmem>>, vector<1x8x64xf32>
    %128 = vector.shape_cast %127 : vector<1x8x64xf32> to vector<8x64xf32>
    %129 = vector.shape_cast %126 : vector<8x64xf32> to vector<1x8x64xf32>
    tpu.vector_store %arg13[%c3_127, %c8_128, %c0_129], %129 {strides = array<i32>} : memref<4x64x64xf32, #tpu.memory_space<vmem>>, vector<1x8x64xf32>,
    %c0_130 = arith.constant 0 : index
    %c28_131 = arith.constant 28 : index
    %c0_132 = arith.constant 0 : index
    %130 = vector.load %arg1[%c0_130, %c28_131, %c0_132] : memref<1x81x64xf32, #tpu.memory_space<vmem>>, vector<1x8x64xf32>
    %131 = vector.shape_cast %130 : vector<1x8x64xf32> to vector<8x64xf32>
    %c3_133 = arith.constant 3 : index
    %c16_134 = arith.constant 16 : index
    %c0_135 = arith.constant 0 : index
    %132 = vector.load %arg13[%c3_133, %c16_134, %c0_135] : memref<4x64x64xf32, #tpu.memory_space<vmem>>, vector<1x8x64xf32>
    %133 = vector.shape_cast %132 : vector<1x8x64xf32> to vector<8x64xf32>
    %134 = vector.shape_cast %131 : vector<8x64xf32> to vector<1x8x64xf32>
    tpu.vector_store %arg13[%c3_133, %c16_134, %c0_135], %134 {strides = array<i32>} : memref<4x64x64xf32, #tpu.memory_space<vmem>>, vector<1x8x64xf32>,
    %c0_136 = arith.constant 0 : index
    %c37_137 = arith.constant 37 : index
    %c0_138 = arith.constant 0 : index
    %135 = vector.load %arg1[%c0_136, %c37_137, %c0_138] : memref<1x81x64xf32, #tpu.memory_space<vmem>>, vector<1x8x64xf32>
    %136 = vector.shape_cast %135 : vector<1x8x64xf32> to vector<8x64xf32>
    %c3_139 = arith.constant 3 : index
    %c24_140 = arith.constant 24 : index
    %c0_141 = arith.constant 0 : index
    %137 = vector.load %arg13[%c3_139, %c24_140, %c0_141] : memref<4x64x64xf32, #tpu.memory_space<vmem>>, vector<1x8x64xf32>
    %138 = vector.shape_cast %137 : vector<1x8x64xf32> to vector<8x64xf32>
    %139 = vector.shape_cast %136 : vector<8x64xf32> to vector<1x8x64xf32>
    tpu.vector_store %arg13[%c3_139, %c24_140, %c0_141], %139 {strides = array<i32>} : memref<4x64x64xf32, #tpu.memory_space<vmem>>, vector<1x8x64xf32>,
    %c0_142 = arith.constant 0 : index
    %c46_143 = arith.constant 46 : index
    %c0_144 = arith.constant 0 : index
    %140 = vector.load %arg1[%c0_142, %c46_143, %c0_144] : memref<1x81x64xf32, #tpu.memory_space<vmem>>, vector<1x8x64xf32>
    %141 = vector.shape_cast %140 : vector<1x8x64xf32> to vector<8x64xf32>
    %c3_145 = arith.constant 3 : index
    %c32_146 = arith.constant 32 : index
    %c0_147 = arith.constant 0 : index
    %142 = vector.load %arg13[%c3_145, %c32_146, %c0_147] : memref<4x64x64xf32, #tpu.memory_space<vmem>>, vector<1x8x64xf32>
    %143 = vector.shape_cast %142 : vector<1x8x64xf32> to vector<8x64xf32>
    %144 = vector.shape_cast %141 : vector<8x64xf32> to vector<1x8x64xf32>
    tpu.vector_store %arg13[%c3_145, %c32_146, %c0_147], %144 {strides = array<i32>} : memref<4x64x64xf32, #tpu.memory_space<vmem>>, vector<1x8x64xf32>,
    %c0_148 = arith.constant 0 : index
    %c55_149 = arith.constant 55 : index
    %c0_150 = arith.constant 0 : index
    %145 = vector.load %arg1[%c0_148, %c55_149, %c0_150] : memref<1x81x64xf32, #tpu.memory_space<vmem>>, vector<1x8x64xf32>
    %146 = vector.shape_cast %145 : vector<1x8x64xf32> to vector<8x64xf32>
    %c3_151 = arith.constant 3 : index
    %c40_152 = arith.constant 40 : index
    %c0_153 = arith.constant 0 : index
    %147 = vector.load %arg13[%c3_151, %c40_152, %c0_153] : memref<4x64x64xf32, #tpu.memory_space<vmem>>, vector<1x8x64xf32>
    %148 = vector.shape_cast %147 : vector<1x8x64xf32> to vector<8x64xf32>
    %149 = vector.shape_cast %146 : vector<8x64xf32> to vector<1x8x64xf32>
    tpu.vector_store %arg13[%c3_151, %c40_152, %c0_153], %149 {strides = array<i32>} : memref<4x64x64xf32, #tpu.memory_space<vmem>>, vector<1x8x64xf32>,
    %c0_154 = arith.constant 0 : index
    %c64_155 = arith.constant 64 : index
    %c0_156 = arith.constant 0 : index
    %150 = vector.load %arg1[%c0_154, %c64_155, %c0_156] : memref<1x81x64xf32, #tpu.memory_space<vmem>>, vector<1x8x64xf32>
    %151 = vector.shape_cast %150 : vector<1x8x64xf32> to vector<8x64xf32>
    %c3_157 = arith.constant 3 : index
    %c48_158 = arith.constant 48 : index
    %c0_159 = arith.constant 0 : index
    %152 = vector.load %arg13[%c3_157, %c48_158, %c0_159] : memref<4x64x64xf32, #tpu.memory_space<vmem>>, vector<1x8x64xf32>
    %153 = vector.shape_cast %152 : vector<1x8x64xf32> to vector<8x64xf32>
    %154 = vector.shape_cast %151 : vector<8x64xf32> to vector<1x8x64xf32>
    tpu.vector_store %arg13[%c3_157, %c48_158, %c0_159], %154 {strides = array<i32>} : memref<4x64x64xf32, #tpu.memory_space<vmem>>, vector<1x8x64xf32>,
    %c0_160 = arith.constant 0 : index
    %c73 = arith.constant 73 : index
    %c0_161 = arith.constant 0 : index
    %155 = vector.load %arg1[%c0_160, %c73, %c0_161] : memref<1x81x64xf32, #tpu.memory_space<vmem>>, vector<1x8x64xf32>
    %156 = vector.shape_cast %155 : vector<1x8x64xf32> to vector<8x64xf32>
    %c3_162 = arith.constant 3 : index
    %c56_163 = arith.constant 56 : index
    %c0_164 = arith.constant 0 : index
    %157 = vector.load %arg13[%c3_162, %c56_163, %c0_164] : memref<4x64x64xf32, #tpu.memory_space<vmem>>, vector<1x8x64xf32>
    %158 = vector.shape_cast %157 : vector<1x8x64xf32> to vector<8x64xf32>
    %159 = vector.shape_cast %156 : vector<8x64xf32> to vector<1x8x64xf32>
    tpu.vector_store %arg13[%c3_162, %c56_163, %c0_164], %159 {strides = array<i32>} : memref<4x64x64xf32, #tpu.memory_space<vmem>>, vector<1x8x64xf32>,
    %cst = arith.constant 0.000000e+00 : f32
    %160 = vector.broadcast %cst : f32 to vector<64x32xf32>
    %c0_165 = arith.constant 0 : index
    %c0_166 = arith.constant 0 : index
    %c0_167 = arith.constant 0 : index
    %161 = vector.load %arg13[%c0_165, %c0_166, %c0_167] : memref<4x64x64xf32, #tpu.memory_space<vmem>>, vector<1x64x64xf32>
    %162 = vector.shape_cast %161 : vector<1x64x64xf32> to vector<64x64xf32>
    %163 = arith.truncf %162 : vector<64x64xf32> to vector<64x64xbf16>
    %c0_168 = arith.constant 0 : index
    %c0_169 = arith.constant 0 : index
    %164 = vector.load %arg2[%c0_168, %c0_169] : memref<256x32xbf16, #tpu.memory_space<vmem>>, vector<64x32xbf16>
    %cst_170 = arith.constant dense<0.000000e+00> : vector<64x32xf32>
    %165 = tpu.matmul %163, %164, %cst_170 {dimension_numbers = #tpu.dot_dimension_numbers<[1], [0], [0], [1], [0, 0, 1, 1], [], []>} : vector<64x64xbf16>, vector<64x32xbf16>, vector<64x32xf32> -> vector<64x32xf32>
    %166 = arith.addf %160, %165 : vector<64x32xf32>
    %c1_171 = arith.constant 1 : index
    %c0_172 = arith.constant 0 : index
    %c0_173 = arith.constant 0 : index
    %167 = vector.load %arg13[%c1_171, %c0_172, %c0_173] : memref<4x64x64xf32, #tpu.memory_space<vmem>>, vector<1x64x64xf32>
    %168 = vector.shape_cast %167 : vector<1x64x64xf32> to vector<64x64xf32>
    %169 = arith.truncf %168 : vector<64x64xf32> to vector<64x64xbf16>
    %c64_174 = arith.constant 64 : index
    %c0_175 = arith.constant 0 : index
    %170 = vector.load %arg2[%c64_174, %c0_175] : memref<256x32xbf16, #tpu.memory_space<vmem>>, vector<64x32xbf16>
    %cst_176 = arith.constant dense<0.000000e+00> : vector<64x32xf32>
    %171 = tpu.matmul %169, %170, %cst_176 {dimension_numbers = #tpu.dot_dimension_numbers<[1], [0], [0], [1], [0, 0, 1, 1], [], []>} : vector<64x64xbf16>, vector<64x32xbf16>, vector<64x32xf32> -> vector<64x32xf32>
    %172 = arith.addf %166, %171 : vector<64x32xf32>
    %c2_177 = arith.constant 2 : index
    %c0_178 = arith.constant 0 : index
    %c0_179 = arith.constant 0 : index
    %173 = vector.load %arg13[%c2_177, %c0_178, %c0_179] : memref<4x64x64xf32, #tpu.memory_space<vmem>>, vector<1x64x64xf32>
    %174 = vector.shape_cast %173 : vector<1x64x64xf32> to vector<64x64xf32>
    %175 = arith.truncf %174 : vector<64x64xf32> to vector<64x64xbf16>
    %c128 = arith.constant 128 : index
    %c0_180 = arith.constant 0 : index
    %176 = vector.load %arg2[%c128, %c0_180] : memref<256x32xbf16, #tpu.memory_space<vmem>>, vector<64x32xbf16>
    %cst_181 = arith.constant dense<0.000000e+00> : vector<64x32xf32>
    %177 = tpu.matmul %175, %176, %cst_181 {dimension_numbers = #tpu.dot_dimension_numbers<[1], [0], [0], [1], [0, 0, 1, 1], [], []>} : vector<64x64xbf16>, vector<64x32xbf16>, vector<64x32xf32> -> vector<64x32xf32>
    %178 = arith.addf %172, %177 : vector<64x32xf32>
    %c3_182 = arith.constant 3 : index
    %c0_183 = arith.constant 0 : index
    %c0_184 = arith.constant 0 : index
    %179 = vector.load %arg13[%c3_182, %c0_183, %c0_184] : memref<4x64x64xf32, #tpu.memory_space<vmem>>, vector<1x64x64xf32>
    %180 = vector.shape_cast %179 : vector<1x64x64xf32> to vector<64x64xf32>
    %181 = arith.truncf %180 : vector<64x64xf32> to vector<64x64xbf16>
    %c192 = arith.constant 192 : index
    %c0_185 = arith.constant 0 : index
    %182 = vector.load %arg2[%c192, %c0_185] : memref<256x32xbf16, #tpu.memory_space<vmem>>, vector<64x32xbf16>
    %cst_186 = arith.constant dense<0.000000e+00> : vector<64x32xf32>
    %183 = tpu.matmul %181, %182, %cst_186 {dimension_numbers = #tpu.dot_dimension_numbers<[1], [0], [0], [1], [0, 0, 1, 1], [], []>} : vector<64x64xbf16>, vector<64x32xbf16>, vector<64x32xf32> -> vector<64x32xf32>
    %184 = arith.addf %178, %183 : vector<64x32xf32>
    %c0_187 = arith.constant 0 : index
    %c0_188 = arith.constant 0 : index
    %185 = vector.load %arg3[%c0_187, %c0_188] : memref<1x32xf32, #tpu.memory_space<vmem>>, vector<1x32xf32>
    %186 = vector.broadcast %185 : vector<1x32xf32> to vector<64x32xf32>
    %187 = arith.addf %184, %186 : vector<64x32xf32>
    %cst_189 = arith.constant 0.000000e+00 : f32
    %188 = vector.broadcast %cst_189 : f32 to vector<64x32xf32>
    %189 = arith.maximumf %187, %188 : vector<64x32xf32>
    %c0_190 = arith.constant 0 : index
    %c0_191 = arith.constant 0 : index
    %190 = vector.load %arg14[%c0_190, %c0_191] : memref<64x32xf32, #tpu.memory_space<vmem>>, vector<64x32xf32>
    tpu.vector_store %arg14[%c0_190, %c0_191], %189 {strides = array<i32>} : memref<64x32xf32, #tpu.memory_space<vmem>>, vector<64x32xf32>,
    %c0_192 = arith.constant 0 : index
    %c0_193 = arith.constant 0 : index
    %191 = vector.load %arg14[%c0_192, %c0_193] : memref<64x32xf32, #tpu.memory_space<vmem>>, vector<1x32xf32>
    %c0_194 = arith.constant 0 : index
    %c0_195 = arith.constant 0 : index
    %c0_196 = arith.constant 0 : index
    %192 = vector.load %arg15[%c0_194, %c0_195, %c0_196] : memref<16x9x32xf32, #tpu.memory_space<vmem>>, vector<1x1x32xf32>
    %193 = vector.shape_cast %192 : vector<1x1x32xf32> to vector<1x32xf32>
    %194 = vector.shape_cast %191 : vector<1x32xf32> to vector<1x1x32xf32>
    tpu.vector_store %arg15[%c0_194, %c0_195, %c0_196], %194 {strides = array<i32>} : memref<16x9x32xf32, #tpu.memory_space<vmem>>, vector<1x1x32xf32>,
    %c2_197 = arith.constant 2 : index
    %c0_198 = arith.constant 0 : index
    %195 = vector.load %arg14[%c2_197, %c0_198] : memref<64x32xf32, #tpu.memory_space<vmem>>, vector<1x32xf32>
    %c0_199 = arith.constant 0 : index
    %c1_200 = arith.constant 1 : index
    %c0_201 = arith.constant 0 : index
    %196 = vector.load %arg15[%c0_199, %c1_200, %c0_201] : memref<16x9x32xf32, #tpu.memory_space<vmem>>, vector<1x1x32xf32>
    %197 = vector.shape_cast %196 : vector<1x1x32xf32> to vector<1x32xf32>
    %198 = vector.shape_cast %195 : vector<1x32xf32> to vector<1x1x32xf32>
    tpu.vector_store %arg15[%c0_199, %c1_200, %c0_201], %198 {strides = array<i32>} : memref<16x9x32xf32, #tpu.memory_space<vmem>>, vector<1x1x32xf32>,
    %c4 = arith.constant 4 : index
    %c0_202 = arith.constant 0 : index
    %199 = vector.load %arg14[%c4, %c0_202] : memref<64x32xf32, #tpu.memory_space<vmem>>, vector<1x32xf32>
    %c0_203 = arith.constant 0 : index
    %c2_204 = arith.constant 2 : index
    %c0_205 = arith.constant 0 : index
    %200 = vector.load %arg15[%c0_203, %c2_204, %c0_205] : memref<16x9x32xf32, #tpu.memory_space<vmem>>, vector<1x1x32xf32>
    %201 = vector.shape_cast %200 : vector<1x1x32xf32> to vector<1x32xf32>
    %202 = vector.shape_cast %199 : vector<1x32xf32> to vector<1x1x32xf32>
    tpu.vector_store %arg15[%c0_203, %c2_204, %c0_205], %202 {strides = array<i32>} : memref<16x9x32xf32, #tpu.memory_space<vmem>>, vector<1x1x32xf32>,
    %c16_206 = arith.constant 16 : index
    %c0_207 = arith.constant 0 : index
    %203 = vector.load %arg14[%c16_206, %c0_207] : memref<64x32xf32, #tpu.memory_space<vmem>>, vector<1x32xf32>
    %c0_208 = arith.constant 0 : index
    %c3_209 = arith.constant 3 : index
    %c0_210 = arith.constant 0 : index
    %204 = vector.load %arg15[%c0_208, %c3_209, %c0_210] : memref<16x9x32xf32, #tpu.memory_space<vmem>>, vector<1x1x32xf32>
    %205 = vector.shape_cast %204 : vector<1x1x32xf32> to vector<1x32xf32>
    %206 = vector.shape_cast %203 : vector<1x32xf32> to vector<1x1x32xf32>
    tpu.vector_store %arg15[%c0_208, %c3_209, %c0_210], %206 {strides = array<i32>} : memref<16x9x32xf32, #tpu.memory_space<vmem>>, vector<1x1x32xf32>,
    %c18_211 = arith.constant 18 : index
    %c0_212 = arith.constant 0 : index
    %207 = vector.load %arg14[%c18_211, %c0_212] : memref<64x32xf32, #tpu.memory_space<vmem>>, vector<1x32xf32>
    %c0_213 = arith.constant 0 : index
    %c4_214 = arith.constant 4 : index
    %c0_215 = arith.constant 0 : index
    %208 = vector.load %arg15[%c0_213, %c4_214, %c0_215] : memref<16x9x32xf32, #tpu.memory_space<vmem>>, vector<1x1x32xf32>
    %209 = vector.shape_cast %208 : vector<1x1x32xf32> to vector<1x32xf32>
    %210 = vector.shape_cast %207 : vector<1x32xf32> to vector<1x1x32xf32>
    tpu.vector_store %arg15[%c0_213, %c4_214, %c0_215], %210 {strides = array<i32>} : memref<16x9x32xf32, #tpu.memory_space<vmem>>, vector<1x1x32xf32>,
    %c20 = arith.constant 20 : index
    %c0_216 = arith.constant 0 : index
    %211 = vector.load %arg14[%c20, %c0_216] : memref<64x32xf32, #tpu.memory_space<vmem>>, vector<1x32xf32>
    %c0_217 = arith.constant 0 : index
    %c5 = arith.constant 5 : index
    %c0_218 = arith.constant 0 : index
    %212 = vector.load %arg15[%c0_217, %c5, %c0_218] : memref<16x9x32xf32, #tpu.memory_space<vmem>>, vector<1x1x32xf32>
    %213 = vector.shape_cast %212 : vector<1x1x32xf32> to vector<1x32xf32>
    %214 = vector.shape_cast %211 : vector<1x32xf32> to vector<1x1x32xf32>
    tpu.vector_store %arg15[%c0_217, %c5, %c0_218], %214 {strides = array<i32>} : memref<16x9x32xf32, #tpu.memory_space<vmem>>, vector<1x1x32xf32>,
    %c32_219 = arith.constant 32 : index
    %c0_220 = arith.constant 0 : index
    %215 = vector.load %arg14[%c32_219, %c0_220] : memref<64x32xf32, #tpu.memory_space<vmem>>, vector<1x32xf32>
    %c0_221 = arith.constant 0 : index
    %c6 = arith.constant 6 : index
    %c0_222 = arith.constant 0 : index
    %216 = vector.load %arg15[%c0_221, %c6, %c0_222] : memref<16x9x32xf32, #tpu.memory_space<vmem>>, vector<1x1x32xf32>
    %217 = vector.shape_cast %216 : vector<1x1x32xf32> to vector<1x32xf32>
    %218 = vector.shape_cast %215 : vector<1x32xf32> to vector<1x1x32xf32>
    tpu.vector_store %arg15[%c0_221, %c6, %c0_222], %218 {strides = array<i32>} : memref<16x9x32xf32, #tpu.memory_space<vmem>>, vector<1x1x32xf32>,
    %c34 = arith.constant 34 : index
    %c0_223 = arith.constant 0 : index
    %219 = vector.load %arg14[%c34, %c0_223] : memref<64x32xf32, #tpu.memory_space<vmem>>, vector<1x32xf32>
    %c0_224 = arith.constant 0 : index
    %c7 = arith.constant 7 : index
    %c0_225 = arith.constant 0 : index
    %220 = vector.load %arg15[%c0_224, %c7, %c0_225] : memref<16x9x32xf32, #tpu.memory_space<vmem>>, vector<1x1x32xf32>
    %221 = vector.shape_cast %220 : vector<1x1x32xf32> to vector<1x32xf32>
    %222 = vector.shape_cast %219 : vector<1x32xf32> to vector<1x1x32xf32>
    tpu.vector_store %arg15[%c0_224, %c7, %c0_225], %222 {strides = array<i32>} : memref<16x9x32xf32, #tpu.memory_space<vmem>>, vector<1x1x32xf32>,
    %c36_226 = arith.constant 36 : index
    %c0_227 = arith.constant 0 : index
    %223 = vector.load %arg14[%c36_226, %c0_227] : memref<64x32xf32, #tpu.memory_space<vmem>>, vector<1x32xf32>
    %c0_228 = arith.constant 0 : index
    %c8_229 = arith.constant 8 : index
    %c0_230 = arith.constant 0 : index
    %224 = vector.load %arg15[%c0_228, %c8_229, %c0_230] : memref<16x9x32xf32, #tpu.memory_space<vmem>>, vector<1x1x32xf32>
    %225 = vector.shape_cast %224 : vector<1x1x32xf32> to vector<1x32xf32>
    %226 = vector.shape_cast %223 : vector<1x32xf32> to vector<1x1x32xf32>
    tpu.vector_store %arg15[%c0_228, %c8_229, %c0_230], %226 {strides = array<i32>} : memref<16x9x32xf32, #tpu.memory_space<vmem>>, vector<1x1x32xf32>,
    %c1_231 = arith.constant 1 : index
    %c0_232 = arith.constant 0 : index
    %227 = vector.load %arg14[%c1_231, %c0_232] : memref<64x32xf32, #tpu.memory_space<vmem>>, vector<1x32xf32>
    %c1_233 = arith.constant 1 : index
    %c0_234 = arith.constant 0 : index
    %c0_235 = arith.constant 0 : index
    %228 = vector.load %arg15[%c1_233, %c0_234, %c0_235] : memref<16x9x32xf32, #tpu.memory_space<vmem>>, vector<1x1x32xf32>
    %229 = vector.shape_cast %228 : vector<1x1x32xf32> to vector<1x32xf32>
    %230 = vector.shape_cast %227 : vector<1x32xf32> to vector<1x1x32xf32>
    tpu.vector_store %arg15[%c1_233, %c0_234, %c0_235], %230 {strides = array<i32>} : memref<16x9x32xf32, #tpu.memory_space<vmem>>, vector<1x1x32xf32>,
    %c3_236 = arith.constant 3 : index
    %c0_237 = arith.constant 0 : index
    %231 = vector.load %arg14[%c3_236, %c0_237] : memref<64x32xf32, #tpu.memory_space<vmem>>, vector<1x32xf32>
    %c1_238 = arith.constant 1 : index
    %c1_239 = arith.constant 1 : index
    %c0_240 = arith.constant 0 : index
    %232 = vector.load %arg15[%c1_238, %c1_239, %c0_240] : memref<16x9x32xf32, #tpu.memory_space<vmem>>, vector<1x1x32xf32>
    %233 = vector.shape_cast %232 : vector<1x1x32xf32> to vector<1x32xf32>
    %234 = vector.shape_cast %231 : vector<1x32xf32> to vector<1x1x32xf32>
    tpu.vector_store %arg15[%c1_238, %c1_239, %c0_240], %234 {strides = array<i32>} : memref<16x9x32xf32, #tpu.memory_space<vmem>>, vector<1x1x32xf32>,
    %c5_241 = arith.constant 5 : index
    %c0_242 = arith.constant 0 : index
    %235 = vector.load %arg14[%c5_241, %c0_242] : memref<64x32xf32, #tpu.memory_space<vmem>>, vector<1x32xf32>
    %c1_243 = arith.constant 1 : index
    %c2_244 = arith.constant 2 : index
    %c0_245 = arith.constant 0 : index
    %236 = vector.load %arg15[%c1_243, %c2_244, %c0_245] : memref<16x9x32xf32, #tpu.memory_space<vmem>>, vector<1x1x32xf32>
    %237 = vector.shape_cast %236 : vector<1x1x32xf32> to vector<1x32xf32>
    %238 = vector.shape_cast %235 : vector<1x32xf32> to vector<1x1x32xf32>
    tpu.vector_store %arg15[%c1_243, %c2_244, %c0_245], %238 {strides = array<i32>} : memref<16x9x32xf32, #tpu.memory_space<vmem>>, vector<1x1x32xf32>,
    %c17 = arith.constant 17 : index
    %c0_246 = arith.constant 0 : index
    %239 = vector.load %arg14[%c17, %c0_246] : memref<64x32xf32, #tpu.memory_space<vmem>>, vector<1x32xf32>
    %c1_247 = arith.constant 1 : index
    %c3_248 = arith.constant 3 : index
    %c0_249 = arith.constant 0 : index
    %240 = vector.load %arg15[%c1_247, %c3_248, %c0_249] : memref<16x9x32xf32, #tpu.memory_space<vmem>>, vector<1x1x32xf32>
    %241 = vector.shape_cast %240 : vector<1x1x32xf32> to vector<1x32xf32>
    %242 = vector.shape_cast %239 : vector<1x32xf32> to vector<1x1x32xf32>
    tpu.vector_store %arg15[%c1_247, %c3_248, %c0_249], %242 {strides = array<i32>} : memref<16x9x32xf32, #tpu.memory_space<vmem>>, vector<1x1x32xf32>,
    %c19_250 = arith.constant 19 : index
    %c0_251 = arith.constant 0 : index
    %243 = vector.load %arg14[%c19_250, %c0_251] : memref<64x32xf32, #tpu.memory_space<vmem>>, vector<1x32xf32>
    %c1_252 = arith.constant 1 : index
    %c4_253 = arith.constant 4 : index
    %c0_254 = arith.constant 0 : index
    %244 = vector.load %arg15[%c1_252, %c4_253, %c0_254] : memref<16x9x32xf32, #tpu.memory_space<vmem>>, vector<1x1x32xf32>
    %245 = vector.shape_cast %244 : vector<1x1x32xf32> to vector<1x32xf32>
    %246 = vector.shape_cast %243 : vector<1x32xf32> to vector<1x1x32xf32>
    tpu.vector_store %arg15[%c1_252, %c4_253, %c0_254], %246 {strides = array<i32>} : memref<16x9x32xf32, #tpu.memory_space<vmem>>, vector<1x1x32xf32>,
    %c21 = arith.constant 21 : index
    %c0_255 = arith.constant 0 : index
    %247 = vector.load %arg14[%c21, %c0_255] : memref<64x32xf32, #tpu.memory_space<vmem>>, vector<1x32xf32>
    %c1_256 = arith.constant 1 : index
    %c5_257 = arith.constant 5 : index
    %c0_258 = arith.constant 0 : index
    %248 = vector.load %arg15[%c1_256, %c5_257, %c0_258] : memref<16x9x32xf32, #tpu.memory_space<vmem>>, vector<1x1x32xf32>
    %249 = vector.shape_cast %248 : vector<1x1x32xf32> to vector<1x32xf32>
    %250 = vector.shape_cast %247 : vector<1x32xf32> to vector<1x1x32xf32>
    tpu.vector_store %arg15[%c1_256, %c5_257, %c0_258], %250 {strides = array<i32>} : memref<16x9x32xf32, #tpu.memory_space<vmem>>, vector<1x1x32xf32>,
    %c33 = arith.constant 33 : index
    %c0_259 = arith.constant 0 : index
    %251 = vector.load %arg14[%c33, %c0_259] : memref<64x32xf32, #tpu.memory_space<vmem>>, vector<1x32xf32>
    %c1_260 = arith.constant 1 : index
    %c6_261 = arith.constant 6 : index
    %c0_262 = arith.constant 0 : index
    %252 = vector.load %arg15[%c1_260, %c6_261, %c0_262] : memref<16x9x32xf32, #tpu.memory_space<vmem>>, vector<1x1x32xf32>
    %253 = vector.shape_cast %252 : vector<1x1x32xf32> to vector<1x32xf32>
    %254 = vector.shape_cast %251 : vector<1x32xf32> to vector<1x1x32xf32>
    tpu.vector_store %arg15[%c1_260, %c6_261, %c0_262], %254 {strides = array<i32>} : memref<16x9x32xf32, #tpu.memory_space<vmem>>, vector<1x1x32xf32>,
    %c35 = arith.constant 35 : index
    %c0_263 = arith.constant 0 : index
    %255 = vector.load %arg14[%c35, %c0_263] : memref<64x32xf32, #tpu.memory_space<vmem>>, vector<1x32xf32>
    %c1_264 = arith.constant 1 : index
    %c7_265 = arith.constant 7 : index
    %c0_266 = arith.constant 0 : index
    %256 = vector.load %arg15[%c1_264, %c7_265, %c0_266] : memref<16x9x32xf32, #tpu.memory_space<vmem>>, vector<1x1x32xf32>
    %257 = vector.shape_cast %256 : vector<1x1x32xf32> to vector<1x32xf32>
    %258 = vector.shape_cast %255 : vector<1x32xf32> to vector<1x1x32xf32>
    tpu.vector_store %arg15[%c1_264, %c7_265, %c0_266], %258 {strides = array<i32>} : memref<16x9x32xf32, #tpu.memory_space<vmem>>, vector<1x1x32xf32>,
    %c37_267 = arith.constant 37 : index
    %c0_268 = arith.constant 0 : index
    %259 = vector.load %arg14[%c37_267, %c0_268] : memref<64x32xf32, #tpu.memory_space<vmem>>, vector<1x32xf32>
    %c1_269 = arith.constant 1 : index
    %c8_270 = arith.constant 8 : index
    %c0_271 = arith.constant 0 : index
    %260 = vector.load %arg15[%c1_269, %c8_270, %c0_271] : memref<16x9x32xf32, #tpu.memory_space<vmem>>, vector<1x1x32xf32>
    %261 = vector.shape_cast %260 : vector<1x1x32xf32> to vector<1x32xf32>
    %262 = vector.shape_cast %259 : vector<1x32xf32> to vector<1x1x32xf32>
    tpu.vector_store %arg15[%c1_269, %c8_270, %c0_271], %262 {strides = array<i32>} : memref<16x9x32xf32, #tpu.memory_space<vmem>>, vector<1x1x32xf32>,
    %c2_272 = arith.constant 2 : index
    %c0_273 = arith.constant 0 : index
    %263 = vector.load %arg14[%c2_272, %c0_273] : memref<64x32xf32, #tpu.memory_space<vmem>>, vector<1x32xf32>
    %c2_274 = arith.constant 2 : index
    %c0_275 = arith.constant 0 : index
    %c0_276 = arith.constant 0 : index
    %264 = vector.load %arg15[%c2_274, %c0_275, %c0_276] : memref<16x9x32xf32, #tpu.memory_space<vmem>>, vector<1x1x32xf32>
    %265 = vector.shape_cast %264 : vector<1x1x32xf32> to vector<1x32xf32>
    %266 = vector.shape_cast %263 : vector<1x32xf32> to vector<1x1x32xf32>
    tpu.vector_store %arg15[%c2_274, %c0_275, %c0_276], %266 {strides = array<i32>} : memref<16x9x32xf32, #tpu.memory_space<vmem>>, vector<1x1x32xf32>,
    %c4_277 = arith.constant 4 : index
    %c0_278 = arith.constant 0 : index
    %267 = vector.load %arg14[%c4_277, %c0_278] : memref<64x32xf32, #tpu.memory_space<vmem>>, vector<1x32xf32>
    %c2_279 = arith.constant 2 : index
    %c1_280 = arith.constant 1 : index
    %c0_281 = arith.constant 0 : index
    %268 = vector.load %arg15[%c2_279, %c1_280, %c0_281] : memref<16x9x32xf32, #tpu.memory_space<vmem>>, vector<1x1x32xf32>
    %269 = vector.shape_cast %268 : vector<1x1x32xf32> to vector<1x32xf32>
    %270 = vector.shape_cast %267 : vector<1x32xf32> to vector<1x1x32xf32>
    tpu.vector_store %arg15[%c2_279, %c1_280, %c0_281], %270 {strides = array<i32>} : memref<16x9x32xf32, #tpu.memory_space<vmem>>, vector<1x1x32xf32>,
    %c6_282 = arith.constant 6 : index
    %c0_283 = arith.constant 0 : index
    %271 = vector.load %arg14[%c6_282, %c0_283] : memref<64x32xf32, #tpu.memory_space<vmem>>, vector<1x32xf32>
    %c2_284 = arith.constant 2 : index
    %c2_285 = arith.constant 2 : index
    %c0_286 = arith.constant 0 : index
    %272 = vector.load %arg15[%c2_284, %c2_285, %c0_286] : memref<16x9x32xf32, #tpu.memory_space<vmem>>, vector<1x1x32xf32>
    %273 = vector.shape_cast %272 : vector<1x1x32xf32> to vector<1x32xf32>
    %274 = vector.shape_cast %271 : vector<1x32xf32> to vector<1x1x32xf32>
    tpu.vector_store %arg15[%c2_284, %c2_285, %c0_286], %274 {strides = array<i32>} : memref<16x9x32xf32, #tpu.memory_space<vmem>>, vector<1x1x32xf32>,
    %c18_287 = arith.constant 18 : index
    %c0_288 = arith.constant 0 : index
    %275 = vector.load %arg14[%c18_287, %c0_288] : memref<64x32xf32, #tpu.memory_space<vmem>>, vector<1x32xf32>
    %c2_289 = arith.constant 2 : index
    %c3_290 = arith.constant 3 : index
    %c0_291 = arith.constant 0 : index
    %276 = vector.load %arg15[%c2_289, %c3_290, %c0_291] : memref<16x9x32xf32, #tpu.memory_space<vmem>>, vector<1x1x32xf32>
    %277 = vector.shape_cast %276 : vector<1x1x32xf32> to vector<1x32xf32>
    %278 = vector.shape_cast %275 : vector<1x32xf32> to vector<1x1x32xf32>
    tpu.vector_store %arg15[%c2_289, %c3_290, %c0_291], %278 {strides = array<i32>} : memref<16x9x32xf32, #tpu.memory_space<vmem>>, vector<1x1x32xf32>,
    %c20_292 = arith.constant 20 : index
    %c0_293 = arith.constant 0 : index
    %279 = vector.load %arg14[%c20_292, %c0_293] : memref<64x32xf32, #tpu.memory_space<vmem>>, vector<1x32xf32>
    %c2_294 = arith.constant 2 : index
    %c4_295 = arith.constant 4 : index
    %c0_296 = arith.constant 0 : index
    %280 = vector.load %arg15[%c2_294, %c4_295, %c0_296] : memref<16x9x32xf32, #tpu.memory_space<vmem>>, vector<1x1x32xf32>
    %281 = vector.shape_cast %280 : vector<1x1x32xf32> to vector<1x32xf32>
    %282 = vector.shape_cast %279 : vector<1x32xf32> to vector<1x1x32xf32>
    tpu.vector_store %arg15[%c2_294, %c4_295, %c0_296], %282 {strides = array<i32>} : memref<16x9x32xf32, #tpu.memory_space<vmem>>, vector<1x1x32xf32>,
    %c22 = arith.constant 22 : index
    %c0_297 = arith.constant 0 : index
    %283 = vector.load %arg14[%c22, %c0_297] : memref<64x32xf32, #tpu.memory_space<vmem>>, vector<1x32xf32>
    %c2_298 = arith.constant 2 : index
    %c5_299 = arith.constant 5 : index
    %c0_300 = arith.constant 0 : index
    %284 = vector.load %arg15[%c2_298, %c5_299, %c0_300] : memref<16x9x32xf32, #tpu.memory_space<vmem>>, vector<1x1x32xf32>
    %285 = vector.shape_cast %284 : vector<1x1x32xf32> to vector<1x32xf32>
    %286 = vector.shape_cast %283 : vector<1x32xf32> to vector<1x1x32xf32>
    tpu.vector_store %arg15[%c2_298, %c5_299, %c0_300], %286 {strides = array<i32>} : memref<16x9x32xf32, #tpu.memory_space<vmem>>, vector<1x1x32xf32>,
    %c34_301 = arith.constant 34 : index
    %c0_302 = arith.constant 0 : index
    %287 = vector.load %arg14[%c34_301, %c0_302] : memref<64x32xf32, #tpu.memory_space<vmem>>, vector<1x32xf32>
    %c2_303 = arith.constant 2 : index
    %c6_304 = arith.constant 6 : index
    %c0_305 = arith.constant 0 : index
    %288 = vector.load %arg15[%c2_303, %c6_304, %c0_305] : memref<16x9x32xf32, #tpu.memory_space<vmem>>, vector<1x1x32xf32>
    %289 = vector.shape_cast %288 : vector<1x1x32xf32> to vector<1x32xf32>
    %290 = vector.shape_cast %287 : vector<1x32xf32> to vector<1x1x32xf32>
    tpu.vector_store %arg15[%c2_303, %c6_304, %c0_305], %290 {strides = array<i32>} : memref<16x9x32xf32, #tpu.memory_space<vmem>>, vector<1x1x32xf32>,
    %c36_306 = arith.constant 36 : index
    %c0_307 = arith.constant 0 : index
    %291 = vector.load %arg14[%c36_306, %c0_307] : memref<64x32xf32, #tpu.memory_space<vmem>>, vector<1x32xf32>
    %c2_308 = arith.constant 2 : index
    %c7_309 = arith.constant 7 : index
    %c0_310 = arith.constant 0 : index
    %292 = vector.load %arg15[%c2_308, %c7_309, %c0_310] : memref<16x9x32xf32, #tpu.memory_space<vmem>>, vector<1x1x32xf32>
    %293 = vector.shape_cast %292 : vector<1x1x32xf32> to vector<1x32xf32>
    %294 = vector.shape_cast %291 : vector<1x32xf32> to vector<1x1x32xf32>
    tpu.vector_store %arg15[%c2_308, %c7_309, %c0_310], %294 {strides = array<i32>} : memref<16x9x32xf32, #tpu.memory_space<vmem>>, vector<1x1x32xf32>,
    %c38 = arith.constant 38 : index
    %c0_311 = arith.constant 0 : index
    %295 = vector.load %arg14[%c38, %c0_311] : memref<64x32xf32, #tpu.memory_space<vmem>>, vector<1x32xf32>
    %c2_312 = arith.constant 2 : index
    %c8_313 = arith.constant 8 : index
    %c0_314 = arith.constant 0 : index
    %296 = vector.load %arg15[%c2_312, %c8_313, %c0_314] : memref<16x9x32xf32, #tpu.memory_space<vmem>>, vector<1x1x32xf32>
    %297 = vector.shape_cast %296 : vector<1x1x32xf32> to vector<1x32xf32>
    %298 = vector.shape_cast %295 : vector<1x32xf32> to vector<1x1x32xf32>
    tpu.vector_store %arg15[%c2_312, %c8_313, %c0_314], %298 {strides = array<i32>} : memref<16x9x32xf32, #tpu.memory_space<vmem>>, vector<1x1x32xf32>,
    %c3_315 = arith.constant 3 : index
    %c0_316 = arith.constant 0 : index
    %299 = vector.load %arg14[%c3_315, %c0_316] : memref<64x32xf32, #tpu.memory_space<vmem>>, vector<1x32xf32>
    %c3_317 = arith.constant 3 : index
    %c0_318 = arith.constant 0 : index
    %c0_319 = arith.constant 0 : index
    %300 = vector.load %arg15[%c3_317, %c0_318, %c0_319] : memref<16x9x32xf32, #tpu.memory_space<vmem>>, vector<1x1x32xf32>
    %301 = vector.shape_cast %300 : vector<1x1x32xf32> to vector<1x32xf32>
    %302 = vector.shape_cast %299 : vector<1x32xf32> to vector<1x1x32xf32>
    tpu.vector_store %arg15[%c3_317, %c0_318, %c0_319], %302 {strides = array<i32>} : memref<16x9x32xf32, #tpu.memory_space<vmem>>, vector<1x1x32xf32>,
    %c5_320 = arith.constant 5 : index
    %c0_321 = arith.constant 0 : index
    %303 = vector.load %arg14[%c5_320, %c0_321] : memref<64x32xf32, #tpu.memory_space<vmem>>, vector<1x32xf32>
    %c3_322 = arith.constant 3 : index
    %c1_323 = arith.constant 1 : index
    %c0_324 = arith.constant 0 : index
    %304 = vector.load %arg15[%c3_322, %c1_323, %c0_324] : memref<16x9x32xf32, #tpu.memory_space<vmem>>, vector<1x1x32xf32>
    %305 = vector.shape_cast %304 : vector<1x1x32xf32> to vector<1x32xf32>
    %306 = vector.shape_cast %303 : vector<1x32xf32> to vector<1x1x32xf32>
    tpu.vector_store %arg15[%c3_322, %c1_323, %c0_324], %306 {strides = array<i32>} : memref<16x9x32xf32, #tpu.memory_space<vmem>>, vector<1x1x32xf32>,
    %c7_325 = arith.constant 7 : index
    %c0_326 = arith.constant 0 : index
    %307 = vector.load %arg14[%c7_325, %c0_326] : memref<64x32xf32, #tpu.memory_space<vmem>>, vector<1x32xf32>
    %c3_327 = arith.constant 3 : index
    %c2_328 = arith.constant 2 : index
    %c0_329 = arith.constant 0 : index
    %308 = vector.load %arg15[%c3_327, %c2_328, %c0_329] : memref<16x9x32xf32, #tpu.memory_space<vmem>>, vector<1x1x32xf32>
    %309 = vector.shape_cast %308 : vector<1x1x32xf32> to vector<1x32xf32>
    %310 = vector.shape_cast %307 : vector<1x32xf32> to vector<1x1x32xf32>
    tpu.vector_store %arg15[%c3_327, %c2_328, %c0_329], %310 {strides = array<i32>} : memref<16x9x32xf32, #tpu.memory_space<vmem>>, vector<1x1x32xf32>,
    %c19_330 = arith.constant 19 : index
    %c0_331 = arith.constant 0 : index
    %311 = vector.load %arg14[%c19_330, %c0_331] : memref<64x32xf32, #tpu.memory_space<vmem>>, vector<1x32xf32>
    %c3_332 = arith.constant 3 : index
    %c3_333 = arith.constant 3 : index
    %c0_334 = arith.constant 0 : index
    %312 = vector.load %arg15[%c3_332, %c3_333, %c0_334] : memref<16x9x32xf32, #tpu.memory_space<vmem>>, vector<1x1x32xf32>
    %313 = vector.shape_cast %312 : vector<1x1x32xf32> to vector<1x32xf32>
    %314 = vector.shape_cast %311 : vector<1x32xf32> to vector<1x1x32xf32>
    tpu.vector_store %arg15[%c3_332, %c3_333, %c0_334], %314 {strides = array<i32>} : memref<16x9x32xf32, #tpu.memory_space<vmem>>, vector<1x1x32xf32>,
    %c21_335 = arith.constant 21 : index
    %c0_336 = arith.constant 0 : index
    %315 = vector.load %arg14[%c21_335, %c0_336] : memref<64x32xf32, #tpu.memory_space<vmem>>, vector<1x32xf32>
    %c3_337 = arith.constant 3 : index
    %c4_338 = arith.constant 4 : index
    %c0_339 = arith.constant 0 : index
    %316 = vector.load %arg15[%c3_337, %c4_338, %c0_339] : memref<16x9x32xf32, #tpu.memory_space<vmem>>, vector<1x1x32xf32>
    %317 = vector.shape_cast %316 : vector<1x1x32xf32> to vector<1x32xf32>
    %318 = vector.shape_cast %315 : vector<1x32xf32> to vector<1x1x32xf32>
    tpu.vector_store %arg15[%c3_337, %c4_338, %c0_339], %318 {strides = array<i32>} : memref<16x9x32xf32, #tpu.memory_space<vmem>>, vector<1x1x32xf32>,
    %c23 = arith.constant 23 : index
    %c0_340 = arith.constant 0 : index
    %319 = vector.load %arg14[%c23, %c0_340] : memref<64x32xf32, #tpu.memory_space<vmem>>, vector<1x32xf32>
    %c3_341 = arith.constant 3 : index
    %c5_342 = arith.constant 5 : index
    %c0_343 = arith.constant 0 : index
    %320 = vector.load %arg15[%c3_341, %c5_342, %c0_343] : memref<16x9x32xf32, #tpu.memory_space<vmem>>, vector<1x1x32xf32>
    %321 = vector.shape_cast %320 : vector<1x1x32xf32> to vector<1x32xf32>
    %322 = vector.shape_cast %319 : vector<1x32xf32> to vector<1x1x32xf32>
    tpu.vector_store %arg15[%c3_341, %c5_342, %c0_343], %322 {strides = array<i32>} : memref<16x9x32xf32, #tpu.memory_space<vmem>>, vector<1x1x32xf32>,
    %c35_344 = arith.constant 35 : index
    %c0_345 = arith.constant 0 : index
    %323 = vector.load %arg14[%c35_344, %c0_345] : memref<64x32xf32, #tpu.memory_space<vmem>>, vector<1x32xf32>
    %c3_346 = arith.constant 3 : index
    %c6_347 = arith.constant 6 : index
    %c0_348 = arith.constant 0 : index
    %324 = vector.load %arg15[%c3_346, %c6_347, %c0_348] : memref<16x9x32xf32, #tpu.memory_space<vmem>>, vector<1x1x32xf32>
    %325 = vector.shape_cast %324 : vector<1x1x32xf32> to vector<1x32xf32>
    %326 = vector.shape_cast %323 : vector<1x32xf32> to vector<1x1x32xf32>
    tpu.vector_store %arg15[%c3_346, %c6_347, %c0_348], %326 {strides = array<i32>} : memref<16x9x32xf32, #tpu.memory_space<vmem>>, vector<1x1x32xf32>,
    %c37_349 = arith.constant 37 : index
    %c0_350 = arith.constant 0 : index
    %327 = vector.load %arg14[%c37_349, %c0_350] : memref<64x32xf32, #tpu.memory_space<vmem>>, vector<1x32xf32>
    %c3_351 = arith.constant 3 : index
    %c7_352 = arith.constant 7 : index
    %c0_353 = arith.constant 0 : index
    %328 = vector.load %arg15[%c3_351, %c7_352, %c0_353] : memref<16x9x32xf32, #tpu.memory_space<vmem>>, vector<1x1x32xf32>
    %329 = vector.shape_cast %328 : vector<1x1x32xf32> to vector<1x32xf32>
    %330 = vector.shape_cast %327 : vector<1x32xf32> to vector<1x1x32xf32>
    tpu.vector_store %arg15[%c3_351, %c7_352, %c0_353], %330 {strides = array<i32>} : memref<16x9x32xf32, #tpu.memory_space<vmem>>, vector<1x1x32xf32>,
    %c39 = arith.constant 39 : index
    %c0_354 = arith.constant 0 : index
    %331 = vector.load %arg14[%c39, %c0_354] : memref<64x32xf32, #tpu.memory_space<vmem>>, vector<1x32xf32>
    %c3_355 = arith.constant 3 : index
    %c8_356 = arith.constant 8 : index
    %c0_357 = arith.constant 0 : index
    %332 = vector.load %arg15[%c3_355, %c8_356, %c0_357] : memref<16x9x32xf32, #tpu.memory_space<vmem>>, vector<1x1x32xf32>
    %333 = vector.shape_cast %332 : vector<1x1x32xf32> to vector<1x32xf32>
    %334 = vector.shape_cast %331 : vector<1x32xf32> to vector<1x1x32xf32>
    tpu.vector_store %arg15[%c3_355, %c8_356, %c0_357], %334 {strides = array<i32>} : memref<16x9x32xf32, #tpu.memory_space<vmem>>, vector<1x1x32xf32>,
    %c8_358 = arith.constant 8 : index
    %c0_359 = arith.constant 0 : index
    %335 = vector.load %arg14[%c8_358, %c0_359] : memref<64x32xf32, #tpu.memory_space<vmem>>, vector<1x32xf32>
    %c4_360 = arith.constant 4 : index
    %c0_361 = arith.constant 0 : index
    %c0_362 = arith.constant 0 : index
    %336 = vector.load %arg15[%c4_360, %c0_361, %c0_362] : memref<16x9x32xf32, #tpu.memory_space<vmem>>, vector<1x1x32xf32>
    %337 = vector.shape_cast %336 : vector<1x1x32xf32> to vector<1x32xf32>
    %338 = vector.shape_cast %335 : vector<1x32xf32> to vector<1x1x32xf32>
    tpu.vector_store %arg15[%c4_360, %c0_361, %c0_362], %338 {strides = array<i32>} : memref<16x9x32xf32, #tpu.memory_space<vmem>>, vector<1x1x32xf32>,
    %c10_363 = arith.constant 10 : index
    %c0_364 = arith.constant 0 : index
    %339 = vector.load %arg14[%c10_363, %c0_364] : memref<64x32xf32, #tpu.memory_space<vmem>>, vector<1x32xf32>
    %c4_365 = arith.constant 4 : index
    %c1_366 = arith.constant 1 : index
    %c0_367 = arith.constant 0 : index
    %340 = vector.load %arg15[%c4_365, %c1_366, %c0_367] : memref<16x9x32xf32, #tpu.memory_space<vmem>>, vector<1x1x32xf32>
    %341 = vector.shape_cast %340 : vector<1x1x32xf32> to vector<1x32xf32>
    %342 = vector.shape_cast %339 : vector<1x32xf32> to vector<1x1x32xf32>
    tpu.vector_store %arg15[%c4_365, %c1_366, %c0_367], %342 {strides = array<i32>} : memref<16x9x32xf32, #tpu.memory_space<vmem>>, vector<1x1x32xf32>,
    %c12 = arith.constant 12 : index
    %c0_368 = arith.constant 0 : index
    %343 = vector.load %arg14[%c12, %c0_368] : memref<64x32xf32, #tpu.memory_space<vmem>>, vector<1x32xf32>
    %c4_369 = arith.constant 4 : index
    %c2_370 = arith.constant 2 : index
    %c0_371 = arith.constant 0 : index
    %344 = vector.load %arg15[%c4_369, %c2_370, %c0_371] : memref<16x9x32xf32, #tpu.memory_space<vmem>>, vector<1x1x32xf32>
    %345 = vector.shape_cast %344 : vector<1x1x32xf32> to vector<1x32xf32>
    %346 = vector.shape_cast %343 : vector<1x32xf32> to vector<1x1x32xf32>
    tpu.vector_store %arg15[%c4_369, %c2_370, %c0_371], %346 {strides = array<i32>} : memref<16x9x32xf32, #tpu.memory_space<vmem>>, vector<1x1x32xf32>,
    %c24_372 = arith.constant 24 : index
    %c0_373 = arith.constant 0 : index
    %347 = vector.load %arg14[%c24_372, %c0_373] : memref<64x32xf32, #tpu.memory_space<vmem>>, vector<1x32xf32>
    %c4_374 = arith.constant 4 : index
    %c3_375 = arith.constant 3 : index
    %c0_376 = arith.constant 0 : index
    %348 = vector.load %arg15[%c4_374, %c3_375, %c0_376] : memref<16x9x32xf32, #tpu.memory_space<vmem>>, vector<1x1x32xf32>
    %349 = vector.shape_cast %348 : vector<1x1x32xf32> to vector<1x32xf32>
    %350 = vector.shape_cast %347 : vector<1x32xf32> to vector<1x1x32xf32>
    tpu.vector_store %arg15[%c4_374, %c3_375, %c0_376], %350 {strides = array<i32>} : memref<16x9x32xf32, #tpu.memory_space<vmem>>, vector<1x1x32xf32>,
    %c26 = arith.constant 26 : index
    %c0_377 = arith.constant 0 : index
    %351 = vector.load %arg14[%c26, %c0_377] : memref<64x32xf32, #tpu.memory_space<vmem>>, vector<1x32xf32>
    %c4_378 = arith.constant 4 : index
    %c4_379 = arith.constant 4 : index
    %c0_380 = arith.constant 0 : index
    %352 = vector.load %arg15[%c4_378, %c4_379, %c0_380] : memref<16x9x32xf32, #tpu.memory_space<vmem>>, vector<1x1x32xf32>
    %353 = vector.shape_cast %352 : vector<1x1x32xf32> to vector<1x32xf32>
    %354 = vector.shape_cast %351 : vector<1x32xf32> to vector<1x1x32xf32>
    tpu.vector_store %arg15[%c4_378, %c4_379, %c0_380], %354 {strides = array<i32>} : memref<16x9x32xf32, #tpu.memory_space<vmem>>, vector<1x1x32xf32>,
    %c28_381 = arith.constant 28 : index
    %c0_382 = arith.constant 0 : index
    %355 = vector.load %arg14[%c28_381, %c0_382] : memref<64x32xf32, #tpu.memory_space<vmem>>, vector<1x32xf32>
    %c4_383 = arith.constant 4 : index
    %c5_384 = arith.constant 5 : index
    %c0_385 = arith.constant 0 : index
    %356 = vector.load %arg15[%c4_383, %c5_384, %c0_385] : memref<16x9x32xf32, #tpu.memory_space<vmem>>, vector<1x1x32xf32>
    %357 = vector.shape_cast %356 : vector<1x1x32xf32> to vector<1x32xf32>
    %358 = vector.shape_cast %355 : vector<1x32xf32> to vector<1x1x32xf32>
    tpu.vector_store %arg15[%c4_383, %c5_384, %c0_385], %358 {strides = array<i32>} : memref<16x9x32xf32, #tpu.memory_space<vmem>>, vector<1x1x32xf32>,
    %c40_386 = arith.constant 40 : index
    %c0_387 = arith.constant 0 : index
    %359 = vector.load %arg14[%c40_386, %c0_387] : memref<64x32xf32, #tpu.memory_space<vmem>>, vector<1x32xf32>
    %c4_388 = arith.constant 4 : index
    %c6_389 = arith.constant 6 : index
    %c0_390 = arith.constant 0 : index
    %360 = vector.load %arg15[%c4_388, %c6_389, %c0_390] : memref<16x9x32xf32, #tpu.memory_space<vmem>>, vector<1x1x32xf32>
    %361 = vector.shape_cast %360 : vector<1x1x32xf32> to vector<1x32xf32>
    %362 = vector.shape_cast %359 : vector<1x32xf32> to vector<1x1x32xf32>
    tpu.vector_store %arg15[%c4_388, %c6_389, %c0_390], %362 {strides = array<i32>} : memref<16x9x32xf32, #tpu.memory_space<vmem>>, vector<1x1x32xf32>,
    %c42 = arith.constant 42 : index
    %c0_391 = arith.constant 0 : index
    %363 = vector.load %arg14[%c42, %c0_391] : memref<64x32xf32, #tpu.memory_space<vmem>>, vector<1x32xf32>
    %c4_392 = arith.constant 4 : index
    %c7_393 = arith.constant 7 : index
    %c0_394 = arith.constant 0 : index
    %364 = vector.load %arg15[%c4_392, %c7_393, %c0_394] : memref<16x9x32xf32, #tpu.memory_space<vmem>>, vector<1x1x32xf32>
    %365 = vector.shape_cast %364 : vector<1x1x32xf32> to vector<1x32xf32>
    %366 = vector.shape_cast %363 : vector<1x32xf32> to vector<1x1x32xf32>
    tpu.vector_store %arg15[%c4_392, %c7_393, %c0_394], %366 {strides = array<i32>} : memref<16x9x32xf32, #tpu.memory_space<vmem>>, vector<1x1x32xf32>,
    %c44 = arith.constant 44 : index
    %c0_395 = arith.constant 0 : index
    %367 = vector.load %arg14[%c44, %c0_395] : memref<64x32xf32, #tpu.memory_space<vmem>>, vector<1x32xf32>
    %c4_396 = arith.constant 4 : index
    %c8_397 = arith.constant 8 : index
    %c0_398 = arith.constant 0 : index
    %368 = vector.load %arg15[%c4_396, %c8_397, %c0_398] : memref<16x9x32xf32, #tpu.memory_space<vmem>>, vector<1x1x32xf32>
    %369 = vector.shape_cast %368 : vector<1x1x32xf32> to vector<1x32xf32>
    %370 = vector.shape_cast %367 : vector<1x32xf32> to vector<1x1x32xf32>
    tpu.vector_store %arg15[%c4_396, %c8_397, %c0_398], %370 {strides = array<i32>} : memref<16x9x32xf32, #tpu.memory_space<vmem>>, vector<1x1x32xf32>,
    %c9_399 = arith.constant 9 : index
    %c0_400 = arith.constant 0 : index
    %371 = vector.load %arg14[%c9_399, %c0_400] : memref<64x32xf32, #tpu.memory_space<vmem>>, vector<1x32xf32>
    %c5_401 = arith.constant 5 : index
    %c0_402 = arith.constant 0 : index
    %c0_403 = arith.constant 0 : index
    %372 = vector.load %arg15[%c5_401, %c0_402, %c0_403] : memref<16x9x32xf32, #tpu.memory_space<vmem>>, vector<1x1x32xf32>
    %373 = vector.shape_cast %372 : vector<1x1x32xf32> to vector<1x32xf32>
    %374 = vector.shape_cast %371 : vector<1x32xf32> to vector<1x1x32xf32>
    tpu.vector_store %arg15[%c5_401, %c0_402, %c0_403], %374 {strides = array<i32>} : memref<16x9x32xf32, #tpu.memory_space<vmem>>, vector<1x1x32xf32>,
    %c11 = arith.constant 11 : index
    %c0_404 = arith.constant 0 : index
    %375 = vector.load %arg14[%c11, %c0_404] : memref<64x32xf32, #tpu.memory_space<vmem>>, vector<1x32xf32>
    %c5_405 = arith.constant 5 : index
    %c1_406 = arith.constant 1 : index
    %c0_407 = arith.constant 0 : index
    %376 = vector.load %arg15[%c5_405, %c1_406, %c0_407] : memref<16x9x32xf32, #tpu.memory_space<vmem>>, vector<1x1x32xf32>
    %377 = vector.shape_cast %376 : vector<1x1x32xf32> to vector<1x32xf32>
    %378 = vector.shape_cast %375 : vector<1x32xf32> to vector<1x1x32xf32>
    tpu.vector_store %arg15[%c5_405, %c1_406, %c0_407], %378 {strides = array<i32>} : memref<16x9x32xf32, #tpu.memory_space<vmem>>, vector<1x1x32xf32>,
    %c13 = arith.constant 13 : index
    %c0_408 = arith.constant 0 : index
    %379 = vector.load %arg14[%c13, %c0_408] : memref<64x32xf32, #tpu.memory_space<vmem>>, vector<1x32xf32>
    %c5_409 = arith.constant 5 : index
    %c2_410 = arith.constant 2 : index
    %c0_411 = arith.constant 0 : index
    %380 = vector.load %arg15[%c5_409, %c2_410, %c0_411] : memref<16x9x32xf32, #tpu.memory_space<vmem>>, vector<1x1x32xf32>
    %381 = vector.shape_cast %380 : vector<1x1x32xf32> to vector<1x32xf32>
    %382 = vector.shape_cast %379 : vector<1x32xf32> to vector<1x1x32xf32>
    tpu.vector_store %arg15[%c5_409, %c2_410, %c0_411], %382 {strides = array<i32>} : memref<16x9x32xf32, #tpu.memory_space<vmem>>, vector<1x1x32xf32>,
    %c25 = arith.constant 25 : index
    %c0_412 = arith.constant 0 : index
    %383 = vector.load %arg14[%c25, %c0_412] : memref<64x32xf32, #tpu.memory_space<vmem>>, vector<1x32xf32>
    %c5_413 = arith.constant 5 : index
    %c3_414 = arith.constant 3 : index
    %c0_415 = arith.constant 0 : index
    %384 = vector.load %arg15[%c5_413, %c3_414, %c0_415] : memref<16x9x32xf32, #tpu.memory_space<vmem>>, vector<1x1x32xf32>
    %385 = vector.shape_cast %384 : vector<1x1x32xf32> to vector<1x32xf32>
    %386 = vector.shape_cast %383 : vector<1x32xf32> to vector<1x1x32xf32>
    tpu.vector_store %arg15[%c5_413, %c3_414, %c0_415], %386 {strides = array<i32>} : memref<16x9x32xf32, #tpu.memory_space<vmem>>, vector<1x1x32xf32>,
    %c27_416 = arith.constant 27 : index
    %c0_417 = arith.constant 0 : index
    %387 = vector.load %arg14[%c27_416, %c0_417] : memref<64x32xf32, #tpu.memory_space<vmem>>, vector<1x32xf32>
    %c5_418 = arith.constant 5 : index
    %c4_419 = arith.constant 4 : index
    %c0_420 = arith.constant 0 : index
    %388 = vector.load %arg15[%c5_418, %c4_419, %c0_420] : memref<16x9x32xf32, #tpu.memory_space<vmem>>, vector<1x1x32xf32>
    %389 = vector.shape_cast %388 : vector<1x1x32xf32> to vector<1x32xf32>
    %390 = vector.shape_cast %387 : vector<1x32xf32> to vector<1x1x32xf32>
    tpu.vector_store %arg15[%c5_418, %c4_419, %c0_420], %390 {strides = array<i32>} : memref<16x9x32xf32, #tpu.memory_space<vmem>>, vector<1x1x32xf32>,
    %c29 = arith.constant 29 : index
    %c0_421 = arith.constant 0 : index
    %391 = vector.load %arg14[%c29, %c0_421] : memref<64x32xf32, #tpu.memory_space<vmem>>, vector<1x32xf32>
    %c5_422 = arith.constant 5 : index
    %c5_423 = arith.constant 5 : index
    %c0_424 = arith.constant 0 : index
    %392 = vector.load %arg15[%c5_422, %c5_423, %c0_424] : memref<16x9x32xf32, #tpu.memory_space<vmem>>, vector<1x1x32xf32>
    %393 = vector.shape_cast %392 : vector<1x1x32xf32> to vector<1x32xf32>
    %394 = vector.shape_cast %391 : vector<1x32xf32> to vector<1x1x32xf32>
    tpu.vector_store %arg15[%c5_422, %c5_423, %c0_424], %394 {strides = array<i32>} : memref<16x9x32xf32, #tpu.memory_space<vmem>>, vector<1x1x32xf32>,
    %c41 = arith.constant 41 : index
    %c0_425 = arith.constant 0 : index
    %395 = vector.load %arg14[%c41, %c0_425] : memref<64x32xf32, #tpu.memory_space<vmem>>, vector<1x32xf32>
    %c5_426 = arith.constant 5 : index
    %c6_427 = arith.constant 6 : index
    %c0_428 = arith.constant 0 : index
    %396 = vector.load %arg15[%c5_426, %c6_427, %c0_428] : memref<16x9x32xf32, #tpu.memory_space<vmem>>, vector<1x1x32xf32>
    %397 = vector.shape_cast %396 : vector<1x1x32xf32> to vector<1x32xf32>
    %398 = vector.shape_cast %395 : vector<1x32xf32> to vector<1x1x32xf32>
    tpu.vector_store %arg15[%c5_426, %c6_427, %c0_428], %398 {strides = array<i32>} : memref<16x9x32xf32, #tpu.memory_space<vmem>>, vector<1x1x32xf32>,
    %c43 = arith.constant 43 : index
    %c0_429 = arith.constant 0 : index
    %399 = vector.load %arg14[%c43, %c0_429] : memref<64x32xf32, #tpu.memory_space<vmem>>, vector<1x32xf32>
    %c5_430 = arith.constant 5 : index
    %c7_431 = arith.constant 7 : index
    %c0_432 = arith.constant 0 : index
    %400 = vector.load %arg15[%c5_430, %c7_431, %c0_432] : memref<16x9x32xf32, #tpu.memory_space<vmem>>, vector<1x1x32xf32>
    %401 = vector.shape_cast %400 : vector<1x1x32xf32> to vector<1x32xf32>
    %402 = vector.shape_cast %399 : vector<1x32xf32> to vector<1x1x32xf32>
    tpu.vector_store %arg15[%c5_430, %c7_431, %c0_432], %402 {strides = array<i32>} : memref<16x9x32xf32, #tpu.memory_space<vmem>>, vector<1x1x32xf32>,
    %c45_433 = arith.constant 45 : index
    %c0_434 = arith.constant 0 : index
    %403 = vector.load %arg14[%c45_433, %c0_434] : memref<64x32xf32, #tpu.memory_space<vmem>>, vector<1x32xf32>
    %c5_435 = arith.constant 5 : index
    %c8_436 = arith.constant 8 : index
    %c0_437 = arith.constant 0 : index
    %404 = vector.load %arg15[%c5_435, %c8_436, %c0_437] : memref<16x9x32xf32, #tpu.memory_space<vmem>>, vector<1x1x32xf32>
    %405 = vector.shape_cast %404 : vector<1x1x32xf32> to vector<1x32xf32>
    %406 = vector.shape_cast %403 : vector<1x32xf32> to vector<1x1x32xf32>
    tpu.vector_store %arg15[%c5_435, %c8_436, %c0_437], %406 {strides = array<i32>} : memref<16x9x32xf32, #tpu.memory_space<vmem>>, vector<1x1x32xf32>,
    %c10_438 = arith.constant 10 : index
    %c0_439 = arith.constant 0 : index
    %407 = vector.load %arg14[%c10_438, %c0_439] : memref<64x32xf32, #tpu.memory_space<vmem>>, vector<1x32xf32>
    %c6_440 = arith.constant 6 : index
    %c0_441 = arith.constant 0 : index
    %c0_442 = arith.constant 0 : index
    %408 = vector.load %arg15[%c6_440, %c0_441, %c0_442] : memref<16x9x32xf32, #tpu.memory_space<vmem>>, vector<1x1x32xf32>
    %409 = vector.shape_cast %408 : vector<1x1x32xf32> to vector<1x32xf32>
    %410 = vector.shape_cast %407 : vector<1x32xf32> to vector<1x1x32xf32>
    tpu.vector_store %arg15[%c6_440, %c0_441, %c0_442], %410 {strides = array<i32>} : memref<16x9x32xf32, #tpu.memory_space<vmem>>, vector<1x1x32xf32>,
    %c12_443 = arith.constant 12 : index
    %c0_444 = arith.constant 0 : index
    %411 = vector.load %arg14[%c12_443, %c0_444] : memref<64x32xf32, #tpu.memory_space<vmem>>, vector<1x32xf32>
    %c6_445 = arith.constant 6 : index
    %c1_446 = arith.constant 1 : index
    %c0_447 = arith.constant 0 : index
    %412 = vector.load %arg15[%c6_445, %c1_446, %c0_447] : memref<16x9x32xf32, #tpu.memory_space<vmem>>, vector<1x1x32xf32>
    %413 = vector.shape_cast %412 : vector<1x1x32xf32> to vector<1x32xf32>
    %414 = vector.shape_cast %411 : vector<1x32xf32> to vector<1x1x32xf32>
    tpu.vector_store %arg15[%c6_445, %c1_446, %c0_447], %414 {strides = array<i32>} : memref<16x9x32xf32, #tpu.memory_space<vmem>>, vector<1x1x32xf32>,
    %c14 = arith.constant 14 : index
    %c0_448 = arith.constant 0 : index
    %415 = vector.load %arg14[%c14, %c0_448] : memref<64x32xf32, #tpu.memory_space<vmem>>, vector<1x32xf32>
    %c6_449 = arith.constant 6 : index
    %c2_450 = arith.constant 2 : index
    %c0_451 = arith.constant 0 : index
    %416 = vector.load %arg15[%c6_449, %c2_450, %c0_451] : memref<16x9x32xf32, #tpu.memory_space<vmem>>, vector<1x1x32xf32>
    %417 = vector.shape_cast %416 : vector<1x1x32xf32> to vector<1x32xf32>
    %418 = vector.shape_cast %415 : vector<1x32xf32> to vector<1x1x32xf32>
    tpu.vector_store %arg15[%c6_449, %c2_450, %c0_451], %418 {strides = array<i32>} : memref<16x9x32xf32, #tpu.memory_space<vmem>>, vector<1x1x32xf32>,
    %c26_452 = arith.constant 26 : index
    %c0_453 = arith.constant 0 : index
    %419 = vector.load %arg14[%c26_452, %c0_453] : memref<64x32xf32, #tpu.memory_space<vmem>>, vector<1x32xf32>
    %c6_454 = arith.constant 6 : index
    %c3_455 = arith.constant 3 : index
    %c0_456 = arith.constant 0 : index
    %420 = vector.load %arg15[%c6_454, %c3_455, %c0_456] : memref<16x9x32xf32, #tpu.memory_space<vmem>>, vector<1x1x32xf32>
    %421 = vector.shape_cast %420 : vector<1x1x32xf32> to vector<1x32xf32>
    %422 = vector.shape_cast %419 : vector<1x32xf32> to vector<1x1x32xf32>
    tpu.vector_store %arg15[%c6_454, %c3_455, %c0_456], %422 {strides = array<i32>} : memref<16x9x32xf32, #tpu.memory_space<vmem>>, vector<1x1x32xf32>,
    %c28_457 = arith.constant 28 : index
    %c0_458 = arith.constant 0 : index
    %423 = vector.load %arg14[%c28_457, %c0_458] : memref<64x32xf32, #tpu.memory_space<vmem>>, vector<1x32xf32>
    %c6_459 = arith.constant 6 : index
    %c4_460 = arith.constant 4 : index
    %c0_461 = arith.constant 0 : index
    %424 = vector.load %arg15[%c6_459, %c4_460, %c0_461] : memref<16x9x32xf32, #tpu.memory_space<vmem>>, vector<1x1x32xf32>
    %425 = vector.shape_cast %424 : vector<1x1x32xf32> to vector<1x32xf32>
    %426 = vector.shape_cast %423 : vector<1x32xf32> to vector<1x1x32xf32>
    tpu.vector_store %arg15[%c6_459, %c4_460, %c0_461], %426 {strides = array<i32>} : memref<16x9x32xf32, #tpu.memory_space<vmem>>, vector<1x1x32xf32>,
    %c30 = arith.constant 30 : index
    %c0_462 = arith.constant 0 : index
    %427 = vector.load %arg14[%c30, %c0_462] : memref<64x32xf32, #tpu.memory_space<vmem>>, vector<1x32xf32>
    %c6_463 = arith.constant 6 : index
    %c5_464 = arith.constant 5 : index
    %c0_465 = arith.constant 0 : index
    %428 = vector.load %arg15[%c6_463, %c5_464, %c0_465] : memref<16x9x32xf32, #tpu.memory_space<vmem>>, vector<1x1x32xf32>
    %429 = vector.shape_cast %428 : vector<1x1x32xf32> to vector<1x32xf32>
    %430 = vector.shape_cast %427 : vector<1x32xf32> to vector<1x1x32xf32>
    tpu.vector_store %arg15[%c6_463, %c5_464, %c0_465], %430 {strides = array<i32>} : memref<16x9x32xf32, #tpu.memory_space<vmem>>, vector<1x1x32xf32>,
    %c42_466 = arith.constant 42 : index
    %c0_467 = arith.constant 0 : index
    %431 = vector.load %arg14[%c42_466, %c0_467] : memref<64x32xf32, #tpu.memory_space<vmem>>, vector<1x32xf32>
    %c6_468 = arith.constant 6 : index
    %c6_469 = arith.constant 6 : index
    %c0_470 = arith.constant 0 : index
    %432 = vector.load %arg15[%c6_468, %c6_469, %c0_470] : memref<16x9x32xf32, #tpu.memory_space<vmem>>, vector<1x1x32xf32>
    %433 = vector.shape_cast %432 : vector<1x1x32xf32> to vector<1x32xf32>
    %434 = vector.shape_cast %431 : vector<1x32xf32> to vector<1x1x32xf32>
    tpu.vector_store %arg15[%c6_468, %c6_469, %c0_470], %434 {strides = array<i32>} : memref<16x9x32xf32, #tpu.memory_space<vmem>>, vector<1x1x32xf32>,
    %c44_471 = arith.constant 44 : index
    %c0_472 = arith.constant 0 : index
    %435 = vector.load %arg14[%c44_471, %c0_472] : memref<64x32xf32, #tpu.memory_space<vmem>>, vector<1x32xf32>
    %c6_473 = arith.constant 6 : index
    %c7_474 = arith.constant 7 : index
    %c0_475 = arith.constant 0 : index
    %436 = vector.load %arg15[%c6_473, %c7_474, %c0_475] : memref<16x9x32xf32, #tpu.memory_space<vmem>>, vector<1x1x32xf32>
    %437 = vector.shape_cast %436 : vector<1x1x32xf32> to vector<1x32xf32>
    %438 = vector.shape_cast %435 : vector<1x32xf32> to vector<1x1x32xf32>
    tpu.vector_store %arg15[%c6_473, %c7_474, %c0_475], %438 {strides = array<i32>} : memref<16x9x32xf32, #tpu.memory_space<vmem>>, vector<1x1x32xf32>,
    %c46_476 = arith.constant 46 : index
    %c0_477 = arith.constant 0 : index
    %439 = vector.load %arg14[%c46_476, %c0_477] : memref<64x32xf32, #tpu.memory_space<vmem>>, vector<1x32xf32>
    %c6_478 = arith.constant 6 : index
    %c8_479 = arith.constant 8 : index
    %c0_480 = arith.constant 0 : index
    %440 = vector.load %arg15[%c6_478, %c8_479, %c0_480] : memref<16x9x32xf32, #tpu.memory_space<vmem>>, vector<1x1x32xf32>
    %441 = vector.shape_cast %440 : vector<1x1x32xf32> to vector<1x32xf32>
    %442 = vector.shape_cast %439 : vector<1x32xf32> to vector<1x1x32xf32>
    tpu.vector_store %arg15[%c6_478, %c8_479, %c0_480], %442 {strides = array<i32>} : memref<16x9x32xf32, #tpu.memory_space<vmem>>, vector<1x1x32xf32>,
    %c11_481 = arith.constant 11 : index
    %c0_482 = arith.constant 0 : index
    %443 = vector.load %arg14[%c11_481, %c0_482] : memref<64x32xf32, #tpu.memory_space<vmem>>, vector<1x32xf32>
    %c7_483 = arith.constant 7 : index
    %c0_484 = arith.constant 0 : index
    %c0_485 = arith.constant 0 : index
    %444 = vector.load %arg15[%c7_483, %c0_484, %c0_485] : memref<16x9x32xf32, #tpu.memory_space<vmem>>, vector<1x1x32xf32>
    %445 = vector.shape_cast %444 : vector<1x1x32xf32> to vector<1x32xf32>
    %446 = vector.shape_cast %443 : vector<1x32xf32> to vector<1x1x32xf32>
    tpu.vector_store %arg15[%c7_483, %c0_484, %c0_485], %446 {strides = array<i32>} : memref<16x9x32xf32, #tpu.memory_space<vmem>>, vector<1x1x32xf32>,
    %c13_486 = arith.constant 13 : index
    %c0_487 = arith.constant 0 : index
    %447 = vector.load %arg14[%c13_486, %c0_487] : memref<64x32xf32, #tpu.memory_space<vmem>>, vector<1x32xf32>
    %c7_488 = arith.constant 7 : index
    %c1_489 = arith.constant 1 : index
    %c0_490 = arith.constant 0 : index
    %448 = vector.load %arg15[%c7_488, %c1_489, %c0_490] : memref<16x9x32xf32, #tpu.memory_space<vmem>>, vector<1x1x32xf32>
    %449 = vector.shape_cast %448 : vector<1x1x32xf32> to vector<1x32xf32>
    %450 = vector.shape_cast %447 : vector<1x32xf32> to vector<1x1x32xf32>
    tpu.vector_store %arg15[%c7_488, %c1_489, %c0_490], %450 {strides = array<i32>} : memref<16x9x32xf32, #tpu.memory_space<vmem>>, vector<1x1x32xf32>,
    %c15 = arith.constant 15 : index
    %c0_491 = arith.constant 0 : index
    %451 = vector.load %arg14[%c15, %c0_491] : memref<64x32xf32, #tpu.memory_space<vmem>>, vector<1x32xf32>
    %c7_492 = arith.constant 7 : index
    %c2_493 = arith.constant 2 : index
    %c0_494 = arith.constant 0 : index
    %452 = vector.load %arg15[%c7_492, %c2_493, %c0_494] : memref<16x9x32xf32, #tpu.memory_space<vmem>>, vector<1x1x32xf32>
    %453 = vector.shape_cast %452 : vector<1x1x32xf32> to vector<1x32xf32>
    %454 = vector.shape_cast %451 : vector<1x32xf32> to vector<1x1x32xf32>
    tpu.vector_store %arg15[%c7_492, %c2_493, %c0_494], %454 {strides = array<i32>} : memref<16x9x32xf32, #tpu.memory_space<vmem>>, vector<1x1x32xf32>,
    %c27_495 = arith.constant 27 : index
    %c0_496 = arith.constant 0 : index
    %455 = vector.load %arg14[%c27_495, %c0_496] : memref<64x32xf32, #tpu.memory_space<vmem>>, vector<1x32xf32>
    %c7_497 = arith.constant 7 : index
    %c3_498 = arith.constant 3 : index
    %c0_499 = arith.constant 0 : index
    %456 = vector.load %arg15[%c7_497, %c3_498, %c0_499] : memref<16x9x32xf32, #tpu.memory_space<vmem>>, vector<1x1x32xf32>
    %457 = vector.shape_cast %456 : vector<1x1x32xf32> to vector<1x32xf32>
    %458 = vector.shape_cast %455 : vector<1x32xf32> to vector<1x1x32xf32>
    tpu.vector_store %arg15[%c7_497, %c3_498, %c0_499], %458 {strides = array<i32>} : memref<16x9x32xf32, #tpu.memory_space<vmem>>, vector<1x1x32xf32>,
    %c29_500 = arith.constant 29 : index
    %c0_501 = arith.constant 0 : index
    %459 = vector.load %arg14[%c29_500, %c0_501] : memref<64x32xf32, #tpu.memory_space<vmem>>, vector<1x32xf32>
    %c7_502 = arith.constant 7 : index
    %c4_503 = arith.constant 4 : index
    %c0_504 = arith.constant 0 : index
    %460 = vector.load %arg15[%c7_502, %c4_503, %c0_504] : memref<16x9x32xf32, #tpu.memory_space<vmem>>, vector<1x1x32xf32>
    %461 = vector.shape_cast %460 : vector<1x1x32xf32> to vector<1x32xf32>
    %462 = vector.shape_cast %459 : vector<1x32xf32> to vector<1x1x32xf32>
    tpu.vector_store %arg15[%c7_502, %c4_503, %c0_504], %462 {strides = array<i32>} : memref<16x9x32xf32, #tpu.memory_space<vmem>>, vector<1x1x32xf32>,
    %c31 = arith.constant 31 : index
    %c0_505 = arith.constant 0 : index
    %463 = vector.load %arg14[%c31, %c0_505] : memref<64x32xf32, #tpu.memory_space<vmem>>, vector<1x32xf32>
    %c7_506 = arith.constant 7 : index
    %c5_507 = arith.constant 5 : index
    %c0_508 = arith.constant 0 : index
    %464 = vector.load %arg15[%c7_506, %c5_507, %c0_508] : memref<16x9x32xf32, #tpu.memory_space<vmem>>, vector<1x1x32xf32>
    %465 = vector.shape_cast %464 : vector<1x1x32xf32> to vector<1x32xf32>
    %466 = vector.shape_cast %463 : vector<1x32xf32> to vector<1x1x32xf32>
    tpu.vector_store %arg15[%c7_506, %c5_507, %c0_508], %466 {strides = array<i32>} : memref<16x9x32xf32, #tpu.memory_space<vmem>>, vector<1x1x32xf32>,
    %c43_509 = arith.constant 43 : index
    %c0_510 = arith.constant 0 : index
    %467 = vector.load %arg14[%c43_509, %c0_510] : memref<64x32xf32, #tpu.memory_space<vmem>>, vector<1x32xf32>
    %c7_511 = arith.constant 7 : index
    %c6_512 = arith.constant 6 : index
    %c0_513 = arith.constant 0 : index
    %468 = vector.load %arg15[%c7_511, %c6_512, %c0_513] : memref<16x9x32xf32, #tpu.memory_space<vmem>>, vector<1x1x32xf32>
    %469 = vector.shape_cast %468 : vector<1x1x32xf32> to vector<1x32xf32>
    %470 = vector.shape_cast %467 : vector<1x32xf32> to vector<1x1x32xf32>
    tpu.vector_store %arg15[%c7_511, %c6_512, %c0_513], %470 {strides = array<i32>} : memref<16x9x32xf32, #tpu.memory_space<vmem>>, vector<1x1x32xf32>,
    %c45_514 = arith.constant 45 : index
    %c0_515 = arith.constant 0 : index
    %471 = vector.load %arg14[%c45_514, %c0_515] : memref<64x32xf32, #tpu.memory_space<vmem>>, vector<1x32xf32>
    %c7_516 = arith.constant 7 : index
    %c7_517 = arith.constant 7 : index
    %c0_518 = arith.constant 0 : index
    %472 = vector.load %arg15[%c7_516, %c7_517, %c0_518] : memref<16x9x32xf32, #tpu.memory_space<vmem>>, vector<1x1x32xf32>
    %473 = vector.shape_cast %472 : vector<1x1x32xf32> to vector<1x32xf32>
    %474 = vector.shape_cast %471 : vector<1x32xf32> to vector<1x1x32xf32>
    tpu.vector_store %arg15[%c7_516, %c7_517, %c0_518], %474 {strides = array<i32>} : memref<16x9x32xf32, #tpu.memory_space<vmem>>, vector<1x1x32xf32>,
    %c47 = arith.constant 47 : index
    %c0_519 = arith.constant 0 : index
    %475 = vector.load %arg14[%c47, %c0_519] : memref<64x32xf32, #tpu.memory_space<vmem>>, vector<1x32xf32>
    %c7_520 = arith.constant 7 : index
    %c8_521 = arith.constant 8 : index
    %c0_522 = arith.constant 0 : index
    %476 = vector.load %arg15[%c7_520, %c8_521, %c0_522] : memref<16x9x32xf32, #tpu.memory_space<vmem>>, vector<1x1x32xf32>
    %477 = vector.shape_cast %476 : vector<1x1x32xf32> to vector<1x32xf32>
    %478 = vector.shape_cast %475 : vector<1x32xf32> to vector<1x1x32xf32>
    tpu.vector_store %arg15[%c7_520, %c8_521, %c0_522], %478 {strides = array<i32>} : memref<16x9x32xf32, #tpu.memory_space<vmem>>, vector<1x1x32xf32>,
    %c16_523 = arith.constant 16 : index
    %c0_524 = arith.constant 0 : index
    %479 = vector.load %arg14[%c16_523, %c0_524] : memref<64x32xf32, #tpu.memory_space<vmem>>, vector<1x32xf32>
    %c8_525 = arith.constant 8 : index
    %c0_526 = arith.constant 0 : index
    %c0_527 = arith.constant 0 : index
    %480 = vector.load %arg15[%c8_525, %c0_526, %c0_527] : memref<16x9x32xf32, #tpu.memory_space<vmem>>, vector<1x1x32xf32>
    %481 = vector.shape_cast %480 : vector<1x1x32xf32> to vector<1x32xf32>
    %482 = vector.shape_cast %479 : vector<1x32xf32> to vector<1x1x32xf32>
    tpu.vector_store %arg15[%c8_525, %c0_526, %c0_527], %482 {strides = array<i32>} : memref<16x9x32xf32, #tpu.memory_space<vmem>>, vector<1x1x32xf32>,
    %c18_528 = arith.constant 18 : index
    %c0_529 = arith.constant 0 : index
    %483 = vector.load %arg14[%c18_528, %c0_529] : memref<64x32xf32, #tpu.memory_space<vmem>>, vector<1x32xf32>
    %c8_530 = arith.constant 8 : index
    %c1_531 = arith.constant 1 : index
    %c0_532 = arith.constant 0 : index
    %484 = vector.load %arg15[%c8_530, %c1_531, %c0_532] : memref<16x9x32xf32, #tpu.memory_space<vmem>>, vector<1x1x32xf32>
    %485 = vector.shape_cast %484 : vector<1x1x32xf32> to vector<1x32xf32>
    %486 = vector.shape_cast %483 : vector<1x32xf32> to vector<1x1x32xf32>
    tpu.vector_store %arg15[%c8_530, %c1_531, %c0_532], %486 {strides = array<i32>} : memref<16x9x32xf32, #tpu.memory_space<vmem>>, vector<1x1x32xf32>,
    %c20_533 = arith.constant 20 : index
    %c0_534 = arith.constant 0 : index
    %487 = vector.load %arg14[%c20_533, %c0_534] : memref<64x32xf32, #tpu.memory_space<vmem>>, vector<1x32xf32>
    %c8_535 = arith.constant 8 : index
    %c2_536 = arith.constant 2 : index
    %c0_537 = arith.constant 0 : index
    %488 = vector.load %arg15[%c8_535, %c2_536, %c0_537] : memref<16x9x32xf32, #tpu.memory_space<vmem>>, vector<1x1x32xf32>
    %489 = vector.shape_cast %488 : vector<1x1x32xf32> to vector<1x32xf32>
    %490 = vector.shape_cast %487 : vector<1x32xf32> to vector<1x1x32xf32>
    tpu.vector_store %arg15[%c8_535, %c2_536, %c0_537], %490 {strides = array<i32>} : memref<16x9x32xf32, #tpu.memory_space<vmem>>, vector<1x1x32xf32>,
    %c32_538 = arith.constant 32 : index
    %c0_539 = arith.constant 0 : index
    %491 = vector.load %arg14[%c32_538, %c0_539] : memref<64x32xf32, #tpu.memory_space<vmem>>, vector<1x32xf32>
    %c8_540 = arith.constant 8 : index
    %c3_541 = arith.constant 3 : index
    %c0_542 = arith.constant 0 : index
    %492 = vector.load %arg15[%c8_540, %c3_541, %c0_542] : memref<16x9x32xf32, #tpu.memory_space<vmem>>, vector<1x1x32xf32>
    %493 = vector.shape_cast %492 : vector<1x1x32xf32> to vector<1x32xf32>
    %494 = vector.shape_cast %491 : vector<1x32xf32> to vector<1x1x32xf32>
    tpu.vector_store %arg15[%c8_540, %c3_541, %c0_542], %494 {strides = array<i32>} : memref<16x9x32xf32, #tpu.memory_space<vmem>>, vector<1x1x32xf32>,
    %c34_543 = arith.constant 34 : index
    %c0_544 = arith.constant 0 : index
    %495 = vector.load %arg14[%c34_543, %c0_544] : memref<64x32xf32, #tpu.memory_space<vmem>>, vector<1x32xf32>
    %c8_545 = arith.constant 8 : index
    %c4_546 = arith.constant 4 : index
    %c0_547 = arith.constant 0 : index
    %496 = vector.load %arg15[%c8_545, %c4_546, %c0_547] : memref<16x9x32xf32, #tpu.memory_space<vmem>>, vector<1x1x32xf32>
    %497 = vector.shape_cast %496 : vector<1x1x32xf32> to vector<1x32xf32>
    %498 = vector.shape_cast %495 : vector<1x32xf32> to vector<1x1x32xf32>
    tpu.vector_store %arg15[%c8_545, %c4_546, %c0_547], %498 {strides = array<i32>} : memref<16x9x32xf32, #tpu.memory_space<vmem>>, vector<1x1x32xf32>,
    %c36_548 = arith.constant 36 : index
    %c0_549 = arith.constant 0 : index
    %499 = vector.load %arg14[%c36_548, %c0_549] : memref<64x32xf32, #tpu.memory_space<vmem>>, vector<1x32xf32>
    %c8_550 = arith.constant 8 : index
    %c5_551 = arith.constant 5 : index
    %c0_552 = arith.constant 0 : index
    %500 = vector.load %arg15[%c8_550, %c5_551, %c0_552] : memref<16x9x32xf32, #tpu.memory_space<vmem>>, vector<1x1x32xf32>
    %501 = vector.shape_cast %500 : vector<1x1x32xf32> to vector<1x32xf32>
    %502 = vector.shape_cast %499 : vector<1x32xf32> to vector<1x1x32xf32>
    tpu.vector_store %arg15[%c8_550, %c5_551, %c0_552], %502 {strides = array<i32>} : memref<16x9x32xf32, #tpu.memory_space<vmem>>, vector<1x1x32xf32>,
    %c48_553 = arith.constant 48 : index
    %c0_554 = arith.constant 0 : index
    %503 = vector.load %arg14[%c48_553, %c0_554] : memref<64x32xf32, #tpu.memory_space<vmem>>, vector<1x32xf32>
    %c8_555 = arith.constant 8 : index
    %c6_556 = arith.constant 6 : index
    %c0_557 = arith.constant 0 : index
    %504 = vector.load %arg15[%c8_555, %c6_556, %c0_557] : memref<16x9x32xf32, #tpu.memory_space<vmem>>, vector<1x1x32xf32>
    %505 = vector.shape_cast %504 : vector<1x1x32xf32> to vector<1x32xf32>
    %506 = vector.shape_cast %503 : vector<1x32xf32> to vector<1x1x32xf32>
    tpu.vector_store %arg15[%c8_555, %c6_556, %c0_557], %506 {strides = array<i32>} : memref<16x9x32xf32, #tpu.memory_space<vmem>>, vector<1x1x32xf32>,
    %c50 = arith.constant 50 : index
    %c0_558 = arith.constant 0 : index
    %507 = vector.load %arg14[%c50, %c0_558] : memref<64x32xf32, #tpu.memory_space<vmem>>, vector<1x32xf32>
    %c8_559 = arith.constant 8 : index
    %c7_560 = arith.constant 7 : index
    %c0_561 = arith.constant 0 : index
    %508 = vector.load %arg15[%c8_559, %c7_560, %c0_561] : memref<16x9x32xf32, #tpu.memory_space<vmem>>, vector<1x1x32xf32>
    %509 = vector.shape_cast %508 : vector<1x1x32xf32> to vector<1x32xf32>
    %510 = vector.shape_cast %507 : vector<1x32xf32> to vector<1x1x32xf32>
    tpu.vector_store %arg15[%c8_559, %c7_560, %c0_561], %510 {strides = array<i32>} : memref<16x9x32xf32, #tpu.memory_space<vmem>>, vector<1x1x32xf32>,
    %c52 = arith.constant 52 : index
    %c0_562 = arith.constant 0 : index
    %511 = vector.load %arg14[%c52, %c0_562] : memref<64x32xf32, #tpu.memory_space<vmem>>, vector<1x32xf32>
    %c8_563 = arith.constant 8 : index
    %c8_564 = arith.constant 8 : index
    %c0_565 = arith.constant 0 : index
    %512 = vector.load %arg15[%c8_563, %c8_564, %c0_565] : memref<16x9x32xf32, #tpu.memory_space<vmem>>, vector<1x1x32xf32>
    %513 = vector.shape_cast %512 : vector<1x1x32xf32> to vector<1x32xf32>
    %514 = vector.shape_cast %511 : vector<1x32xf32> to vector<1x1x32xf32>
    tpu.vector_store %arg15[%c8_563, %c8_564, %c0_565], %514 {strides = array<i32>} : memref<16x9x32xf32, #tpu.memory_space<vmem>>, vector<1x1x32xf32>,
    %c17_566 = arith.constant 17 : index
    %c0_567 = arith.constant 0 : index
    %515 = vector.load %arg14[%c17_566, %c0_567] : memref<64x32xf32, #tpu.memory_space<vmem>>, vector<1x32xf32>
    %c9_568 = arith.constant 9 : index
    %c0_569 = arith.constant 0 : index
    %c0_570 = arith.constant 0 : index
    %516 = vector.load %arg15[%c9_568, %c0_569, %c0_570] : memref<16x9x32xf32, #tpu.memory_space<vmem>>, vector<1x1x32xf32>
    %517 = vector.shape_cast %516 : vector<1x1x32xf32> to vector<1x32xf32>
    %518 = vector.shape_cast %515 : vector<1x32xf32> to vector<1x1x32xf32>
    tpu.vector_store %arg15[%c9_568, %c0_569, %c0_570], %518 {strides = array<i32>} : memref<16x9x32xf32, #tpu.memory_space<vmem>>, vector<1x1x32xf32>,
    %c19_571 = arith.constant 19 : index
    %c0_572 = arith.constant 0 : index
    %519 = vector.load %arg14[%c19_571, %c0_572] : memref<64x32xf32, #tpu.memory_space<vmem>>, vector<1x32xf32>
    %c9_573 = arith.constant 9 : index
    %c1_574 = arith.constant 1 : index
    %c0_575 = arith.constant 0 : index
    %520 = vector.load %arg15[%c9_573, %c1_574, %c0_575] : memref<16x9x32xf32, #tpu.memory_space<vmem>>, vector<1x1x32xf32>
    %521 = vector.shape_cast %520 : vector<1x1x32xf32> to vector<1x32xf32>
    %522 = vector.shape_cast %519 : vector<1x32xf32> to vector<1x1x32xf32>
    tpu.vector_store %arg15[%c9_573, %c1_574, %c0_575], %522 {strides = array<i32>} : memref<16x9x32xf32, #tpu.memory_space<vmem>>, vector<1x1x32xf32>,
    %c21_576 = arith.constant 21 : index
    %c0_577 = arith.constant 0 : index
    %523 = vector.load %arg14[%c21_576, %c0_577] : memref<64x32xf32, #tpu.memory_space<vmem>>, vector<1x32xf32>
    %c9_578 = arith.constant 9 : index
    %c2_579 = arith.constant 2 : index
    %c0_580 = arith.constant 0 : index
    %524 = vector.load %arg15[%c9_578, %c2_579, %c0_580] : memref<16x9x32xf32, #tpu.memory_space<vmem>>, vector<1x1x32xf32>
    %525 = vector.shape_cast %524 : vector<1x1x32xf32> to vector<1x32xf32>
    %526 = vector.shape_cast %523 : vector<1x32xf32> to vector<1x1x32xf32>
    tpu.vector_store %arg15[%c9_578, %c2_579, %c0_580], %526 {strides = array<i32>} : memref<16x9x32xf32, #tpu.memory_space<vmem>>, vector<1x1x32xf32>,
    %c33_581 = arith.constant 33 : index
    %c0_582 = arith.constant 0 : index
    %527 = vector.load %arg14[%c33_581, %c0_582] : memref<64x32xf32, #tpu.memory_space<vmem>>, vector<1x32xf32>
    %c9_583 = arith.constant 9 : index
    %c3_584 = arith.constant 3 : index
    %c0_585 = arith.constant 0 : index
    %528 = vector.load %arg15[%c9_583, %c3_584, %c0_585] : memref<16x9x32xf32, #tpu.memory_space<vmem>>, vector<1x1x32xf32>
    %529 = vector.shape_cast %528 : vector<1x1x32xf32> to vector<1x32xf32>
    %530 = vector.shape_cast %527 : vector<1x32xf32> to vector<1x1x32xf32>
    tpu.vector_store %arg15[%c9_583, %c3_584, %c0_585], %530 {strides = array<i32>} : memref<16x9x32xf32, #tpu.memory_space<vmem>>, vector<1x1x32xf32>,
    %c35_586 = arith.constant 35 : index
    %c0_587 = arith.constant 0 : index
    %531 = vector.load %arg14[%c35_586, %c0_587] : memref<64x32xf32, #tpu.memory_space<vmem>>, vector<1x32xf32>
    %c9_588 = arith.constant 9 : index
    %c4_589 = arith.constant 4 : index
    %c0_590 = arith.constant 0 : index
    %532 = vector.load %arg15[%c9_588, %c4_589, %c0_590] : memref<16x9x32xf32, #tpu.memory_space<vmem>>, vector<1x1x32xf32>
    %533 = vector.shape_cast %532 : vector<1x1x32xf32> to vector<1x32xf32>
    %534 = vector.shape_cast %531 : vector<1x32xf32> to vector<1x1x32xf32>
    tpu.vector_store %arg15[%c9_588, %c4_589, %c0_590], %534 {strides = array<i32>} : memref<16x9x32xf32, #tpu.memory_space<vmem>>, vector<1x1x32xf32>,
    %c37_591 = arith.constant 37 : index
    %c0_592 = arith.constant 0 : index
    %535 = vector.load %arg14[%c37_591, %c0_592] : memref<64x32xf32, #tpu.memory_space<vmem>>, vector<1x32xf32>
    %c9_593 = arith.constant 9 : index
    %c5_594 = arith.constant 5 : index
    %c0_595 = arith.constant 0 : index
    %536 = vector.load %arg15[%c9_593, %c5_594, %c0_595] : memref<16x9x32xf32, #tpu.memory_space<vmem>>, vector<1x1x32xf32>
    %537 = vector.shape_cast %536 : vector<1x1x32xf32> to vector<1x32xf32>
    %538 = vector.shape_cast %535 : vector<1x32xf32> to vector<1x1x32xf32>
    tpu.vector_store %arg15[%c9_593, %c5_594, %c0_595], %538 {strides = array<i32>} : memref<16x9x32xf32, #tpu.memory_space<vmem>>, vector<1x1x32xf32>,
    %c49 = arith.constant 49 : index
    %c0_596 = arith.constant 0 : index
    %539 = vector.load %arg14[%c49, %c0_596] : memref<64x32xf32, #tpu.memory_space<vmem>>, vector<1x32xf32>
    %c9_597 = arith.constant 9 : index
    %c6_598 = arith.constant 6 : index
    %c0_599 = arith.constant 0 : index
    %540 = vector.load %arg15[%c9_597, %c6_598, %c0_599] : memref<16x9x32xf32, #tpu.memory_space<vmem>>, vector<1x1x32xf32>
    %541 = vector.shape_cast %540 : vector<1x1x32xf32> to vector<1x32xf32>
    %542 = vector.shape_cast %539 : vector<1x32xf32> to vector<1x1x32xf32>
    tpu.vector_store %arg15[%c9_597, %c6_598, %c0_599], %542 {strides = array<i32>} : memref<16x9x32xf32, #tpu.memory_space<vmem>>, vector<1x1x32xf32>,
    %c51 = arith.constant 51 : index
    %c0_600 = arith.constant 0 : index
    %543 = vector.load %arg14[%c51, %c0_600] : memref<64x32xf32, #tpu.memory_space<vmem>>, vector<1x32xf32>
    %c9_601 = arith.constant 9 : index
    %c7_602 = arith.constant 7 : index
    %c0_603 = arith.constant 0 : index
    %544 = vector.load %arg15[%c9_601, %c7_602, %c0_603] : memref<16x9x32xf32, #tpu.memory_space<vmem>>, vector<1x1x32xf32>
    %545 = vector.shape_cast %544 : vector<1x1x32xf32> to vector<1x32xf32>
    %546 = vector.shape_cast %543 : vector<1x32xf32> to vector<1x1x32xf32>
    tpu.vector_store %arg15[%c9_601, %c7_602, %c0_603], %546 {strides = array<i32>} : memref<16x9x32xf32, #tpu.memory_space<vmem>>, vector<1x1x32xf32>,
    %c53 = arith.constant 53 : index
    %c0_604 = arith.constant 0 : index
    %547 = vector.load %arg14[%c53, %c0_604] : memref<64x32xf32, #tpu.memory_space<vmem>>, vector<1x32xf32>
    %c9_605 = arith.constant 9 : index
    %c8_606 = arith.constant 8 : index
    %c0_607 = arith.constant 0 : index
    %548 = vector.load %arg15[%c9_605, %c8_606, %c0_607] : memref<16x9x32xf32, #tpu.memory_space<vmem>>, vector<1x1x32xf32>
    %549 = vector.shape_cast %548 : vector<1x1x32xf32> to vector<1x32xf32>
    %550 = vector.shape_cast %547 : vector<1x32xf32> to vector<1x1x32xf32>
    tpu.vector_store %arg15[%c9_605, %c8_606, %c0_607], %550 {strides = array<i32>} : memref<16x9x32xf32, #tpu.memory_space<vmem>>, vector<1x1x32xf32>,
    %c18_608 = arith.constant 18 : index
    %c0_609 = arith.constant 0 : index
    %551 = vector.load %arg14[%c18_608, %c0_609] : memref<64x32xf32, #tpu.memory_space<vmem>>, vector<1x32xf32>
    %c10_610 = arith.constant 10 : index
    %c0_611 = arith.constant 0 : index
    %c0_612 = arith.constant 0 : index
    %552 = vector.load %arg15[%c10_610, %c0_611, %c0_612] : memref<16x9x32xf32, #tpu.memory_space<vmem>>, vector<1x1x32xf32>
    %553 = vector.shape_cast %552 : vector<1x1x32xf32> to vector<1x32xf32>
    %554 = vector.shape_cast %551 : vector<1x32xf32> to vector<1x1x32xf32>
    tpu.vector_store %arg15[%c10_610, %c0_611, %c0_612], %554 {strides = array<i32>} : memref<16x9x32xf32, #tpu.memory_space<vmem>>, vector<1x1x32xf32>,
    %c20_613 = arith.constant 20 : index
    %c0_614 = arith.constant 0 : index
    %555 = vector.load %arg14[%c20_613, %c0_614] : memref<64x32xf32, #tpu.memory_space<vmem>>, vector<1x32xf32>
    %c10_615 = arith.constant 10 : index
    %c1_616 = arith.constant 1 : index
    %c0_617 = arith.constant 0 : index
    %556 = vector.load %arg15[%c10_615, %c1_616, %c0_617] : memref<16x9x32xf32, #tpu.memory_space<vmem>>, vector<1x1x32xf32>
    %557 = vector.shape_cast %556 : vector<1x1x32xf32> to vector<1x32xf32>
    %558 = vector.shape_cast %555 : vector<1x32xf32> to vector<1x1x32xf32>
    tpu.vector_store %arg15[%c10_615, %c1_616, %c0_617], %558 {strides = array<i32>} : memref<16x9x32xf32, #tpu.memory_space<vmem>>, vector<1x1x32xf32>,
    %c22_618 = arith.constant 22 : index
    %c0_619 = arith.constant 0 : index
    %559 = vector.load %arg14[%c22_618, %c0_619] : memref<64x32xf32, #tpu.memory_space<vmem>>, vector<1x32xf32>
    %c10_620 = arith.constant 10 : index
    %c2_621 = arith.constant 2 : index
    %c0_622 = arith.constant 0 : index
    %560 = vector.load %arg15[%c10_620, %c2_621, %c0_622] : memref<16x9x32xf32, #tpu.memory_space<vmem>>, vector<1x1x32xf32>
    %561 = vector.shape_cast %560 : vector<1x1x32xf32> to vector<1x32xf32>
    %562 = vector.shape_cast %559 : vector<1x32xf32> to vector<1x1x32xf32>
    tpu.vector_store %arg15[%c10_620, %c2_621, %c0_622], %562 {strides = array<i32>} : memref<16x9x32xf32, #tpu.memory_space<vmem>>, vector<1x1x32xf32>,
    %c34_623 = arith.constant 34 : index
    %c0_624 = arith.constant 0 : index
    %563 = vector.load %arg14[%c34_623, %c0_624] : memref<64x32xf32, #tpu.memory_space<vmem>>, vector<1x32xf32>
    %c10_625 = arith.constant 10 : index
    %c3_626 = arith.constant 3 : index
    %c0_627 = arith.constant 0 : index
    %564 = vector.load %arg15[%c10_625, %c3_626, %c0_627] : memref<16x9x32xf32, #tpu.memory_space<vmem>>, vector<1x1x32xf32>
    %565 = vector.shape_cast %564 : vector<1x1x32xf32> to vector<1x32xf32>
    %566 = vector.shape_cast %563 : vector<1x32xf32> to vector<1x1x32xf32>
    tpu.vector_store %arg15[%c10_625, %c3_626, %c0_627], %566 {strides = array<i32>} : memref<16x9x32xf32, #tpu.memory_space<vmem>>, vector<1x1x32xf32>,
    %c36_628 = arith.constant 36 : index
    %c0_629 = arith.constant 0 : index
    %567 = vector.load %arg14[%c36_628, %c0_629] : memref<64x32xf32, #tpu.memory_space<vmem>>, vector<1x32xf32>
    %c10_630 = arith.constant 10 : index
    %c4_631 = arith.constant 4 : index
    %c0_632 = arith.constant 0 : index
    %568 = vector.load %arg15[%c10_630, %c4_631, %c0_632] : memref<16x9x32xf32, #tpu.memory_space<vmem>>, vector<1x1x32xf32>
    %569 = vector.shape_cast %568 : vector<1x1x32xf32> to vector<1x32xf32>
    %570 = vector.shape_cast %567 : vector<1x32xf32> to vector<1x1x32xf32>
    tpu.vector_store %arg15[%c10_630, %c4_631, %c0_632], %570 {strides = array<i32>} : memref<16x9x32xf32, #tpu.memory_space<vmem>>, vector<1x1x32xf32>,
    %c38_633 = arith.constant 38 : index
    %c0_634 = arith.constant 0 : index
    %571 = vector.load %arg14[%c38_633, %c0_634] : memref<64x32xf32, #tpu.memory_space<vmem>>, vector<1x32xf32>
    %c10_635 = arith.constant 10 : index
    %c5_636 = arith.constant 5 : index
    %c0_637 = arith.constant 0 : index
    %572 = vector.load %arg15[%c10_635, %c5_636, %c0_637] : memref<16x9x32xf32, #tpu.memory_space<vmem>>, vector<1x1x32xf32>
    %573 = vector.shape_cast %572 : vector<1x1x32xf32> to vector<1x32xf32>
    %574 = vector.shape_cast %571 : vector<1x32xf32> to vector<1x1x32xf32>
    tpu.vector_store %arg15[%c10_635, %c5_636, %c0_637], %574 {strides = array<i32>} : memref<16x9x32xf32, #tpu.memory_space<vmem>>, vector<1x1x32xf32>,
    %c50_638 = arith.constant 50 : index
    %c0_639 = arith.constant 0 : index
    %575 = vector.load %arg14[%c50_638, %c0_639] : memref<64x32xf32, #tpu.memory_space<vmem>>, vector<1x32xf32>
    %c10_640 = arith.constant 10 : index
    %c6_641 = arith.constant 6 : index
    %c0_642 = arith.constant 0 : index
    %576 = vector.load %arg15[%c10_640, %c6_641, %c0_642] : memref<16x9x32xf32, #tpu.memory_space<vmem>>, vector<1x1x32xf32>
    %577 = vector.shape_cast %576 : vector<1x1x32xf32> to vector<1x32xf32>
    %578 = vector.shape_cast %575 : vector<1x32xf32> to vector<1x1x32xf32>
    tpu.vector_store %arg15[%c10_640, %c6_641, %c0_642], %578 {strides = array<i32>} : memref<16x9x32xf32, #tpu.memory_space<vmem>>, vector<1x1x32xf32>,
    %c52_643 = arith.constant 52 : index
    %c0_644 = arith.constant 0 : index
    %579 = vector.load %arg14[%c52_643, %c0_644] : memref<64x32xf32, #tpu.memory_space<vmem>>, vector<1x32xf32>
    %c10_645 = arith.constant 10 : index
    %c7_646 = arith.constant 7 : index
    %c0_647 = arith.constant 0 : index
    %580 = vector.load %arg15[%c10_645, %c7_646, %c0_647] : memref<16x9x32xf32, #tpu.memory_space<vmem>>, vector<1x1x32xf32>
    %581 = vector.shape_cast %580 : vector<1x1x32xf32> to vector<1x32xf32>
    %582 = vector.shape_cast %579 : vector<1x32xf32> to vector<1x1x32xf32>
    tpu.vector_store %arg15[%c10_645, %c7_646, %c0_647], %582 {strides = array<i32>} : memref<16x9x32xf32, #tpu.memory_space<vmem>>, vector<1x1x32xf32>,
    %c54_648 = arith.constant 54 : index
    %c0_649 = arith.constant 0 : index
    %583 = vector.load %arg14[%c54_648, %c0_649] : memref<64x32xf32, #tpu.memory_space<vmem>>, vector<1x32xf32>
    %c10_650 = arith.constant 10 : index
    %c8_651 = arith.constant 8 : index
    %c0_652 = arith.constant 0 : index
    %584 = vector.load %arg15[%c10_650, %c8_651, %c0_652] : memref<16x9x32xf32, #tpu.memory_space<vmem>>, vector<1x1x32xf32>
    %585 = vector.shape_cast %584 : vector<1x1x32xf32> to vector<1x32xf32>
    %586 = vector.shape_cast %583 : vector<1x32xf32> to vector<1x1x32xf32>
    tpu.vector_store %arg15[%c10_650, %c8_651, %c0_652], %586 {strides = array<i32>} : memref<16x9x32xf32, #tpu.memory_space<vmem>>, vector<1x1x32xf32>,
    %c19_653 = arith.constant 19 : index
    %c0_654 = arith.constant 0 : index
    %587 = vector.load %arg14[%c19_653, %c0_654] : memref<64x32xf32, #tpu.memory_space<vmem>>, vector<1x32xf32>
    %c11_655 = arith.constant 11 : index
    %c0_656 = arith.constant 0 : index
    %c0_657 = arith.constant 0 : index
    %588 = vector.load %arg15[%c11_655, %c0_656, %c0_657] : memref<16x9x32xf32, #tpu.memory_space<vmem>>, vector<1x1x32xf32>
    %589 = vector.shape_cast %588 : vector<1x1x32xf32> to vector<1x32xf32>
    %590 = vector.shape_cast %587 : vector<1x32xf32> to vector<1x1x32xf32>
    tpu.vector_store %arg15[%c11_655, %c0_656, %c0_657], %590 {strides = array<i32>} : memref<16x9x32xf32, #tpu.memory_space<vmem>>, vector<1x1x32xf32>,
    %c21_658 = arith.constant 21 : index
    %c0_659 = arith.constant 0 : index
    %591 = vector.load %arg14[%c21_658, %c0_659] : memref<64x32xf32, #tpu.memory_space<vmem>>, vector<1x32xf32>
    %c11_660 = arith.constant 11 : index
    %c1_661 = arith.constant 1 : index
    %c0_662 = arith.constant 0 : index
    %592 = vector.load %arg15[%c11_660, %c1_661, %c0_662] : memref<16x9x32xf32, #tpu.memory_space<vmem>>, vector<1x1x32xf32>
    %593 = vector.shape_cast %592 : vector<1x1x32xf32> to vector<1x32xf32>
    %594 = vector.shape_cast %591 : vector<1x32xf32> to vector<1x1x32xf32>
    tpu.vector_store %arg15[%c11_660, %c1_661, %c0_662], %594 {strides = array<i32>} : memref<16x9x32xf32, #tpu.memory_space<vmem>>, vector<1x1x32xf32>,
    %c23_663 = arith.constant 23 : index
    %c0_664 = arith.constant 0 : index
    %595 = vector.load %arg14[%c23_663, %c0_664] : memref<64x32xf32, #tpu.memory_space<vmem>>, vector<1x32xf32>
    %c11_665 = arith.constant 11 : index
    %c2_666 = arith.constant 2 : index
    %c0_667 = arith.constant 0 : index
    %596 = vector.load %arg15[%c11_665, %c2_666, %c0_667] : memref<16x9x32xf32, #tpu.memory_space<vmem>>, vector<1x1x32xf32>
    %597 = vector.shape_cast %596 : vector<1x1x32xf32> to vector<1x32xf32>
    %598 = vector.shape_cast %595 : vector<1x32xf32> to vector<1x1x32xf32>
    tpu.vector_store %arg15[%c11_665, %c2_666, %c0_667], %598 {strides = array<i32>} : memref<16x9x32xf32, #tpu.memory_space<vmem>>, vector<1x1x32xf32>,
    %c35_668 = arith.constant 35 : index
    %c0_669 = arith.constant 0 : index
    %599 = vector.load %arg14[%c35_668, %c0_669] : memref<64x32xf32, #tpu.memory_space<vmem>>, vector<1x32xf32>
    %c11_670 = arith.constant 11 : index
    %c3_671 = arith.constant 3 : index
    %c0_672 = arith.constant 0 : index
    %600 = vector.load %arg15[%c11_670, %c3_671, %c0_672] : memref<16x9x32xf32, #tpu.memory_space<vmem>>, vector<1x1x32xf32>
    %601 = vector.shape_cast %600 : vector<1x1x32xf32> to vector<1x32xf32>
    %602 = vector.shape_cast %599 : vector<1x32xf32> to vector<1x1x32xf32>
    tpu.vector_store %arg15[%c11_670, %c3_671, %c0_672], %602 {strides = array<i32>} : memref<16x9x32xf32, #tpu.memory_space<vmem>>, vector<1x1x32xf32>,
    %c37_673 = arith.constant 37 : index
    %c0_674 = arith.constant 0 : index
    %603 = vector.load %arg14[%c37_673, %c0_674] : memref<64x32xf32, #tpu.memory_space<vmem>>, vector<1x32xf32>
    %c11_675 = arith.constant 11 : index
    %c4_676 = arith.constant 4 : index
    %c0_677 = arith.constant 0 : index
    %604 = vector.load %arg15[%c11_675, %c4_676, %c0_677] : memref<16x9x32xf32, #tpu.memory_space<vmem>>, vector<1x1x32xf32>
    %605 = vector.shape_cast %604 : vector<1x1x32xf32> to vector<1x32xf32>
    %606 = vector.shape_cast %603 : vector<1x32xf32> to vector<1x1x32xf32>
    tpu.vector_store %arg15[%c11_675, %c4_676, %c0_677], %606 {strides = array<i32>} : memref<16x9x32xf32, #tpu.memory_space<vmem>>, vector<1x1x32xf32>,
    %c39_678 = arith.constant 39 : index
    %c0_679 = arith.constant 0 : index
    %607 = vector.load %arg14[%c39_678, %c0_679] : memref<64x32xf32, #tpu.memory_space<vmem>>, vector<1x32xf32>
    %c11_680 = arith.constant 11 : index
    %c5_681 = arith.constant 5 : index
    %c0_682 = arith.constant 0 : index
    %608 = vector.load %arg15[%c11_680, %c5_681, %c0_682] : memref<16x9x32xf32, #tpu.memory_space<vmem>>, vector<1x1x32xf32>
    %609 = vector.shape_cast %608 : vector<1x1x32xf32> to vector<1x32xf32>
    %610 = vector.shape_cast %607 : vector<1x32xf32> to vector<1x1x32xf32>
    tpu.vector_store %arg15[%c11_680, %c5_681, %c0_682], %610 {strides = array<i32>} : memref<16x9x32xf32, #tpu.memory_space<vmem>>, vector<1x1x32xf32>,
    %c51_683 = arith.constant 51 : index
    %c0_684 = arith.constant 0 : index
    %611 = vector.load %arg14[%c51_683, %c0_684] : memref<64x32xf32, #tpu.memory_space<vmem>>, vector<1x32xf32>
    %c11_685 = arith.constant 11 : index
    %c6_686 = arith.constant 6 : index
    %c0_687 = arith.constant 0 : index
    %612 = vector.load %arg15[%c11_685, %c6_686, %c0_687] : memref<16x9x32xf32, #tpu.memory_space<vmem>>, vector<1x1x32xf32>
    %613 = vector.shape_cast %612 : vector<1x1x32xf32> to vector<1x32xf32>
    %614 = vector.shape_cast %611 : vector<1x32xf32> to vector<1x1x32xf32>
    tpu.vector_store %arg15[%c11_685, %c6_686, %c0_687], %614 {strides = array<i32>} : memref<16x9x32xf32, #tpu.memory_space<vmem>>, vector<1x1x32xf32>,
    %c53_688 = arith.constant 53 : index
    %c0_689 = arith.constant 0 : index
    %615 = vector.load %arg14[%c53_688, %c0_689] : memref<64x32xf32, #tpu.memory_space<vmem>>, vector<1x32xf32>
    %c11_690 = arith.constant 11 : index
    %c7_691 = arith.constant 7 : index
    %c0_692 = arith.constant 0 : index
    %616 = vector.load %arg15[%c11_690, %c7_691, %c0_692] : memref<16x9x32xf32, #tpu.memory_space<vmem>>, vector<1x1x32xf32>
    %617 = vector.shape_cast %616 : vector<1x1x32xf32> to vector<1x32xf32>
    %618 = vector.shape_cast %615 : vector<1x32xf32> to vector<1x1x32xf32>
    tpu.vector_store %arg15[%c11_690, %c7_691, %c0_692], %618 {strides = array<i32>} : memref<16x9x32xf32, #tpu.memory_space<vmem>>, vector<1x1x32xf32>,
    %c55_693 = arith.constant 55 : index
    %c0_694 = arith.constant 0 : index
    %619 = vector.load %arg14[%c55_693, %c0_694] : memref<64x32xf32, #tpu.memory_space<vmem>>, vector<1x32xf32>
    %c11_695 = arith.constant 11 : index
    %c8_696 = arith.constant 8 : index
    %c0_697 = arith.constant 0 : index
    %620 = vector.load %arg15[%c11_695, %c8_696, %c0_697] : memref<16x9x32xf32, #tpu.memory_space<vmem>>, vector<1x1x32xf32>
    %621 = vector.shape_cast %620 : vector<1x1x32xf32> to vector<1x32xf32>
    %622 = vector.shape_cast %619 : vector<1x32xf32> to vector<1x1x32xf32>
    tpu.vector_store %arg15[%c11_695, %c8_696, %c0_697], %622 {strides = array<i32>} : memref<16x9x32xf32, #tpu.memory_space<vmem>>, vector<1x1x32xf32>,
    %c24_698 = arith.constant 24 : index
    %c0_699 = arith.constant 0 : index
    %623 = vector.load %arg14[%c24_698, %c0_699] : memref<64x32xf32, #tpu.memory_space<vmem>>, vector<1x32xf32>
    %c12_700 = arith.constant 12 : index
    %c0_701 = arith.constant 0 : index
    %c0_702 = arith.constant 0 : index
    %624 = vector.load %arg15[%c12_700, %c0_701, %c0_702] : memref<16x9x32xf32, #tpu.memory_space<vmem>>, vector<1x1x32xf32>
    %625 = vector.shape_cast %624 : vector<1x1x32xf32> to vector<1x32xf32>
    %626 = vector.shape_cast %623 : vector<1x32xf32> to vector<1x1x32xf32>
    tpu.vector_store %arg15[%c12_700, %c0_701, %c0_702], %626 {strides = array<i32>} : memref<16x9x32xf32, #tpu.memory_space<vmem>>, vector<1x1x32xf32>,
    %c26_703 = arith.constant 26 : index
    %c0_704 = arith.constant 0 : index
    %627 = vector.load %arg14[%c26_703, %c0_704] : memref<64x32xf32, #tpu.memory_space<vmem>>, vector<1x32xf32>
    %c12_705 = arith.constant 12 : index
    %c1_706 = arith.constant 1 : index
    %c0_707 = arith.constant 0 : index
    %628 = vector.load %arg15[%c12_705, %c1_706, %c0_707] : memref<16x9x32xf32, #tpu.memory_space<vmem>>, vector<1x1x32xf32>
    %629 = vector.shape_cast %628 : vector<1x1x32xf32> to vector<1x32xf32>
    %630 = vector.shape_cast %627 : vector<1x32xf32> to vector<1x1x32xf32>
    tpu.vector_store %arg15[%c12_705, %c1_706, %c0_707], %630 {strides = array<i32>} : memref<16x9x32xf32, #tpu.memory_space<vmem>>, vector<1x1x32xf32>,
    %c28_708 = arith.constant 28 : index
    %c0_709 = arith.constant 0 : index
    %631 = vector.load %arg14[%c28_708, %c0_709] : memref<64x32xf32, #tpu.memory_space<vmem>>, vector<1x32xf32>
    %c12_710 = arith.constant 12 : index
    %c2_711 = arith.constant 2 : index
    %c0_712 = arith.constant 0 : index
    %632 = vector.load %arg15[%c12_710, %c2_711, %c0_712] : memref<16x9x32xf32, #tpu.memory_space<vmem>>, vector<1x1x32xf32>
    %633 = vector.shape_cast %632 : vector<1x1x32xf32> to vector<1x32xf32>
    %634 = vector.shape_cast %631 : vector<1x32xf32> to vector<1x1x32xf32>
    tpu.vector_store %arg15[%c12_710, %c2_711, %c0_712], %634 {strides = array<i32>} : memref<16x9x32xf32, #tpu.memory_space<vmem>>, vector<1x1x32xf32>,
    %c40_713 = arith.constant 40 : index
    %c0_714 = arith.constant 0 : index
    %635 = vector.load %arg14[%c40_713, %c0_714] : memref<64x32xf32, #tpu.memory_space<vmem>>, vector<1x32xf32>
    %c12_715 = arith.constant 12 : index
    %c3_716 = arith.constant 3 : index
    %c0_717 = arith.constant 0 : index
    %636 = vector.load %arg15[%c12_715, %c3_716, %c0_717] : memref<16x9x32xf32, #tpu.memory_space<vmem>>, vector<1x1x32xf32>
    %637 = vector.shape_cast %636 : vector<1x1x32xf32> to vector<1x32xf32>
    %638 = vector.shape_cast %635 : vector<1x32xf32> to vector<1x1x32xf32>
    tpu.vector_store %arg15[%c12_715, %c3_716, %c0_717], %638 {strides = array<i32>} : memref<16x9x32xf32, #tpu.memory_space<vmem>>, vector<1x1x32xf32>,
    %c42_718 = arith.constant 42 : index
    %c0_719 = arith.constant 0 : index
    %639 = vector.load %arg14[%c42_718, %c0_719] : memref<64x32xf32, #tpu.memory_space<vmem>>, vector<1x32xf32>
    %c12_720 = arith.constant 12 : index
    %c4_721 = arith.constant 4 : index
    %c0_722 = arith.constant 0 : index
    %640 = vector.load %arg15[%c12_720, %c4_721, %c0_722] : memref<16x9x32xf32, #tpu.memory_space<vmem>>, vector<1x1x32xf32>
    %641 = vector.shape_cast %640 : vector<1x1x32xf32> to vector<1x32xf32>
    %642 = vector.shape_cast %639 : vector<1x32xf32> to vector<1x1x32xf32>
    tpu.vector_store %arg15[%c12_720, %c4_721, %c0_722], %642 {strides = array<i32>} : memref<16x9x32xf32, #tpu.memory_space<vmem>>, vector<1x1x32xf32>,
    %c44_723 = arith.constant 44 : index
    %c0_724 = arith.constant 0 : index
    %643 = vector.load %arg14[%c44_723, %c0_724] : memref<64x32xf32, #tpu.memory_space<vmem>>, vector<1x32xf32>
    %c12_725 = arith.constant 12 : index
    %c5_726 = arith.constant 5 : index
    %c0_727 = arith.constant 0 : index
    %644 = vector.load %arg15[%c12_725, %c5_726, %c0_727] : memref<16x9x32xf32, #tpu.memory_space<vmem>>, vector<1x1x32xf32>
    %645 = vector.shape_cast %644 : vector<1x1x32xf32> to vector<1x32xf32>
    %646 = vector.shape_cast %643 : vector<1x32xf32> to vector<1x1x32xf32>
    tpu.vector_store %arg15[%c12_725, %c5_726, %c0_727], %646 {strides = array<i32>} : memref<16x9x32xf32, #tpu.memory_space<vmem>>, vector<1x1x32xf32>,
    %c56_728 = arith.constant 56 : index
    %c0_729 = arith.constant 0 : index
    %647 = vector.load %arg14[%c56_728, %c0_729] : memref<64x32xf32, #tpu.memory_space<vmem>>, vector<1x32xf32>
    %c12_730 = arith.constant 12 : index
    %c6_731 = arith.constant 6 : index
    %c0_732 = arith.constant 0 : index
    %648 = vector.load %arg15[%c12_730, %c6_731, %c0_732] : memref<16x9x32xf32, #tpu.memory_space<vmem>>, vector<1x1x32xf32>
    %649 = vector.shape_cast %648 : vector<1x1x32xf32> to vector<1x32xf32>
    %650 = vector.shape_cast %647 : vector<1x32xf32> to vector<1x1x32xf32>
    tpu.vector_store %arg15[%c12_730, %c6_731, %c0_732], %650 {strides = array<i32>} : memref<16x9x32xf32, #tpu.memory_space<vmem>>, vector<1x1x32xf32>,
    %c58 = arith.constant 58 : index
    %c0_733 = arith.constant 0 : index
    %651 = vector.load %arg14[%c58, %c0_733] : memref<64x32xf32, #tpu.memory_space<vmem>>, vector<1x32xf32>
    %c12_734 = arith.constant 12 : index
    %c7_735 = arith.constant 7 : index
    %c0_736 = arith.constant 0 : index
    %652 = vector.load %arg15[%c12_734, %c7_735, %c0_736] : memref<16x9x32xf32, #tpu.memory_space<vmem>>, vector<1x1x32xf32>
    %653 = vector.shape_cast %652 : vector<1x1x32xf32> to vector<1x32xf32>
    %654 = vector.shape_cast %651 : vector<1x32xf32> to vector<1x1x32xf32>
    tpu.vector_store %arg15[%c12_734, %c7_735, %c0_736], %654 {strides = array<i32>} : memref<16x9x32xf32, #tpu.memory_space<vmem>>, vector<1x1x32xf32>,
    %c60 = arith.constant 60 : index
    %c0_737 = arith.constant 0 : index
    %655 = vector.load %arg14[%c60, %c0_737] : memref<64x32xf32, #tpu.memory_space<vmem>>, vector<1x32xf32>
    %c12_738 = arith.constant 12 : index
    %c8_739 = arith.constant 8 : index
    %c0_740 = arith.constant 0 : index
    %656 = vector.load %arg15[%c12_738, %c8_739, %c0_740] : memref<16x9x32xf32, #tpu.memory_space<vmem>>, vector<1x1x32xf32>
    %657 = vector.shape_cast %656 : vector<1x1x32xf32> to vector<1x32xf32>
    %658 = vector.shape_cast %655 : vector<1x32xf32> to vector<1x1x32xf32>
    tpu.vector_store %arg15[%c12_738, %c8_739, %c0_740], %658 {strides = array<i32>} : memref<16x9x32xf32, #tpu.memory_space<vmem>>, vector<1x1x32xf32>,
    %c25_741 = arith.constant 25 : index
    %c0_742 = arith.constant 0 : index
    %659 = vector.load %arg14[%c25_741, %c0_742] : memref<64x32xf32, #tpu.memory_space<vmem>>, vector<1x32xf32>
    %c13_743 = arith.constant 13 : index
    %c0_744 = arith.constant 0 : index
    %c0_745 = arith.constant 0 : index
    %660 = vector.load %arg15[%c13_743, %c0_744, %c0_745] : memref<16x9x32xf32, #tpu.memory_space<vmem>>, vector<1x1x32xf32>
    %661 = vector.shape_cast %660 : vector<1x1x32xf32> to vector<1x32xf32>
    %662 = vector.shape_cast %659 : vector<1x32xf32> to vector<1x1x32xf32>
    tpu.vector_store %arg15[%c13_743, %c0_744, %c0_745], %662 {strides = array<i32>} : memref<16x9x32xf32, #tpu.memory_space<vmem>>, vector<1x1x32xf32>,
    %c27_746 = arith.constant 27 : index
    %c0_747 = arith.constant 0 : index
    %663 = vector.load %arg14[%c27_746, %c0_747] : memref<64x32xf32, #tpu.memory_space<vmem>>, vector<1x32xf32>
    %c13_748 = arith.constant 13 : index
    %c1_749 = arith.constant 1 : index
    %c0_750 = arith.constant 0 : index
    %664 = vector.load %arg15[%c13_748, %c1_749, %c0_750] : memref<16x9x32xf32, #tpu.memory_space<vmem>>, vector<1x1x32xf32>
    %665 = vector.shape_cast %664 : vector<1x1x32xf32> to vector<1x32xf32>
    %666 = vector.shape_cast %663 : vector<1x32xf32> to vector<1x1x32xf32>
    tpu.vector_store %arg15[%c13_748, %c1_749, %c0_750], %666 {strides = array<i32>} : memref<16x9x32xf32, #tpu.memory_space<vmem>>, vector<1x1x32xf32>,
    %c29_751 = arith.constant 29 : index
    %c0_752 = arith.constant 0 : index
    %667 = vector.load %arg14[%c29_751, %c0_752] : memref<64x32xf32, #tpu.memory_space<vmem>>, vector<1x32xf32>
    %c13_753 = arith.constant 13 : index
    %c2_754 = arith.constant 2 : index
    %c0_755 = arith.constant 0 : index
    %668 = vector.load %arg15[%c13_753, %c2_754, %c0_755] : memref<16x9x32xf32, #tpu.memory_space<vmem>>, vector<1x1x32xf32>
    %669 = vector.shape_cast %668 : vector<1x1x32xf32> to vector<1x32xf32>
    %670 = vector.shape_cast %667 : vector<1x32xf32> to vector<1x1x32xf32>
    tpu.vector_store %arg15[%c13_753, %c2_754, %c0_755], %670 {strides = array<i32>} : memref<16x9x32xf32, #tpu.memory_space<vmem>>, vector<1x1x32xf32>,
    %c41_756 = arith.constant 41 : index
    %c0_757 = arith.constant 0 : index
    %671 = vector.load %arg14[%c41_756, %c0_757] : memref<64x32xf32, #tpu.memory_space<vmem>>, vector<1x32xf32>
    %c13_758 = arith.constant 13 : index
    %c3_759 = arith.constant 3 : index
    %c0_760 = arith.constant 0 : index
    %672 = vector.load %arg15[%c13_758, %c3_759, %c0_760] : memref<16x9x32xf32, #tpu.memory_space<vmem>>, vector<1x1x32xf32>
    %673 = vector.shape_cast %672 : vector<1x1x32xf32> to vector<1x32xf32>
    %674 = vector.shape_cast %671 : vector<1x32xf32> to vector<1x1x32xf32>
    tpu.vector_store %arg15[%c13_758, %c3_759, %c0_760], %674 {strides = array<i32>} : memref<16x9x32xf32, #tpu.memory_space<vmem>>, vector<1x1x32xf32>,
    %c43_761 = arith.constant 43 : index
    %c0_762 = arith.constant 0 : index
    %675 = vector.load %arg14[%c43_761, %c0_762] : memref<64x32xf32, #tpu.memory_space<vmem>>, vector<1x32xf32>
    %c13_763 = arith.constant 13 : index
    %c4_764 = arith.constant 4 : index
    %c0_765 = arith.constant 0 : index
    %676 = vector.load %arg15[%c13_763, %c4_764, %c0_765] : memref<16x9x32xf32, #tpu.memory_space<vmem>>, vector<1x1x32xf32>
    %677 = vector.shape_cast %676 : vector<1x1x32xf32> to vector<1x32xf32>
    %678 = vector.shape_cast %675 : vector<1x32xf32> to vector<1x1x32xf32>
    tpu.vector_store %arg15[%c13_763, %c4_764, %c0_765], %678 {strides = array<i32>} : memref<16x9x32xf32, #tpu.memory_space<vmem>>, vector<1x1x32xf32>,
    %c45_766 = arith.constant 45 : index
    %c0_767 = arith.constant 0 : index
    %679 = vector.load %arg14[%c45_766, %c0_767] : memref<64x32xf32, #tpu.memory_space<vmem>>, vector<1x32xf32>
    %c13_768 = arith.constant 13 : index
    %c5_769 = arith.constant 5 : index
    %c0_770 = arith.constant 0 : index
    %680 = vector.load %arg15[%c13_768, %c5_769, %c0_770] : memref<16x9x32xf32, #tpu.memory_space<vmem>>, vector<1x1x32xf32>
    %681 = vector.shape_cast %680 : vector<1x1x32xf32> to vector<1x32xf32>
    %682 = vector.shape_cast %679 : vector<1x32xf32> to vector<1x1x32xf32>
    tpu.vector_store %arg15[%c13_768, %c5_769, %c0_770], %682 {strides = array<i32>} : memref<16x9x32xf32, #tpu.memory_space<vmem>>, vector<1x1x32xf32>,
    %c57 = arith.constant 57 : index
    %c0_771 = arith.constant 0 : index
    %683 = vector.load %arg14[%c57, %c0_771] : memref<64x32xf32, #tpu.memory_space<vmem>>, vector<1x32xf32>
    %c13_772 = arith.constant 13 : index
    %c6_773 = arith.constant 6 : index
    %c0_774 = arith.constant 0 : index
    %684 = vector.load %arg15[%c13_772, %c6_773, %c0_774] : memref<16x9x32xf32, #tpu.memory_space<vmem>>, vector<1x1x32xf32>
    %685 = vector.shape_cast %684 : vector<1x1x32xf32> to vector<1x32xf32>
    %686 = vector.shape_cast %683 : vector<1x32xf32> to vector<1x1x32xf32>
    tpu.vector_store %arg15[%c13_772, %c6_773, %c0_774], %686 {strides = array<i32>} : memref<16x9x32xf32, #tpu.memory_space<vmem>>, vector<1x1x32xf32>,
    %c59 = arith.constant 59 : index
    %c0_775 = arith.constant 0 : index
    %687 = vector.load %arg14[%c59, %c0_775] : memref<64x32xf32, #tpu.memory_space<vmem>>, vector<1x32xf32>
    %c13_776 = arith.constant 13 : index
    %c7_777 = arith.constant 7 : index
    %c0_778 = arith.constant 0 : index
    %688 = vector.load %arg15[%c13_776, %c7_777, %c0_778] : memref<16x9x32xf32, #tpu.memory_space<vmem>>, vector<1x1x32xf32>
    %689 = vector.shape_cast %688 : vector<1x1x32xf32> to vector<1x32xf32>
    %690 = vector.shape_cast %687 : vector<1x32xf32> to vector<1x1x32xf32>
    tpu.vector_store %arg15[%c13_776, %c7_777, %c0_778], %690 {strides = array<i32>} : memref<16x9x32xf32, #tpu.memory_space<vmem>>, vector<1x1x32xf32>,
    %c61 = arith.constant 61 : index
    %c0_779 = arith.constant 0 : index
    %691 = vector.load %arg14[%c61, %c0_779] : memref<64x32xf32, #tpu.memory_space<vmem>>, vector<1x32xf32>
    %c13_780 = arith.constant 13 : index
    %c8_781 = arith.constant 8 : index
    %c0_782 = arith.constant 0 : index
    %692 = vector.load %arg15[%c13_780, %c8_781, %c0_782] : memref<16x9x32xf32, #tpu.memory_space<vmem>>, vector<1x1x32xf32>
    %693 = vector.shape_cast %692 : vector<1x1x32xf32> to vector<1x32xf32>
    %694 = vector.shape_cast %691 : vector<1x32xf32> to vector<1x1x32xf32>
    tpu.vector_store %arg15[%c13_780, %c8_781, %c0_782], %694 {strides = array<i32>} : memref<16x9x32xf32, #tpu.memory_space<vmem>>, vector<1x1x32xf32>,
    %c26_783 = arith.constant 26 : index
    %c0_784 = arith.constant 0 : index
    %695 = vector.load %arg14[%c26_783, %c0_784] : memref<64x32xf32, #tpu.memory_space<vmem>>, vector<1x32xf32>
    %c14_785 = arith.constant 14 : index
    %c0_786 = arith.constant 0 : index
    %c0_787 = arith.constant 0 : index
    %696 = vector.load %arg15[%c14_785, %c0_786, %c0_787] : memref<16x9x32xf32, #tpu.memory_space<vmem>>, vector<1x1x32xf32>
    %697 = vector.shape_cast %696 : vector<1x1x32xf32> to vector<1x32xf32>
    %698 = vector.shape_cast %695 : vector<1x32xf32> to vector<1x1x32xf32>
    tpu.vector_store %arg15[%c14_785, %c0_786, %c0_787], %698 {strides = array<i32>} : memref<16x9x32xf32, #tpu.memory_space<vmem>>, vector<1x1x32xf32>,
    %c28_788 = arith.constant 28 : index
    %c0_789 = arith.constant 0 : index
    %699 = vector.load %arg14[%c28_788, %c0_789] : memref<64x32xf32, #tpu.memory_space<vmem>>, vector<1x32xf32>
    %c14_790 = arith.constant 14 : index
    %c1_791 = arith.constant 1 : index
    %c0_792 = arith.constant 0 : index
    %700 = vector.load %arg15[%c14_790, %c1_791, %c0_792] : memref<16x9x32xf32, #tpu.memory_space<vmem>>, vector<1x1x32xf32>
    %701 = vector.shape_cast %700 : vector<1x1x32xf32> to vector<1x32xf32>
    %702 = vector.shape_cast %699 : vector<1x32xf32> to vector<1x1x32xf32>
    tpu.vector_store %arg15[%c14_790, %c1_791, %c0_792], %702 {strides = array<i32>} : memref<16x9x32xf32, #tpu.memory_space<vmem>>, vector<1x1x32xf32>,
    %c30_793 = arith.constant 30 : index
    %c0_794 = arith.constant 0 : index
    %703 = vector.load %arg14[%c30_793, %c0_794] : memref<64x32xf32, #tpu.memory_space<vmem>>, vector<1x32xf32>
    %c14_795 = arith.constant 14 : index
    %c2_796 = arith.constant 2 : index
    %c0_797 = arith.constant 0 : index
    %704 = vector.load %arg15[%c14_795, %c2_796, %c0_797] : memref<16x9x32xf32, #tpu.memory_space<vmem>>, vector<1x1x32xf32>
    %705 = vector.shape_cast %704 : vector<1x1x32xf32> to vector<1x32xf32>
    %706 = vector.shape_cast %703 : vector<1x32xf32> to vector<1x1x32xf32>
    tpu.vector_store %arg15[%c14_795, %c2_796, %c0_797], %706 {strides = array<i32>} : memref<16x9x32xf32, #tpu.memory_space<vmem>>, vector<1x1x32xf32>,
    %c42_798 = arith.constant 42 : index
    %c0_799 = arith.constant 0 : index
    %707 = vector.load %arg14[%c42_798, %c0_799] : memref<64x32xf32, #tpu.memory_space<vmem>>, vector<1x32xf32>
    %c14_800 = arith.constant 14 : index
    %c3_801 = arith.constant 3 : index
    %c0_802 = arith.constant 0 : index
    %708 = vector.load %arg15[%c14_800, %c3_801, %c0_802] : memref<16x9x32xf32, #tpu.memory_space<vmem>>, vector<1x1x32xf32>
    %709 = vector.shape_cast %708 : vector<1x1x32xf32> to vector<1x32xf32>
    %710 = vector.shape_cast %707 : vector<1x32xf32> to vector<1x1x32xf32>
    tpu.vector_store %arg15[%c14_800, %c3_801, %c0_802], %710 {strides = array<i32>} : memref<16x9x32xf32, #tpu.memory_space<vmem>>, vector<1x1x32xf32>,
    %c44_803 = arith.constant 44 : index
    %c0_804 = arith.constant 0 : index
    %711 = vector.load %arg14[%c44_803, %c0_804] : memref<64x32xf32, #tpu.memory_space<vmem>>, vector<1x32xf32>
    %c14_805 = arith.constant 14 : index
    %c4_806 = arith.constant 4 : index
    %c0_807 = arith.constant 0 : index
    %712 = vector.load %arg15[%c14_805, %c4_806, %c0_807] : memref<16x9x32xf32, #tpu.memory_space<vmem>>, vector<1x1x32xf32>
    %713 = vector.shape_cast %712 : vector<1x1x32xf32> to vector<1x32xf32>
    %714 = vector.shape_cast %711 : vector<1x32xf32> to vector<1x1x32xf32>
    tpu.vector_store %arg15[%c14_805, %c4_806, %c0_807], %714 {strides = array<i32>} : memref<16x9x32xf32, #tpu.memory_space<vmem>>, vector<1x1x32xf32>,
    %c46_808 = arith.constant 46 : index
    %c0_809 = arith.constant 0 : index
    %715 = vector.load %arg14[%c46_808, %c0_809] : memref<64x32xf32, #tpu.memory_space<vmem>>, vector<1x32xf32>
    %c14_810 = arith.constant 14 : index
    %c5_811 = arith.constant 5 : index
    %c0_812 = arith.constant 0 : index
    %716 = vector.load %arg15[%c14_810, %c5_811, %c0_812] : memref<16x9x32xf32, #tpu.memory_space<vmem>>, vector<1x1x32xf32>
    %717 = vector.shape_cast %716 : vector<1x1x32xf32> to vector<1x32xf32>
    %718 = vector.shape_cast %715 : vector<1x32xf32> to vector<1x1x32xf32>
    tpu.vector_store %arg15[%c14_810, %c5_811, %c0_812], %718 {strides = array<i32>} : memref<16x9x32xf32, #tpu.memory_space<vmem>>, vector<1x1x32xf32>,
    %c58_813 = arith.constant 58 : index
    %c0_814 = arith.constant 0 : index
    %719 = vector.load %arg14[%c58_813, %c0_814] : memref<64x32xf32, #tpu.memory_space<vmem>>, vector<1x32xf32>
    %c14_815 = arith.constant 14 : index
    %c6_816 = arith.constant 6 : index
    %c0_817 = arith.constant 0 : index
    %720 = vector.load %arg15[%c14_815, %c6_816, %c0_817] : memref<16x9x32xf32, #tpu.memory_space<vmem>>, vector<1x1x32xf32>
    %721 = vector.shape_cast %720 : vector<1x1x32xf32> to vector<1x32xf32>
    %722 = vector.shape_cast %719 : vector<1x32xf32> to vector<1x1x32xf32>
    tpu.vector_store %arg15[%c14_815, %c6_816, %c0_817], %722 {strides = array<i32>} : memref<16x9x32xf32, #tpu.memory_space<vmem>>, vector<1x1x32xf32>,
    %c60_818 = arith.constant 60 : index
    %c0_819 = arith.constant 0 : index
    %723 = vector.load %arg14[%c60_818, %c0_819] : memref<64x32xf32, #tpu.memory_space<vmem>>, vector<1x32xf32>
    %c14_820 = arith.constant 14 : index
    %c7_821 = arith.constant 7 : index
    %c0_822 = arith.constant 0 : index
    %724 = vector.load %arg15[%c14_820, %c7_821, %c0_822] : memref<16x9x32xf32, #tpu.memory_space<vmem>>, vector<1x1x32xf32>
    %725 = vector.shape_cast %724 : vector<1x1x32xf32> to vector<1x32xf32>
    %726 = vector.shape_cast %723 : vector<1x32xf32> to vector<1x1x32xf32>
    tpu.vector_store %arg15[%c14_820, %c7_821, %c0_822], %726 {strides = array<i32>} : memref<16x9x32xf32, #tpu.memory_space<vmem>>, vector<1x1x32xf32>,
    %c62 = arith.constant 62 : index
    %c0_823 = arith.constant 0 : index
    %727 = vector.load %arg14[%c62, %c0_823] : memref<64x32xf32, #tpu.memory_space<vmem>>, vector<1x32xf32>
    %c14_824 = arith.constant 14 : index
    %c8_825 = arith.constant 8 : index
    %c0_826 = arith.constant 0 : index
    %728 = vector.load %arg15[%c14_824, %c8_825, %c0_826] : memref<16x9x32xf32, #tpu.memory_space<vmem>>, vector<1x1x32xf32>
    %729 = vector.shape_cast %728 : vector<1x1x32xf32> to vector<1x32xf32>
    %730 = vector.shape_cast %727 : vector<1x32xf32> to vector<1x1x32xf32>
    tpu.vector_store %arg15[%c14_824, %c8_825, %c0_826], %730 {strides = array<i32>} : memref<16x9x32xf32, #tpu.memory_space<vmem>>, vector<1x1x32xf32>,
    %c27_827 = arith.constant 27 : index
    %c0_828 = arith.constant 0 : index
    %731 = vector.load %arg14[%c27_827, %c0_828] : memref<64x32xf32, #tpu.memory_space<vmem>>, vector<1x32xf32>
    %c15_829 = arith.constant 15 : index
    %c0_830 = arith.constant 0 : index
    %c0_831 = arith.constant 0 : index
    %732 = vector.load %arg15[%c15_829, %c0_830, %c0_831] : memref<16x9x32xf32, #tpu.memory_space<vmem>>, vector<1x1x32xf32>
    %733 = vector.shape_cast %732 : vector<1x1x32xf32> to vector<1x32xf32>
    %734 = vector.shape_cast %731 : vector<1x32xf32> to vector<1x1x32xf32>
    tpu.vector_store %arg15[%c15_829, %c0_830, %c0_831], %734 {strides = array<i32>} : memref<16x9x32xf32, #tpu.memory_space<vmem>>, vector<1x1x32xf32>,
    %c29_832 = arith.constant 29 : index
    %c0_833 = arith.constant 0 : index
    %735 = vector.load %arg14[%c29_832, %c0_833] : memref<64x32xf32, #tpu.memory_space<vmem>>, vector<1x32xf32>
    %c15_834 = arith.constant 15 : index
    %c1_835 = arith.constant 1 : index
    %c0_836 = arith.constant 0 : index
    %736 = vector.load %arg15[%c15_834, %c1_835, %c0_836] : memref<16x9x32xf32, #tpu.memory_space<vmem>>, vector<1x1x32xf32>
    %737 = vector.shape_cast %736 : vector<1x1x32xf32> to vector<1x32xf32>
    %738 = vector.shape_cast %735 : vector<1x32xf32> to vector<1x1x32xf32>
    tpu.vector_store %arg15[%c15_834, %c1_835, %c0_836], %738 {strides = array<i32>} : memref<16x9x32xf32, #tpu.memory_space<vmem>>, vector<1x1x32xf32>,
    %c31_837 = arith.constant 31 : index
    %c0_838 = arith.constant 0 : index
    %739 = vector.load %arg14[%c31_837, %c0_838] : memref<64x32xf32, #tpu.memory_space<vmem>>, vector<1x32xf32>
    %c15_839 = arith.constant 15 : index
    %c2_840 = arith.constant 2 : index
    %c0_841 = arith.constant 0 : index
    %740 = vector.load %arg15[%c15_839, %c2_840, %c0_841] : memref<16x9x32xf32, #tpu.memory_space<vmem>>, vector<1x1x32xf32>
    %741 = vector.shape_cast %740 : vector<1x1x32xf32> to vector<1x32xf32>
    %742 = vector.shape_cast %739 : vector<1x32xf32> to vector<1x1x32xf32>
    tpu.vector_store %arg15[%c15_839, %c2_840, %c0_841], %742 {strides = array<i32>} : memref<16x9x32xf32, #tpu.memory_space<vmem>>, vector<1x1x32xf32>,
    %c43_842 = arith.constant 43 : index
    %c0_843 = arith.constant 0 : index
    %743 = vector.load %arg14[%c43_842, %c0_843] : memref<64x32xf32, #tpu.memory_space<vmem>>, vector<1x32xf32>
    %c15_844 = arith.constant 15 : index
    %c3_845 = arith.constant 3 : index
    %c0_846 = arith.constant 0 : index
    %744 = vector.load %arg15[%c15_844, %c3_845, %c0_846] : memref<16x9x32xf32, #tpu.memory_space<vmem>>, vector<1x1x32xf32>
    %745 = vector.shape_cast %744 : vector<1x1x32xf32> to vector<1x32xf32>
    %746 = vector.shape_cast %743 : vector<1x32xf32> to vector<1x1x32xf32>
    tpu.vector_store %arg15[%c15_844, %c3_845, %c0_846], %746 {strides = array<i32>} : memref<16x9x32xf32, #tpu.memory_space<vmem>>, vector<1x1x32xf32>,
    %c45_847 = arith.constant 45 : index
    %c0_848 = arith.constant 0 : index
    %747 = vector.load %arg14[%c45_847, %c0_848] : memref<64x32xf32, #tpu.memory_space<vmem>>, vector<1x32xf32>
    %c15_849 = arith.constant 15 : index
    %c4_850 = arith.constant 4 : index
    %c0_851 = arith.constant 0 : index
    %748 = vector.load %arg15[%c15_849, %c4_850, %c0_851] : memref<16x9x32xf32, #tpu.memory_space<vmem>>, vector<1x1x32xf32>
    %749 = vector.shape_cast %748 : vector<1x1x32xf32> to vector<1x32xf32>
    %750 = vector.shape_cast %747 : vector<1x32xf32> to vector<1x1x32xf32>
    tpu.vector_store %arg15[%c15_849, %c4_850, %c0_851], %750 {strides = array<i32>} : memref<16x9x32xf32, #tpu.memory_space<vmem>>, vector<1x1x32xf32>,
    %c47_852 = arith.constant 47 : index
    %c0_853 = arith.constant 0 : index
    %751 = vector.load %arg14[%c47_852, %c0_853] : memref<64x32xf32, #tpu.memory_space<vmem>>, vector<1x32xf32>
    %c15_854 = arith.constant 15 : index
    %c5_855 = arith.constant 5 : index
    %c0_856 = arith.constant 0 : index
    %752 = vector.load %arg15[%c15_854, %c5_855, %c0_856] : memref<16x9x32xf32, #tpu.memory_space<vmem>>, vector<1x1x32xf32>
    %753 = vector.shape_cast %752 : vector<1x1x32xf32> to vector<1x32xf32>
    %754 = vector.shape_cast %751 : vector<1x32xf32> to vector<1x1x32xf32>
    tpu.vector_store %arg15[%c15_854, %c5_855, %c0_856], %754 {strides = array<i32>} : memref<16x9x32xf32, #tpu.memory_space<vmem>>, vector<1x1x32xf32>,
    %c59_857 = arith.constant 59 : index
    %c0_858 = arith.constant 0 : index
    %755 = vector.load %arg14[%c59_857, %c0_858] : memref<64x32xf32, #tpu.memory_space<vmem>>, vector<1x32xf32>
    %c15_859 = arith.constant 15 : index
    %c6_860 = arith.constant 6 : index
    %c0_861 = arith.constant 0 : index
    %756 = vector.load %arg15[%c15_859, %c6_860, %c0_861] : memref<16x9x32xf32, #tpu.memory_space<vmem>>, vector<1x1x32xf32>
    %757 = vector.shape_cast %756 : vector<1x1x32xf32> to vector<1x32xf32>
    %758 = vector.shape_cast %755 : vector<1x32xf32> to vector<1x1x32xf32>
    tpu.vector_store %arg15[%c15_859, %c6_860, %c0_861], %758 {strides = array<i32>} : memref<16x9x32xf32, #tpu.memory_space<vmem>>, vector<1x1x32xf32>,
    %c61_862 = arith.constant 61 : index
    %c0_863 = arith.constant 0 : index
    %759 = vector.load %arg14[%c61_862, %c0_863] : memref<64x32xf32, #tpu.memory_space<vmem>>, vector<1x32xf32>
    %c15_864 = arith.constant 15 : index
    %c7_865 = arith.constant 7 : index
    %c0_866 = arith.constant 0 : index
    %760 = vector.load %arg15[%c15_864, %c7_865, %c0_866] : memref<16x9x32xf32, #tpu.memory_space<vmem>>, vector<1x1x32xf32>
    %761 = vector.shape_cast %760 : vector<1x1x32xf32> to vector<1x32xf32>
    %762 = vector.shape_cast %759 : vector<1x32xf32> to vector<1x1x32xf32>
    tpu.vector_store %arg15[%c15_864, %c7_865, %c0_866], %762 {strides = array<i32>} : memref<16x9x32xf32, #tpu.memory_space<vmem>>, vector<1x1x32xf32>,
    %c63_867 = arith.constant 63 : index
    %c0_868 = arith.constant 0 : index
    %763 = vector.load %arg14[%c63_867, %c0_868] : memref<64x32xf32, #tpu.memory_space<vmem>>, vector<1x32xf32>
    %c15_869 = arith.constant 15 : index
    %c8_870 = arith.constant 8 : index
    %c0_871 = arith.constant 0 : index
    %764 = vector.load %arg15[%c15_869, %c8_870, %c0_871] : memref<16x9x32xf32, #tpu.memory_space<vmem>>, vector<1x1x32xf32>
    %765 = vector.shape_cast %764 : vector<1x1x32xf32> to vector<1x32xf32>
    %766 = vector.shape_cast %763 : vector<1x32xf32> to vector<1x1x32xf32>
    tpu.vector_store %arg15[%c15_869, %c8_870, %c0_871], %766 {strides = array<i32>} : memref<16x9x32xf32, #tpu.memory_space<vmem>>, vector<1x1x32xf32>,
    %cst_872 = arith.constant 0.000000e+00 : f32
    %767 = vector.broadcast %cst_872 : f32 to vector<9x64xf32>
    %c0_873 = arith.constant 0 : index
    %c0_874 = arith.constant 0 : index
    %c0_875 = arith.constant 0 : index
    %768 = vector.load %arg15[%c0_873, %c0_874, %c0_875] : memref<16x9x32xf32, #tpu.memory_space<vmem>>, vector<1x9x32xf32>
    %769 = vector.shape_cast %768 : vector<1x9x32xf32> to vector<9x32xf32>
    %770 = arith.truncf %769 : vector<9x32xf32> to vector<9x32xbf16>
    %c0_876 = arith.constant 0 : index
    %c0_877 = arith.constant 0 : index
    %771 = vector.load %arg4[%c0_876, %c0_877] : memref<512x64xbf16, #tpu.memory_space<vmem>>, vector<32x64xbf16>
    %cst_878 = arith.constant dense<0.000000e+00> : vector<9x64xf32>
    %772 = tpu.matmul %770, %771, %cst_878 {dimension_numbers = #tpu.dot_dimension_numbers<[1], [0], [0], [1], [0, 0, 1, 1], [], []>} : vector<9x32xbf16>, vector<32x64xbf16>, vector<9x64xf32> -> vector<9x64xf32>
    %773 = arith.addf %767, %772 : vector<9x64xf32>
    %c1_879 = arith.constant 1 : index
    %c0_880 = arith.constant 0 : index
    %c0_881 = arith.constant 0 : index
    %774 = vector.load %arg15[%c1_879, %c0_880, %c0_881] : memref<16x9x32xf32, #tpu.memory_space<vmem>>, vector<1x9x32xf32>
    %775 = vector.shape_cast %774 : vector<1x9x32xf32> to vector<9x32xf32>
    %776 = arith.truncf %775 : vector<9x32xf32> to vector<9x32xbf16>
    %c32_882 = arith.constant 32 : index
    %c0_883 = arith.constant 0 : index
    %777 = vector.load %arg4[%c32_882, %c0_883] : memref<512x64xbf16, #tpu.memory_space<vmem>>, vector<32x64xbf16>
    %cst_884 = arith.constant dense<0.000000e+00> : vector<9x64xf32>
    %778 = tpu.matmul %776, %777, %cst_884 {dimension_numbers = #tpu.dot_dimension_numbers<[1], [0], [0], [1], [0, 0, 1, 1], [], []>} : vector<9x32xbf16>, vector<32x64xbf16>, vector<9x64xf32> -> vector<9x64xf32>
    %779 = arith.addf %773, %778 : vector<9x64xf32>
    %c2_885 = arith.constant 2 : index
    %c0_886 = arith.constant 0 : index
    %c0_887 = arith.constant 0 : index
    %780 = vector.load %arg15[%c2_885, %c0_886, %c0_887] : memref<16x9x32xf32, #tpu.memory_space<vmem>>, vector<1x9x32xf32>
    %781 = vector.shape_cast %780 : vector<1x9x32xf32> to vector<9x32xf32>
    %782 = arith.truncf %781 : vector<9x32xf32> to vector<9x32xbf16>
    %c64_888 = arith.constant 64 : index
    %c0_889 = arith.constant 0 : index
    %783 = vector.load %arg4[%c64_888, %c0_889] : memref<512x64xbf16, #tpu.memory_space<vmem>>, vector<32x64xbf16>
    %cst_890 = arith.constant dense<0.000000e+00> : vector<9x64xf32>
    %784 = tpu.matmul %782, %783, %cst_890 {dimension_numbers = #tpu.dot_dimension_numbers<[1], [0], [0], [1], [0, 0, 1, 1], [], []>} : vector<9x32xbf16>, vector<32x64xbf16>, vector<9x64xf32> -> vector<9x64xf32>
    %785 = arith.addf %779, %784 : vector<9x64xf32>
    %c3_891 = arith.constant 3 : index
    %c0_892 = arith.constant 0 : index
    %c0_893 = arith.constant 0 : index
    %786 = vector.load %arg15[%c3_891, %c0_892, %c0_893] : memref<16x9x32xf32, #tpu.memory_space<vmem>>, vector<1x9x32xf32>
    %787 = vector.shape_cast %786 : vector<1x9x32xf32> to vector<9x32xf32>
    %788 = arith.truncf %787 : vector<9x32xf32> to vector<9x32xbf16>
    %c96 = arith.constant 96 : index
    %c0_894 = arith.constant 0 : index
    %789 = vector.load %arg4[%c96, %c0_894] : memref<512x64xbf16, #tpu.memory_space<vmem>>, vector<32x64xbf16>
    %cst_895 = arith.constant dense<0.000000e+00> : vector<9x64xf32>
    %790 = tpu.matmul %788, %789, %cst_895 {dimension_numbers = #tpu.dot_dimension_numbers<[1], [0], [0], [1], [0, 0, 1, 1], [], []>} : vector<9x32xbf16>, vector<32x64xbf16>, vector<9x64xf32> -> vector<9x64xf32>
    %791 = arith.addf %785, %790 : vector<9x64xf32>
    %c4_896 = arith.constant 4 : index
    %c0_897 = arith.constant 0 : index
    %c0_898 = arith.constant 0 : index
    %792 = vector.load %arg15[%c4_896, %c0_897, %c0_898] : memref<16x9x32xf32, #tpu.memory_space<vmem>>, vector<1x9x32xf32>
    %793 = vector.shape_cast %792 : vector<1x9x32xf32> to vector<9x32xf32>
    %794 = arith.truncf %793 : vector<9x32xf32> to vector<9x32xbf16>
    %c128_899 = arith.constant 128 : index
    %c0_900 = arith.constant 0 : index
    %795 = vector.load %arg4[%c128_899, %c0_900] : memref<512x64xbf16, #tpu.memory_space<vmem>>, vector<32x64xbf16>
    %cst_901 = arith.constant dense<0.000000e+00> : vector<9x64xf32>
    %796 = tpu.matmul %794, %795, %cst_901 {dimension_numbers = #tpu.dot_dimension_numbers<[1], [0], [0], [1], [0, 0, 1, 1], [], []>} : vector<9x32xbf16>, vector<32x64xbf16>, vector<9x64xf32> -> vector<9x64xf32>
    %797 = arith.addf %791, %796 : vector<9x64xf32>
    %c5_902 = arith.constant 5 : index
    %c0_903 = arith.constant 0 : index
    %c0_904 = arith.constant 0 : index
    %798 = vector.load %arg15[%c5_902, %c0_903, %c0_904] : memref<16x9x32xf32, #tpu.memory_space<vmem>>, vector<1x9x32xf32>
    %799 = vector.shape_cast %798 : vector<1x9x32xf32> to vector<9x32xf32>
    %800 = arith.truncf %799 : vector<9x32xf32> to vector<9x32xbf16>
    %c160 = arith.constant 160 : index
    %c0_905 = arith.constant 0 : index
    %801 = vector.load %arg4[%c160, %c0_905] : memref<512x64xbf16, #tpu.memory_space<vmem>>, vector<32x64xbf16>
    %cst_906 = arith.constant dense<0.000000e+00> : vector<9x64xf32>
    %802 = tpu.matmul %800, %801, %cst_906 {dimension_numbers = #tpu.dot_dimension_numbers<[1], [0], [0], [1], [0, 0, 1, 1], [], []>} : vector<9x32xbf16>, vector<32x64xbf16>, vector<9x64xf32> -> vector<9x64xf32>
    %803 = arith.addf %797, %802 : vector<9x64xf32>
    %c6_907 = arith.constant 6 : index
    %c0_908 = arith.constant 0 : index
    %c0_909 = arith.constant 0 : index
    %804 = vector.load %arg15[%c6_907, %c0_908, %c0_909] : memref<16x9x32xf32, #tpu.memory_space<vmem>>, vector<1x9x32xf32>
    %805 = vector.shape_cast %804 : vector<1x9x32xf32> to vector<9x32xf32>
    %806 = arith.truncf %805 : vector<9x32xf32> to vector<9x32xbf16>
    %c192_910 = arith.constant 192 : index
    %c0_911 = arith.constant 0 : index
    %807 = vector.load %arg4[%c192_910, %c0_911] : memref<512x64xbf16, #tpu.memory_space<vmem>>, vector<32x64xbf16>
    %cst_912 = arith.constant dense<0.000000e+00> : vector<9x64xf32>
    %808 = tpu.matmul %806, %807, %cst_912 {dimension_numbers = #tpu.dot_dimension_numbers<[1], [0], [0], [1], [0, 0, 1, 1], [], []>} : vector<9x32xbf16>, vector<32x64xbf16>, vector<9x64xf32> -> vector<9x64xf32>
    %809 = arith.addf %803, %808 : vector<9x64xf32>
    %c7_913 = arith.constant 7 : index
    %c0_914 = arith.constant 0 : index
    %c0_915 = arith.constant 0 : index
    %810 = vector.load %arg15[%c7_913, %c0_914, %c0_915] : memref<16x9x32xf32, #tpu.memory_space<vmem>>, vector<1x9x32xf32>
    %811 = vector.shape_cast %810 : vector<1x9x32xf32> to vector<9x32xf32>
    %812 = arith.truncf %811 : vector<9x32xf32> to vector<9x32xbf16>
    %c224 = arith.constant 224 : index
    %c0_916 = arith.constant 0 : index
    %813 = vector.load %arg4[%c224, %c0_916] : memref<512x64xbf16, #tpu.memory_space<vmem>>, vector<32x64xbf16>
    %cst_917 = arith.constant dense<0.000000e+00> : vector<9x64xf32>
    %814 = tpu.matmul %812, %813, %cst_917 {dimension_numbers = #tpu.dot_dimension_numbers<[1], [0], [0], [1], [0, 0, 1, 1], [], []>} : vector<9x32xbf16>, vector<32x64xbf16>, vector<9x64xf32> -> vector<9x64xf32>
    %815 = arith.addf %809, %814 : vector<9x64xf32>
    %c8_918 = arith.constant 8 : index
    %c0_919 = arith.constant 0 : index
    %c0_920 = arith.constant 0 : index
    %816 = vector.load %arg15[%c8_918, %c0_919, %c0_920] : memref<16x9x32xf32, #tpu.memory_space<vmem>>, vector<1x9x32xf32>
    %817 = vector.shape_cast %816 : vector<1x9x32xf32> to vector<9x32xf32>
    %818 = arith.truncf %817 : vector<9x32xf32> to vector<9x32xbf16>
    %c256 = arith.constant 256 : index
    %c0_921 = arith.constant 0 : index
    %819 = vector.load %arg4[%c256, %c0_921] : memref<512x64xbf16, #tpu.memory_space<vmem>>, vector<32x64xbf16>
    %cst_922 = arith.constant dense<0.000000e+00> : vector<9x64xf32>
    %820 = tpu.matmul %818, %819, %cst_922 {dimension_numbers = #tpu.dot_dimension_numbers<[1], [0], [0], [1], [0, 0, 1, 1], [], []>} : vector<9x32xbf16>, vector<32x64xbf16>, vector<9x64xf32> -> vector<9x64xf32>
    %821 = arith.addf %815, %820 : vector<9x64xf32>
    %c9_923 = arith.constant 9 : index
    %c0_924 = arith.constant 0 : index
    %c0_925 = arith.constant 0 : index
    %822 = vector.load %arg15[%c9_923, %c0_924, %c0_925] : memref<16x9x32xf32, #tpu.memory_space<vmem>>, vector<1x9x32xf32>
    %823 = vector.shape_cast %822 : vector<1x9x32xf32> to vector<9x32xf32>
    %824 = arith.truncf %823 : vector<9x32xf32> to vector<9x32xbf16>
    %c288 = arith.constant 288 : index
    %c0_926 = arith.constant 0 : index
    %825 = vector.load %arg4[%c288, %c0_926] : memref<512x64xbf16, #tpu.memory_space<vmem>>, vector<32x64xbf16>
    %cst_927 = arith.constant dense<0.000000e+00> : vector<9x64xf32>
    %826 = tpu.matmul %824, %825, %cst_927 {dimension_numbers = #tpu.dot_dimension_numbers<[1], [0], [0], [1], [0, 0, 1, 1], [], []>} : vector<9x32xbf16>, vector<32x64xbf16>, vector<9x64xf32> -> vector<9x64xf32>
    %827 = arith.addf %821, %826 : vector<9x64xf32>
    %c10_928 = arith.constant 10 : index
    %c0_929 = arith.constant 0 : index
    %c0_930 = arith.constant 0 : index
    %828 = vector.load %arg15[%c10_928, %c0_929, %c0_930] : memref<16x9x32xf32, #tpu.memory_space<vmem>>, vector<1x9x32xf32>
    %829 = vector.shape_cast %828 : vector<1x9x32xf32> to vector<9x32xf32>
    %830 = arith.truncf %829 : vector<9x32xf32> to vector<9x32xbf16>
    %c320 = arith.constant 320 : index
    %c0_931 = arith.constant 0 : index
    %831 = vector.load %arg4[%c320, %c0_931] : memref<512x64xbf16, #tpu.memory_space<vmem>>, vector<32x64xbf16>
    %cst_932 = arith.constant dense<0.000000e+00> : vector<9x64xf32>
    %832 = tpu.matmul %830, %831, %cst_932 {dimension_numbers = #tpu.dot_dimension_numbers<[1], [0], [0], [1], [0, 0, 1, 1], [], []>} : vector<9x32xbf16>, vector<32x64xbf16>, vector<9x64xf32> -> vector<9x64xf32>
    %833 = arith.addf %827, %832 : vector<9x64xf32>
    %c11_933 = arith.constant 11 : index
    %c0_934 = arith.constant 0 : index
    %c0_935 = arith.constant 0 : index
    %834 = vector.load %arg15[%c11_933, %c0_934, %c0_935] : memref<16x9x32xf32, #tpu.memory_space<vmem>>, vector<1x9x32xf32>
    %835 = vector.shape_cast %834 : vector<1x9x32xf32> to vector<9x32xf32>
    %836 = arith.truncf %835 : vector<9x32xf32> to vector<9x32xbf16>
    %c352 = arith.constant 352 : index
    %c0_936 = arith.constant 0 : index
    %837 = vector.load %arg4[%c352, %c0_936] : memref<512x64xbf16, #tpu.memory_space<vmem>>, vector<32x64xbf16>
    %cst_937 = arith.constant dense<0.000000e+00> : vector<9x64xf32>
    %838 = tpu.matmul %836, %837, %cst_937 {dimension_numbers = #tpu.dot_dimension_numbers<[1], [0], [0], [1], [0, 0, 1, 1], [], []>} : vector<9x32xbf16>, vector<32x64xbf16>, vector<9x64xf32> -> vector<9x64xf32>
    %839 = arith.addf %833, %838 : vector<9x64xf32>
    %c12_938 = arith.constant 12 : index
    %c0_939 = arith.constant 0 : index
    %c0_940 = arith.constant 0 : index
    %840 = vector.load %arg15[%c12_938, %c0_939, %c0_940] : memref<16x9x32xf32, #tpu.memory_space<vmem>>, vector<1x9x32xf32>
    %841 = vector.shape_cast %840 : vector<1x9x32xf32> to vector<9x32xf32>
    %842 = arith.truncf %841 : vector<9x32xf32> to vector<9x32xbf16>
    %c384 = arith.constant 384 : index
    %c0_941 = arith.constant 0 : index
    %843 = vector.load %arg4[%c384, %c0_941] : memref<512x64xbf16, #tpu.memory_space<vmem>>, vector<32x64xbf16>
    %cst_942 = arith.constant dense<0.000000e+00> : vector<9x64xf32>
    %844 = tpu.matmul %842, %843, %cst_942 {dimension_numbers = #tpu.dot_dimension_numbers<[1], [0], [0], [1], [0, 0, 1, 1], [], []>} : vector<9x32xbf16>, vector<32x64xbf16>, vector<9x64xf32> -> vector<9x64xf32>
    %845 = arith.addf %839, %844 : vector<9x64xf32>
    %c13_943 = arith.constant 13 : index
    %c0_944 = arith.constant 0 : index
    %c0_945 = arith.constant 0 : index
    %846 = vector.load %arg15[%c13_943, %c0_944, %c0_945] : memref<16x9x32xf32, #tpu.memory_space<vmem>>, vector<1x9x32xf32>
    %847 = vector.shape_cast %846 : vector<1x9x32xf32> to vector<9x32xf32>
    %848 = arith.truncf %847 : vector<9x32xf32> to vector<9x32xbf16>
    %c416 = arith.constant 416 : index
    %c0_946 = arith.constant 0 : index
    %849 = vector.load %arg4[%c416, %c0_946] : memref<512x64xbf16, #tpu.memory_space<vmem>>, vector<32x64xbf16>
    %cst_947 = arith.constant dense<0.000000e+00> : vector<9x64xf32>
    %850 = tpu.matmul %848, %849, %cst_947 {dimension_numbers = #tpu.dot_dimension_numbers<[1], [0], [0], [1], [0, 0, 1, 1], [], []>} : vector<9x32xbf16>, vector<32x64xbf16>, vector<9x64xf32> -> vector<9x64xf32>
    %851 = arith.addf %845, %850 : vector<9x64xf32>
    %c14_948 = arith.constant 14 : index
    %c0_949 = arith.constant 0 : index
    %c0_950 = arith.constant 0 : index
    %852 = vector.load %arg15[%c14_948, %c0_949, %c0_950] : memref<16x9x32xf32, #tpu.memory_space<vmem>>, vector<1x9x32xf32>
    %853 = vector.shape_cast %852 : vector<1x9x32xf32> to vector<9x32xf32>
    %854 = arith.truncf %853 : vector<9x32xf32> to vector<9x32xbf16>
    %c448 = arith.constant 448 : index
    %c0_951 = arith.constant 0 : index
    %855 = vector.load %arg4[%c448, %c0_951] : memref<512x64xbf16, #tpu.memory_space<vmem>>, vector<32x64xbf16>
    %cst_952 = arith.constant dense<0.000000e+00> : vector<9x64xf32>
    %856 = tpu.matmul %854, %855, %cst_952 {dimension_numbers = #tpu.dot_dimension_numbers<[1], [0], [0], [1], [0, 0, 1, 1], [], []>} : vector<9x32xbf16>, vector<32x64xbf16>, vector<9x64xf32> -> vector<9x64xf32>
    %857 = arith.addf %851, %856 : vector<9x64xf32>
    %c15_953 = arith.constant 15 : index
    %c0_954 = arith.constant 0 : index
    %c0_955 = arith.constant 0 : index
    %858 = vector.load %arg15[%c15_953, %c0_954, %c0_955] : memref<16x9x32xf32, #tpu.memory_space<vmem>>, vector<1x9x32xf32>
    %859 = vector.shape_cast %858 : vector<1x9x32xf32> to vector<9x32xf32>
    %860 = arith.truncf %859 : vector<9x32xf32> to vector<9x32xbf16>
    %c480 = arith.constant 480 : index
    %c0_956 = arith.constant 0 : index
    %861 = vector.load %arg4[%c480, %c0_956] : memref<512x64xbf16, #tpu.memory_space<vmem>>, vector<32x64xbf16>
    %cst_957 = arith.constant dense<0.000000e+00> : vector<9x64xf32>
    %862 = tpu.matmul %860, %861, %cst_957 {dimension_numbers = #tpu.dot_dimension_numbers<[1], [0], [0], [1], [0, 0, 1, 1], [], []>} : vector<9x32xbf16>, vector<32x64xbf16>, vector<9x64xf32> -> vector<9x64xf32>
    %863 = arith.addf %857, %862 : vector<9x64xf32>
    %c0_958 = arith.constant 0 : index
    %c0_959 = arith.constant 0 : index
    %864 = vector.load %arg5[%c0_958, %c0_959] : memref<1x64xf32, #tpu.memory_space<vmem>>, vector<1x64xf32>
    %865 = vector.broadcast %864 : vector<1x64xf32> to vector<9x64xf32>
    %866 = arith.addf %863, %865 : vector<9x64xf32>
    %cst_960 = arith.constant 0.000000e+00 : f32
    %867 = vector.broadcast %cst_960 : f32 to vector<9x64xf32>
    %868 = arith.maximumf %866, %867 : vector<9x64xf32>
    %c0_961 = arith.constant 0 : index
    %c0_962 = arith.constant 0 : index
    %869 = vector.load %arg16[%c0_961, %c0_962] : memref<9x64xf32, #tpu.memory_space<vmem>>, vector<9x64xf32>
    tpu.vector_store %arg16[%c0_961, %c0_962], %868 {strides = array<i32>} : memref<9x64xf32, #tpu.memory_space<vmem>>, vector<9x64xf32>,
    %c0_963 = arith.constant 0 : index
    %c0_964 = arith.constant 0 : index
    %870 = vector.load %arg16[%c0_963, %c0_964] : memref<9x64xf32, #tpu.memory_space<vmem>>, vector<1x64xf32>
    %c0_965 = arith.constant 0 : index
    %c0_966 = arith.constant 0 : index
    %c0_967 = arith.constant 0 : index
    %871 = vector.load %arg17[%c0_965, %c0_966, %c0_967] : memref<9x1x64xf32, #tpu.memory_space<vmem>>, vector<1x1x64xf32>
    %872 = vector.shape_cast %871 : vector<1x1x64xf32> to vector<1x64xf32>
    %873 = vector.shape_cast %870 : vector<1x64xf32> to vector<1x1x64xf32>
    tpu.vector_store %arg17[%c0_965, %c0_966, %c0_967], %873 {strides = array<i32>} : memref<9x1x64xf32, #tpu.memory_space<vmem>>, vector<1x1x64xf32>,
    %c1_968 = arith.constant 1 : index
    %c0_969 = arith.constant 0 : index
    %874 = vector.load %arg16[%c1_968, %c0_969] : memref<9x64xf32, #tpu.memory_space<vmem>>, vector<1x64xf32>
    %c1_970 = arith.constant 1 : index
    %c0_971 = arith.constant 0 : index
    %c0_972 = arith.constant 0 : index
    %875 = vector.load %arg17[%c1_970, %c0_971, %c0_972] : memref<9x1x64xf32, #tpu.memory_space<vmem>>, vector<1x1x64xf32>
    %876 = vector.shape_cast %875 : vector<1x1x64xf32> to vector<1x64xf32>
    %877 = vector.shape_cast %874 : vector<1x64xf32> to vector<1x1x64xf32>
    tpu.vector_store %arg17[%c1_970, %c0_971, %c0_972], %877 {strides = array<i32>} : memref<9x1x64xf32, #tpu.memory_space<vmem>>, vector<1x1x64xf32>,
    %c2_973 = arith.constant 2 : index
    %c0_974 = arith.constant 0 : index
    %878 = vector.load %arg16[%c2_973, %c0_974] : memref<9x64xf32, #tpu.memory_space<vmem>>, vector<1x64xf32>
    %c2_975 = arith.constant 2 : index
    %c0_976 = arith.constant 0 : index
    %c0_977 = arith.constant 0 : index
    %879 = vector.load %arg17[%c2_975, %c0_976, %c0_977] : memref<9x1x64xf32, #tpu.memory_space<vmem>>, vector<1x1x64xf32>
    %880 = vector.shape_cast %879 : vector<1x1x64xf32> to vector<1x64xf32>
    %881 = vector.shape_cast %878 : vector<1x64xf32> to vector<1x1x64xf32>
    tpu.vector_store %arg17[%c2_975, %c0_976, %c0_977], %881 {strides = array<i32>} : memref<9x1x64xf32, #tpu.memory_space<vmem>>, vector<1x1x64xf32>,
    %c3_978 = arith.constant 3 : index
    %c0_979 = arith.constant 0 : index
    %882 = vector.load %arg16[%c3_978, %c0_979] : memref<9x64xf32, #tpu.memory_space<vmem>>, vector<1x64xf32>
    %c3_980 = arith.constant 3 : index
    %c0_981 = arith.constant 0 : index
    %c0_982 = arith.constant 0 : index
    %883 = vector.load %arg17[%c3_980, %c0_981, %c0_982] : memref<9x1x64xf32, #tpu.memory_space<vmem>>, vector<1x1x64xf32>
    %884 = vector.shape_cast %883 : vector<1x1x64xf32> to vector<1x64xf32>
    %885 = vector.shape_cast %882 : vector<1x64xf32> to vector<1x1x64xf32>
    tpu.vector_store %arg17[%c3_980, %c0_981, %c0_982], %885 {strides = array<i32>} : memref<9x1x64xf32, #tpu.memory_space<vmem>>, vector<1x1x64xf32>,
    %c4_983 = arith.constant 4 : index
    %c0_984 = arith.constant 0 : index
    %886 = vector.load %arg16[%c4_983, %c0_984] : memref<9x64xf32, #tpu.memory_space<vmem>>, vector<1x64xf32>
    %c4_985 = arith.constant 4 : index
    %c0_986 = arith.constant 0 : index
    %c0_987 = arith.constant 0 : index
    %887 = vector.load %arg17[%c4_985, %c0_986, %c0_987] : memref<9x1x64xf32, #tpu.memory_space<vmem>>, vector<1x1x64xf32>
    %888 = vector.shape_cast %887 : vector<1x1x64xf32> to vector<1x64xf32>
    %889 = vector.shape_cast %886 : vector<1x64xf32> to vector<1x1x64xf32>
    tpu.vector_store %arg17[%c4_985, %c0_986, %c0_987], %889 {strides = array<i32>} : memref<9x1x64xf32, #tpu.memory_space<vmem>>, vector<1x1x64xf32>,
    %c5_988 = arith.constant 5 : index
    %c0_989 = arith.constant 0 : index
    %890 = vector.load %arg16[%c5_988, %c0_989] : memref<9x64xf32, #tpu.memory_space<vmem>>, vector<1x64xf32>
    %c5_990 = arith.constant 5 : index
    %c0_991 = arith.constant 0 : index
    %c0_992 = arith.constant 0 : index
    %891 = vector.load %arg17[%c5_990, %c0_991, %c0_992] : memref<9x1x64xf32, #tpu.memory_space<vmem>>, vector<1x1x64xf32>
    %892 = vector.shape_cast %891 : vector<1x1x64xf32> to vector<1x64xf32>
    %893 = vector.shape_cast %890 : vector<1x64xf32> to vector<1x1x64xf32>
    tpu.vector_store %arg17[%c5_990, %c0_991, %c0_992], %893 {strides = array<i32>} : memref<9x1x64xf32, #tpu.memory_space<vmem>>, vector<1x1x64xf32>,
    %c6_993 = arith.constant 6 : index
    %c0_994 = arith.constant 0 : index
    %894 = vector.load %arg16[%c6_993, %c0_994] : memref<9x64xf32, #tpu.memory_space<vmem>>, vector<1x64xf32>
    %c6_995 = arith.constant 6 : index
    %c0_996 = arith.constant 0 : index
    %c0_997 = arith.constant 0 : index
    %895 = vector.load %arg17[%c6_995, %c0_996, %c0_997] : memref<9x1x64xf32, #tpu.memory_space<vmem>>, vector<1x1x64xf32>
    %896 = vector.shape_cast %895 : vector<1x1x64xf32> to vector<1x64xf32>
    %897 = vector.shape_cast %894 : vector<1x64xf32> to vector<1x1x64xf32>
    tpu.vector_store %arg17[%c6_995, %c0_996, %c0_997], %897 {strides = array<i32>} : memref<9x1x64xf32, #tpu.memory_space<vmem>>, vector<1x1x64xf32>,
    %c7_998 = arith.constant 7 : index
    %c0_999 = arith.constant 0 : index
    %898 = vector.load %arg16[%c7_998, %c0_999] : memref<9x64xf32, #tpu.memory_space<vmem>>, vector<1x64xf32>
    %c7_1000 = arith.constant 7 : index
    %c0_1001 = arith.constant 0 : index
    %c0_1002 = arith.constant 0 : index
    %899 = vector.load %arg17[%c7_1000, %c0_1001, %c0_1002] : memref<9x1x64xf32, #tpu.memory_space<vmem>>, vector<1x1x64xf32>
    %900 = vector.shape_cast %899 : vector<1x1x64xf32> to vector<1x64xf32>
    %901 = vector.shape_cast %898 : vector<1x64xf32> to vector<1x1x64xf32>
    tpu.vector_store %arg17[%c7_1000, %c0_1001, %c0_1002], %901 {strides = array<i32>} : memref<9x1x64xf32, #tpu.memory_space<vmem>>, vector<1x1x64xf32>,
    %c8_1003 = arith.constant 8 : index
    %c0_1004 = arith.constant 0 : index
    %902 = vector.load %arg16[%c8_1003, %c0_1004] : memref<9x64xf32, #tpu.memory_space<vmem>>, vector<1x64xf32>
    %c8_1005 = arith.constant 8 : index
    %c0_1006 = arith.constant 0 : index
    %c0_1007 = arith.constant 0 : index
    %903 = vector.load %arg17[%c8_1005, %c0_1006, %c0_1007] : memref<9x1x64xf32, #tpu.memory_space<vmem>>, vector<1x1x64xf32>
    %904 = vector.shape_cast %903 : vector<1x1x64xf32> to vector<1x64xf32>
    %905 = vector.shape_cast %902 : vector<1x64xf32> to vector<1x1x64xf32>
    tpu.vector_store %arg17[%c8_1005, %c0_1006, %c0_1007], %905 {strides = array<i32>} : memref<9x1x64xf32, #tpu.memory_space<vmem>>, vector<1x1x64xf32>,
    %cst_1008 = arith.constant 0.000000e+00 : f32
    %906 = vector.broadcast %cst_1008 : f32 to vector<1x64xf32>
    %c0_1009 = arith.constant 0 : index
    %c0_1010 = arith.constant 0 : index
    %c0_1011 = arith.constant 0 : index
    %907 = vector.load %arg17[%c0_1009, %c0_1010, %c0_1011] : memref<9x1x64xf32, #tpu.memory_space<vmem>>, vector<1x1x64xf32>
    %908 = vector.shape_cast %907 : vector<1x1x64xf32> to vector<1x64xf32>
    %909 = arith.truncf %908 : vector<1x64xf32> to vector<1x64xbf16>
    %c0_1012 = arith.constant 0 : index
    %c0_1013 = arith.constant 0 : index
    %910 = vector.load %arg6[%c0_1012, %c0_1013] : memref<576x64xbf16, #tpu.memory_space<vmem>>, vector<64x64xbf16>
    %cst_1014 = arith.constant dense<0.000000e+00> : vector<1x64xf32>
    %911 = tpu.matmul %909, %910, %cst_1014 {dimension_numbers = #tpu.dot_dimension_numbers<[1], [0], [0], [1], [0, 0, 1, 1], [], []>} : vector<1x64xbf16>, vector<64x64xbf16>, vector<1x64xf32> -> vector<1x64xf32>
    %912 = arith.addf %906, %911 : vector<1x64xf32>
    %c1_1015 = arith.constant 1 : index
    %c0_1016 = arith.constant 0 : index
    %c0_1017 = arith.constant 0 : index
    %913 = vector.load %arg17[%c1_1015, %c0_1016, %c0_1017] : memref<9x1x64xf32, #tpu.memory_space<vmem>>, vector<1x1x64xf32>
    %914 = vector.shape_cast %913 : vector<1x1x64xf32> to vector<1x64xf32>
    %915 = arith.truncf %914 : vector<1x64xf32> to vector<1x64xbf16>
    %c64_1018 = arith.constant 64 : index
    %c0_1019 = arith.constant 0 : index
    %916 = vector.load %arg6[%c64_1018, %c0_1019] : memref<576x64xbf16, #tpu.memory_space<vmem>>, vector<64x64xbf16>
    %cst_1020 = arith.constant dense<0.000000e+00> : vector<1x64xf32>
    %917 = tpu.matmul %915, %916, %cst_1020 {dimension_numbers = #tpu.dot_dimension_numbers<[1], [0], [0], [1], [0, 0, 1, 1], [], []>} : vector<1x64xbf16>, vector<64x64xbf16>, vector<1x64xf32> -> vector<1x64xf32>
    %918 = arith.addf %912, %917 : vector<1x64xf32>
    %c2_1021 = arith.constant 2 : index
    %c0_1022 = arith.constant 0 : index
    %c0_1023 = arith.constant 0 : index
    %919 = vector.load %arg17[%c2_1021, %c0_1022, %c0_1023] : memref<9x1x64xf32, #tpu.memory_space<vmem>>, vector<1x1x64xf32>
    %920 = vector.shape_cast %919 : vector<1x1x64xf32> to vector<1x64xf32>
    %921 = arith.truncf %920 : vector<1x64xf32> to vector<1x64xbf16>
    %c128_1024 = arith.constant 128 : index
    %c0_1025 = arith.constant 0 : index
    %922 = vector.load %arg6[%c128_1024, %c0_1025] : memref<576x64xbf16, #tpu.memory_space<vmem>>, vector<64x64xbf16>
    %cst_1026 = arith.constant dense<0.000000e+00> : vector<1x64xf32>
    %923 = tpu.matmul %921, %922, %cst_1026 {dimension_numbers = #tpu.dot_dimension_numbers<[1], [0], [0], [1], [0, 0, 1, 1], [], []>} : vector<1x64xbf16>, vector<64x64xbf16>, vector<1x64xf32> -> vector<1x64xf32>
    %924 = arith.addf %918, %923 : vector<1x64xf32>
    %c3_1027 = arith.constant 3 : index
    %c0_1028 = arith.constant 0 : index
    %c0_1029 = arith.constant 0 : index
    %925 = vector.load %arg17[%c3_1027, %c0_1028, %c0_1029] : memref<9x1x64xf32, #tpu.memory_space<vmem>>, vector<1x1x64xf32>
    %926 = vector.shape_cast %925 : vector<1x1x64xf32> to vector<1x64xf32>
    %927 = arith.truncf %926 : vector<1x64xf32> to vector<1x64xbf16>
    %c192_1030 = arith.constant 192 : index
    %c0_1031 = arith.constant 0 : index
    %928 = vector.load %arg6[%c192_1030, %c0_1031] : memref<576x64xbf16, #tpu.memory_space<vmem>>, vector<64x64xbf16>
    %cst_1032 = arith.constant dense<0.000000e+00> : vector<1x64xf32>
    %929 = tpu.matmul %927, %928, %cst_1032 {dimension_numbers = #tpu.dot_dimension_numbers<[1], [0], [0], [1], [0, 0, 1, 1], [], []>} : vector<1x64xbf16>, vector<64x64xbf16>, vector<1x64xf32> -> vector<1x64xf32>
    %930 = arith.addf %924, %929 : vector<1x64xf32>
    %c4_1033 = arith.constant 4 : index
    %c0_1034 = arith.constant 0 : index
    %c0_1035 = arith.constant 0 : index
    %931 = vector.load %arg17[%c4_1033, %c0_1034, %c0_1035] : memref<9x1x64xf32, #tpu.memory_space<vmem>>, vector<1x1x64xf32>
    %932 = vector.shape_cast %931 : vector<1x1x64xf32> to vector<1x64xf32>
    %933 = arith.truncf %932 : vector<1x64xf32> to vector<1x64xbf16>
    %c256_1036 = arith.constant 256 : index
    %c0_1037 = arith.constant 0 : index
    %934 = vector.load %arg6[%c256_1036, %c0_1037] : memref<576x64xbf16, #tpu.memory_space<vmem>>, vector<64x64xbf16>
    %cst_1038 = arith.constant dense<0.000000e+00> : vector<1x64xf32>
    %935 = tpu.matmul %933, %934, %cst_1038 {dimension_numbers = #tpu.dot_dimension_numbers<[1], [0], [0], [1], [0, 0, 1, 1], [], []>} : vector<1x64xbf16>, vector<64x64xbf16>, vector<1x64xf32> -> vector<1x64xf32>
    %936 = arith.addf %930, %935 : vector<1x64xf32>
    %c5_1039 = arith.constant 5 : index
    %c0_1040 = arith.constant 0 : index
    %c0_1041 = arith.constant 0 : index
    %937 = vector.load %arg17[%c5_1039, %c0_1040, %c0_1041] : memref<9x1x64xf32, #tpu.memory_space<vmem>>, vector<1x1x64xf32>
    %938 = vector.shape_cast %937 : vector<1x1x64xf32> to vector<1x64xf32>
    %939 = arith.truncf %938 : vector<1x64xf32> to vector<1x64xbf16>
    %c320_1042 = arith.constant 320 : index
    %c0_1043 = arith.constant 0 : index
    %940 = vector.load %arg6[%c320_1042, %c0_1043] : memref<576x64xbf16, #tpu.memory_space<vmem>>, vector<64x64xbf16>
    %cst_1044 = arith.constant dense<0.000000e+00> : vector<1x64xf32>
    %941 = tpu.matmul %939, %940, %cst_1044 {dimension_numbers = #tpu.dot_dimension_numbers<[1], [0], [0], [1], [0, 0, 1, 1], [], []>} : vector<1x64xbf16>, vector<64x64xbf16>, vector<1x64xf32> -> vector<1x64xf32>
    %942 = arith.addf %936, %941 : vector<1x64xf32>
    %c6_1045 = arith.constant 6 : index
    %c0_1046 = arith.constant 0 : index
    %c0_1047 = arith.constant 0 : index
    %943 = vector.load %arg17[%c6_1045, %c0_1046, %c0_1047] : memref<9x1x64xf32, #tpu.memory_space<vmem>>, vector<1x1x64xf32>
    %944 = vector.shape_cast %943 : vector<1x1x64xf32> to vector<1x64xf32>
    %945 = arith.truncf %944 : vector<1x64xf32> to vector<1x64xbf16>
    %c384_1048 = arith.constant 384 : index
    %c0_1049 = arith.constant 0 : index
    %946 = vector.load %arg6[%c384_1048, %c0_1049] : memref<576x64xbf16, #tpu.memory_space<vmem>>, vector<64x64xbf16>
    %cst_1050 = arith.constant dense<0.000000e+00> : vector<1x64xf32>
    %947 = tpu.matmul %945, %946, %cst_1050 {dimension_numbers = #tpu.dot_dimension_numbers<[1], [0], [0], [1], [0, 0, 1, 1], [], []>} : vector<1x64xbf16>, vector<64x64xbf16>, vector<1x64xf32> -> vector<1x64xf32>
    %948 = arith.addf %942, %947 : vector<1x64xf32>
    %c7_1051 = arith.constant 7 : index
    %c0_1052 = arith.constant 0 : index
    %c0_1053 = arith.constant 0 : index
    %949 = vector.load %arg17[%c7_1051, %c0_1052, %c0_1053] : memref<9x1x64xf32, #tpu.memory_space<vmem>>, vector<1x1x64xf32>
    %950 = vector.shape_cast %949 : vector<1x1x64xf32> to vector<1x64xf32>
    %951 = arith.truncf %950 : vector<1x64xf32> to vector<1x64xbf16>
    %c448_1054 = arith.constant 448 : index
    %c0_1055 = arith.constant 0 : index
    %952 = vector.load %arg6[%c448_1054, %c0_1055] : memref<576x64xbf16, #tpu.memory_space<vmem>>, vector<64x64xbf16>
    %cst_1056 = arith.constant dense<0.000000e+00> : vector<1x64xf32>
    %953 = tpu.matmul %951, %952, %cst_1056 {dimension_numbers = #tpu.dot_dimension_numbers<[1], [0], [0], [1], [0, 0, 1, 1], [], []>} : vector<1x64xbf16>, vector<64x64xbf16>, vector<1x64xf32> -> vector<1x64xf32>
    %954 = arith.addf %948, %953 : vector<1x64xf32>
    %c8_1057 = arith.constant 8 : index
    %c0_1058 = arith.constant 0 : index
    %c0_1059 = arith.constant 0 : index
    %955 = vector.load %arg17[%c8_1057, %c0_1058, %c0_1059] : memref<9x1x64xf32, #tpu.memory_space<vmem>>, vector<1x1x64xf32>
    %956 = vector.shape_cast %955 : vector<1x1x64xf32> to vector<1x64xf32>
    %957 = arith.truncf %956 : vector<1x64xf32> to vector<1x64xbf16>
    %c512 = arith.constant 512 : index
    %c0_1060 = arith.constant 0 : index
    %958 = vector.load %arg6[%c512, %c0_1060] : memref<576x64xbf16, #tpu.memory_space<vmem>>, vector<64x64xbf16>
    %cst_1061 = arith.constant dense<0.000000e+00> : vector<1x64xf32>
    %959 = tpu.matmul %957, %958, %cst_1061 {dimension_numbers = #tpu.dot_dimension_numbers<[1], [0], [0], [1], [0, 0, 1, 1], [], []>} : vector<1x64xbf16>, vector<64x64xbf16>, vector<1x64xf32> -> vector<1x64xf32>
    %960 = arith.addf %954, %959 : vector<1x64xf32>
    %c0_1062 = arith.constant 0 : index
    %c0_1063 = arith.constant 0 : index
    %961 = vector.load %arg7[%c0_1062, %c0_1063] : memref<1x64xf32, #tpu.memory_space<vmem>>, vector<1x64xf32>
    %962 = arith.addf %960, %961 : vector<1x64xf32>
    %cst_1064 = arith.constant 0.000000e+00 : f32
    %963 = vector.broadcast %cst_1064 : f32 to vector<1x64xf32>
    %964 = arith.maximumf %962, %963 : vector<1x64xf32>
    %cst_1065 = arith.constant 0.000000e+00 : f32
    %965 = vector.broadcast %cst_1065 : f32 to vector<1x256xf32>
    %966 = arith.truncf %964 : vector<1x64xf32> to vector<1x64xbf16>
    %c0_1066 = arith.constant 0 : index
    %c0_1067 = arith.constant 0 : index
    %967 = vector.load %arg8[%c0_1066, %c0_1067] : memref<64x256xbf16, #tpu.memory_space<vmem>>, vector<64x256xbf16>
    %cst_1068 = arith.constant dense<0.000000e+00> : vector<1x256xf32>
    %968 = tpu.matmul %966, %967, %cst_1068 {dimension_numbers = #tpu.dot_dimension_numbers<[1], [0], [0], [1], [0, 0, 1, 1], [], []>} : vector<1x64xbf16>, vector<64x256xbf16>, vector<1x256xf32> -> vector<1x256xf32>
    %969 = arith.addf %965, %968 : vector<1x256xf32>
    %c0_1069 = arith.constant 0 : index
    %c0_1070 = arith.constant 0 : index
    %970 = vector.load %arg9[%c0_1069, %c0_1070] : memref<1x256xf32, #tpu.memory_space<vmem>>, vector<1x256xf32>
    %971 = arith.addf %969, %970 : vector<1x256xf32>
    %cst_1071 = arith.constant 0.000000e+00 : f32
    %972 = vector.broadcast %cst_1071 : f32 to vector<1x256xf32>
    %973 = arith.maximumf %971, %972 : vector<1x256xf32>
    %974 = arith.truncf %973 : vector<1x256xf32> to vector<1x256xbf16>
    %c0_1072 = arith.constant 0 : index
    %c0_1073 = arith.constant 0 : index
    %975 = vector.load %arg10[%c0_1072, %c0_1073] : memref<256x2xbf16, #tpu.memory_space<vmem>>, vector<256x2xbf16>
    %cst_1074 = arith.constant dense<0.000000e+00> : vector<1x2xf32>
    %976 = tpu.matmul %974, %975, %cst_1074 {dimension_numbers = #tpu.dot_dimension_numbers<[1], [0], [0], [1], [0, 0, 1, 1], [], []>} : vector<1x256xbf16>, vector<256x2xbf16>, vector<1x2xf32> -> vector<1x2xf32>
    %c0_1075 = arith.constant 0 : index
    %c0_1076 = arith.constant 0 : index
    %977 = vector.load %arg11[%c0_1075, %c0_1076] : memref<1x2xf32, #tpu.memory_space<vmem>>, vector<1x2xf32>
    %978 = arith.addf %976, %977 : vector<1x2xf32>
    %c0_1077 = arith.constant 0 : index
    %c0_1078 = arith.constant 0 : index
    %c0_1079 = arith.constant 0 : index
    %979 = vector.load %arg12[%c0_1077, %c0_1078, %c0_1079] : memref<1x1x2xf32, #tpu.memory_space<vmem>>, vector<1x1x2xf32>
    %980 = vector.shape_cast %979 : vector<1x1x2xf32> to vector<1x2xf32>
    %981 = vector.shape_cast %978 : vector<1x2xf32> to vector<1x1x2xf32>
    tpu.vector_store %arg12[%c0_1077, %c0_1078, %c0_1079], %981 {strides = array<i32>} : memref<1x1x2xf32, #tpu.memory_space<vmem>>, vector<1x1x2xf32>,
    return
  }
  func.func @transform_0(%arg0: i32) -> (i32, i32, i32) {
    %c0_i32 = arith.constant 0 : i32
    %c0_i32_0 = arith.constant 0 : i32
    %c0_i32_1 = arith.constant 0 : i32
    return %arg0, %c0_i32, %c0_i32_0 : i32, i32, i32
  }
  func.func @transform_1(%arg0: i32) -> (i32, i32) {
    %c0_i32 = arith.constant 0 : i32
    %c0_i32_0 = arith.constant 0 : i32
    %c0_i32_1 = arith.constant 0 : i32
    return %c0_i32, %c0_i32_0 : i32, i32
  }
  func.func @transform_2(%arg0: i32) -> (i32, i32) {
    %c0_i32 = arith.constant 0 : i32
    %c0_i32_0 = arith.constant 0 : i32
    %c0_i32_1 = arith.constant 0 : i32
    return %c0_i32, %c0_i32_0 : i32, i32
  }
  func.func @transform_3(%arg0: i32) -> (i32, i32) {
    %c0_i32 = arith.constant 0 : i32
    %c0_i32_0 = arith.constant 0 : i32
    %c0_i32_1 = arith.constant 0 : i32
    return %c0_i32, %c0_i32_0 : i32, i32
  }
  func.func @transform_4(%arg0: i32) -> (i32, i32) {
    %c0_i32 = arith.constant 0 : i32
    %c0_i32_0 = arith.constant 0 : i32
    %c0_i32_1 = arith.constant 0 : i32
    return %c0_i32, %c0_i32_0 : i32, i32
  }
  func.func @transform_5(%arg0: i32) -> (i32, i32) {
    %c0_i32 = arith.constant 0 : i32
    %c0_i32_0 = arith.constant 0 : i32
    %c0_i32_1 = arith.constant 0 : i32
    return %c0_i32, %c0_i32_0 : i32, i32
  }
  func.func @transform_6(%arg0: i32) -> (i32, i32) {
    %c0_i32 = arith.constant 0 : i32
    %c0_i32_0 = arith.constant 0 : i32
    %c0_i32_1 = arith.constant 0 : i32
    return %c0_i32, %c0_i32_0 : i32, i32
  }
  func.func @transform_7(%arg0: i32) -> (i32, i32) {
    %c0_i32 = arith.constant 0 : i32
    %c0_i32_0 = arith.constant 0 : i32
    %c0_i32_1 = arith.constant 0 : i32
    return %c0_i32, %c0_i32_0 : i32, i32
  }
  func.func @transform_8(%arg0: i32) -> (i32, i32) {
    %c0_i32 = arith.constant 0 : i32
    %c0_i32_0 = arith.constant 0 : i32
    %c0_i32_1 = arith.constant 0 : i32
    return %c0_i32, %c0_i32_0 : i32, i32
  }
  func.func @transform_9(%arg0: i32) -> (i32, i32) {
    %c0_i32 = arith.constant 0 : i32
    %c0_i32_0 = arith.constant 0 : i32
    %c0_i32_1 = arith.constant 0 : i32
    return %c0_i32, %c0_i32_0 : i32, i32
  }
  func.func @transform_10(%arg0: i32) -> (i32, i32) {
    %c0_i32 = arith.constant 0 : i32
    %c0_i32_0 = arith.constant 0 : i32
    %c0_i32_1 = arith.constant 0 : i32
    return %c0_i32, %c0_i32_0 : i32, i32
  }
  func.func @transform_11(%arg0: i32) -> (i32, i32, i32) {
    %c0_i32 = arith.constant 0 : i32
    %c0_i32_0 = arith.constant 0 : i32
    %c0_i32_1 = arith.constant 0 : i32
    return %arg0, %c0_i32, %c0_i32_0 : i32, i32, i32
  }
}

</mosaic_0001>

<bundles_post_ra>
// kernel: dqn_forward.1
= control target key start
LH: loop header
LB: loop body
LE: loop exit
PB: predicated region body
PF: predicated region fallthrough
CT: control target
= control target key end

     0   :  { %16 = vsyncpa [#allocation8], 0  ;;  %s4046_s0 = inlined_call_operand.vmem [shape: f32[2,81,64], index: 0, kind: input, shape index: {}]   ;;  %s4047_s1 = inlined_call_operand.vmem [shape: bf16[256,32], index: 1, kind: input, shape index: {}]   ;;  %s4048_s2 = inlined_call_operand.vmem [shape: f32[1,32], index: 2, kind: input, shape index: {}]   ;;  %s4049_s3 = inlined_call_operand.vmem [shape: bf16[512,64], index: 3, kind: input, shape index: {}]   ;;  %s4050_s4 = inlined_call_operand.vmem [shape: f32[1,64], index: 4, kind: input, shape index: {}]   ;;  %s4051_s5 = inlined_call_operand.vmem [shape: bf16[576,64], index: 5, kind: input, shape index: {}]   ;;  %s4052_s6 = inlined_call_operand.vmem [shape: f32[1,64], index: 6, kind: input, shape index: {}]   ;;  %s4053_s7 = inlined_call_operand.vmem [shape: bf16[64,256], index: 7, kind: input, shape index: {}]   ;;  %s4054_s8 = inlined_call_operand.vmem [shape: f32[1,256], index: 8, kind: input, shape index: {}]   ;;  %s4055_s9 = inlined_call_operand.vmem [shape: bf16[256,2], index: 9, kind: input, shape index: {}]   ;;  %s4056_s10 = inlined_call_operand.vmem [shape: f32[1,2], index: 10, kind: input, shape index: {}]   ;;  %s4057_s11 = inlined_call_operand.hbm [shape: f32[2,1,2], index: 11, kind: output, shape index: {}]  }
   0x1   :  { %18 = vsyncpa [#allocation8 + $0x1], 0  ;;  %s3316_s17 = smov 0   ;;  %s3318_s18 = smov 0  }
   0x2   :  { %s3320_s19 = smov 0   ;;  %s3322_s20 = smov 0  }
   0x3 LB: > { %4059 = sst [smem:[#allocation10_spill]] %s3250_s19  ;;  %s3337_s21 = sadd.s32 4294967295, %s3254_s20   ;;  %s3254_s20 = sphi %s3322_s20, %s4067_s20   ;;  %s3250_s19 = sphi %s3320_s19, %s4064_s19   ;;  %s3246_s18 = sphi %s3318_s18, %s4066_s18   ;;  %s3242_s17 = sphi %s3316_s17, %s4065_s17  }
   0x4   : > { %s2556_s22 = sadd.s32 4294967294, %s3254_s20   ;;  %s3341_s23 = sadd.s32 1, %s3254_s20  }
   0x5   : > { %s267_s24 = sadd.s32 1, %s3250_s19  ;;  %s264_s25 = ssub.s32 %s3254_s20, %s3341_s23 }
   0x6   : > { %p277_p0 = scmp.ne.s32.totalorder %s3250_s19, %s3246_s18  ;;  %p265_p1 = scmp.eq.s32.totalorder %s264_s25, 0 }
   0x7   : > { %p278_p2 = scmp.eq.s32.totalorder %s3337_s21, 1  ;;  %p283_p3 = scmp.ne.s32.totalorder %s3246_s18, %s3242_s17 }
   0x8   : > { %p284_p4 = scmp.eq.s32.totalorder %s2556_s22, 1  ;;  %p2559_p7 = scmp.ge.s32.totalorder %s3254_s20, 1 }
   0x9   : > { %s3352_s26 = scalar_select %p265_p1, %s3250_s19, %s267_s24  }
   0xa   : > { %p3354_p5 = por %p278_p2, %p277_p0  ;;  %p3358_p6 = por %p284_p4, %p283_p3 }
   0xb   : > { %4060 = sst [smem:[#allocation11_spill]] %s3352_s26  ;;  %p340_p8 = scmp.lt.s32.totalorder %s3254_s20, 3 }
   0xd   : > { %p341_p9 = pnand %p2559_p7, %p340_p8 }
   0xe   : > { %p379_p10 = scmp.lt.s32.totalorder (!%p341_p9), %s3337_s21, 1  ;;  %s377_s15 = sand.u32 (!%p341_p9), 1, %s3246_s18  }
   0xf   : > { %344 = sbr.rel (%p341_p9) target bundleno = 972 (0x3cc), region = 64  ;;  %s2497_s24 = scalar_lea.hbm (!%p341_p9), %s4057_s11, %s3337_s21 }
  0x10   : > { %s378_s26 = scalar_lea.vmem (!%p341_p9), [#allocation7], %s377_s15  ;;  %s2489_s12 = scalar_lea.sflag (!%p341_p9), [#allocation8], %s377_s15 }
  0x11   : > { %s3212_s22 = scalar_lea.hbm (!%p341_p9), %s4057_s11, 2 }
  0x14   : > { %v3045_v0 = vld [vmem:[%s4047_s1 + $0x38] sm:$0xff]  ;;  %v3044_v3 = vld [vmem:[%s4047_s1 + $0x30] sm:$0xff]  ;;  %s380_s29 = scalar_select %p379_p10, %s3337_s21, 1  ;;  %vm386_vm0 = vcmask 523264   ;;  %v3043_v6 = vld [vmem:[%s4047_s1 + $0x28] sm:$0xff]  ;;  %vm829_vm1 = vcmask 261120  }
  0x15   : > { %v3049_v1 = vld [vmem:[%s4047_s1 + $0x58] sm:$0xff]  ;;  %3146 = vmatpush.bf16.msra.mxu1 %v3045_v0  ;;  %v3048_v4 = vld [vmem:[%s4047_s1 + $0x50] sm:$0xff]  ;;  %533 = vmatpush.bf16.msra.mxu0 %v3045_v0  ;;  %v3047_v7 = vld [vmem:[%s4047_s1 + $0x48] sm:$0xff]  ;;  %vm839_vm2 = vcmask 253952   ;;  %vm1755_vm3 = vcmask 516096   ;;  %vm2486_vm4 = vcmask 8192  }
  0x16   : > { %v3053_v2 = vld [vmem:[%s4047_s1 + $0x78] sm:$0xff]  ;;  %683 = vmatpush.bf16.msra.mxu2 %v3049_v1  ;;  %v3052_v5 = vld [vmem:[%s4047_s1 + $0x70] sm:$0xff]  ;;  %s3150_s13 = smul.u32 88, %s380_s29  ;;  %v3051_v8 = vld [vmem:[%s4047_s1 + $0x68] sm:$0xff]  ;;  %s2499_s29 = sshll.u32 %s378_s26, 4  ;;  %s2500_s29 = int_to_ptr.vmem [resolvable:$true] %s2499_s29 }
  0x17   : > { %776 = vmatpush.bf16.msra.mxu3 %v3053_v2  ;;  %v3042_v14 = vld [vmem:[%s4047_s1 + $0x20] sm:$0xff]  ;;  %v3041_v17 = vld [vmem:[%s4047_s1 + $0x18] sm:$0xff]  ;;  %v3040_v24 = vld [vmem:[%s4047_s1 + $0x10] sm:$0xff] }
  0x18   : > { %s3396_s30 = scalar_lea.vmem %s4046_s0, %s3150_s13  ;;  %v3046_v15 = vld [vmem:[%s4047_s1 + $0x40] sm:$0xff]  ;;  %v3039_v34 = vld [vmem:[%s4047_s1 + $0x8] sm:$0xff] }
  0x19   : > { %3147 = vmatpush.bf16.msra.mxu1 %v3044_v3  ;;  %534 = vmatpush.bf16.msra.mxu0 %v3044_v3  ;;  %v3399_v9 = vld [vmem:[%s3396_s30 + $0x37] sm:$0xff]  ;;  %v3402_v10 = vld [vmem:[%s3396_s30 + $0x40] sm:$0xff]  ;;  %v419_v11 = vld [vmem:[%s3396_s30 + $0x9] sm:$0xff] }
  0x1a   : > { %684 = vmatpush.bf16.msra.mxu2 %v3048_v4  ;;  %416 = vst.msk [vmem:[#allocation2 + $0x70] sm:$0xff] %vm386_vm0, %v3399_v9  ;;  %v422_v12 = vld [vmem:[%s3396_s30 + $0x12] sm:$0xff]  ;;  %v436_v13 = vld [vmem:[%s3396_s30 + $0xa] sm:$0xff]  ;;  %v3050_v18 = vld [vmem:[%s4047_s1 + $0x60] sm:$0xff] }
  0x1b   : > { %777 = vmatpush.bf16.msra.mxu3 %v3052_v5  ;;  %418 = vst.msk [vmem:[#allocation2 + $0x78] sm:$0xff] %vm386_vm0, %v3402_v10  ;;  %v439_v16 = vld [vmem:[%s3396_s30 + $0x13] sm:$0xff]  ;;  %v402_v19 = vld [vmem:[%s3396_s30 + $0x1] sm:$0xff]  ;;  %v451_v57 = vld [vmem:[%s3396_s30 + $0x49] sm:$0xff] }
  0x1c   : > { %421 = vst.msk [vmem:[#allocation2 + $0x80] sm:$0xff] %vm386_vm0, %v419_v11  ;;  %v385_v20 = vld [vmem:[%s3396_s30] sm:$0xff]  ;;  %v428_v39 = vld [vmem:[%s3396_s30 + $0x2d] sm:$0xff]  ;;  %v430_v41 = vld [vmem:[%s3396_s30 + $0x36] sm:$0xff] }
  0x1d   : > { %3148 = vmatpush.bf16.msra.mxu1 %v3043_v6  ;;  %535 = vmatpush.bf16.msra.mxu0 %v3043_v6  ;;  %423 = vst.msk [vmem:[#allocation2 + $0x88] sm:$0xff] %vm386_vm0, %v422_v12  ;;  %v424_v22 = vld [vmem:[%s3396_s30 + $0x1b] sm:$0xff]  ;;  %v426_v25 = vld [vmem:[%s3396_s30 + $0x24] sm:$0xff]  ;;  %v445_v42 = vld [vmem:[%s3396_s30 + $0x2e] sm:$0xff] }
  0x1e   : > { %685 = vmatpush.bf16.msra.mxu2 %v3047_v7  ;;  %438 = vst.msk [vmem:[#allocation2 + $0xc0] sm:$0xff] %vm386_vm0, %v436_v13  ;;  %v441_v28 = vld [vmem:[%s3396_s30 + $0x1c] sm:$0xff]  ;;  %v443_v30 = vld [vmem:[%s3396_s30 + $0x25] sm:$0xff] }
  0x1f   : > { %778 = vmatpush.bf16.msra.mxu3 %v3051_v8  ;;  %440 = vst.msk [vmem:[#allocation2 + $0xc8] sm:$0xff] %vm386_vm0, %v439_v16  ;;  %v3038_v40 = vld [vmem:[%s4047_s1] sm:$0xff]  ;;  %v434_v55 = vld [vmem:[%s3396_s30 + $0x48] sm:$0xff] }
  0x20   : > { %404 = vst.msk [vmem:[#allocation2 + $0x40] sm:$0xff] %vm386_vm0, %v402_v19  ;;  %v432_v54 = vld [vmem:[%s3396_s30 + $0x3f] sm:$0xff]  ;;  %s2501_s30 = sshll.u32 %s2497_s24, 4  ;;  %s2502_s30 = int_to_ptr.hbm [resolvable:$true] %s2501_s30 }
  0x21   : > { %3149 = vmatpush.bf16.msra.mxu1 %v3042_v14  ;;  %v479_v21 = vld [vmem:[#allocation2 + $0x70] sm:$0xff]  ;;  %406 = vst.msk [vmem:[#allocation2 + $0x48] sm:$0xff] %vm386_vm0, %v436_v13  ;;  %536 = vmatpush.bf16.msra.mxu0 %v3042_v14  ;;  %v3061_v19 = vld [vmem:[%s4049_s3 + $0x38] sm:$0xff]  ;;  %s3206_s13 = sshra.s32 %s2502_s30, 4  ;;  %s3207_s13 = int_to_ptr.hbm [resolvable:$true] %s3206_s13 }
  0x22   : > { %686 = vmatpush.bf16.msra.mxu2 %v3046_v15  ;;  %v480_v23 = vld [vmem:[#allocation2 + $0x78] sm:$0xff]  ;;  %387 = vst.msk [vmem:[#allocation2] sm:$0xff] %vm386_vm0, %v385_v20  ;;  %s3208_s21 = scalar_lea.hbm %s3207_s13, 1  ;;  %p3213_p0 = scmp.lt.s32.totalorder %s3207_s13, %s4057_s11 }
  0x23   : > { %779 = vmatpush.bf16.msra.mxu3 %v3050_v18  ;;  %v484_v26 = vpack.c.bf16 %v480_v23, %v479_v21  ;;  %v623_v27 = vld [vmem:[#allocation2 + $0x80] sm:$0xff]  ;;  %389 = vst.msk [vmem:[#allocation2 + $0x8] sm:$0xff] %vm386_vm0, %v419_v11  ;;  %v3059_v18 = vld [vmem:[%s4049_s3 + $0x28] sm:$0xff]  ;;  %p3209_p11 = scmp.ne.s32.totalorder %s3207_s13, %s3208_s21  ;;  %p3214_p1 = scmp.lt.s32.totalorder %s3212_s22, %s3208_s21 }
  0x24   : > { %v624_v29 = vld [vmem:[#allocation2 + $0x88] sm:$0xff]  ;;  %425 = vst.msk [vmem:[#allocation2 + $0x90] sm:$0xff] %vm386_vm0, %v424_v22 }
  0x25   : > { %598 = vmatpush.bf16.msrb.mxu1 %v3041_v17  ;;  %v631_v31 = vpack.c.bf16 %v624_v29, %v623_v27  ;;  %v716_v32 = vld [vmem:[#allocation2 + $0xc0] sm:$0xff]  ;;  %427 = vst.msk [vmem:[#allocation2 + $0x98] sm:$0xff] %vm386_vm0, %v426_v25  ;;  %p3210_p12 = pnand %p3209_p11, %p3354_p5  ;;  %p3215_p2 = por %p3214_p1, %p3213_p0 }
  0x26   : > { %2580 = vmatmul.msk.bf16.vlgmr.msra.gmra.mxu1 %vm386_vm0, %v484_v26  ;;  %v717_v33 = vld [vmem:[#allocation2 + $0xc8] sm:$0xff]  ;;  %442 = vst.msk [vmem:[#allocation2 + $0xd0] sm:$0xff] %vm386_vm0, %v441_v28  ;;  %1242 = vmatpush.bf16.msrb.mxu2 %v3059_v18  ;;  %v3509_v29 = vld [vmem:[%s4048_s2] ss:$0 sm:$0xff] }
  0x27   : > { %2617 = vmatmul.msk.bf16.vlgmr.msra.gmra.mxu2 %vm386_vm0, %v631_v31  ;;  %v724_v35 = vpack.c.bf16 %v717_v33, %v716_v32  ;;  %v473_v36 = vld [vmem:[#allocation2 + $0x40] sm:$0xff]  ;;  %444 = vst.msk [vmem:[#allocation2 + $0xd8] sm:$0xff] %vm386_vm0, %v443_v30  ;;  %1280 = vmatpush.bf16.msrb.mxu3 %v3061_v19  ;;  %p3211_p13 = pneg %p3210_p12 }
  0x28   : > { %v474_v37 = vld [vmem:[#allocation2 + $0x48] sm:$0xff]  ;;  %408 = vst.msk [vmem:[#allocation2 + $0x50] sm:$0xff] %vm386_vm0, %v439_v16 }
  0x29   : > { %599 = vmatpush.bf16.msrb.mxu1 %v3040_v24  ;;  %2637 = vmatmul.msk.bf16.vlgmr.msra.gmra.mxu3 %vm386_vm0, %v724_v35  ;;  %v481_v38 = vpack.c.bf16 %v474_v37, %v473_v36  ;;  %410 = vst.msk [vmem:[#allocation2 + $0x58] sm:$0xff] %vm386_vm0, %v441_v28  ;;  %v453_v43 = vld [vmem:[#allocation2] sm:$0xff]  ;;  %v3055_v24 = vld [vmem:[%s4049_s3 + $0x8] sm:$0xff]  ;;  %p3216_p3 = pnand %p3215_p2, %p3211_p13 }
  0x2a   : > { %391 = vst.msk [vmem:[#allocation2 + $0x10] sm:$0xff] %vm386_vm0, %v422_v12  ;;  %v454_v44 = vld [vmem:[#allocation2 + $0x8] sm:$0xff] }
  0x2b   : > { %2577 = vmatmul.msk.bf16.vlgmr.msra.gmra.mxu0 %vm386_vm0, %v481_v38  ;;  %393 = vst.msk [vmem:[#allocation2 + $0x18] sm:$0xff] %vm386_vm0, %v424_v22  ;;  %v625_v45 = vld [vmem:[#allocation2 + $0x90] sm:$0xff]  ;;  %v461_v47 = vpack.c.bf16 %v454_v44, %v453_v43 }
  0x2c   : > { %429 = vst.msk [vmem:[#allocation2 + $0xa0] sm:$0xff] %vm386_vm0, %v428_v39  ;;  %v626_v46 = vld [vmem:[#allocation2 + $0x98] sm:$0xff] }
  0x2d   : > { %600 = vmatpush.bf16.msrb.mxu1 %v3039_v34  ;;  %431 = vst.msk [vmem:[#allocation2 + $0xa8] sm:$0xff] %vm386_vm0, %v430_v41  ;;  %v718_v48 = vld [vmem:[#allocation2 + $0xd0] sm:$0xff]  ;;  %v632_v50 = vpack.c.bf16 %v626_v46, %v625_v45 }
  0x2e   : > { %446 = vst.msk [vmem:[#allocation2 + $0xe0] sm:$0xff] %vm386_vm0, %v445_v42  ;;  %v719_v49 = vld [vmem:[#allocation2 + $0xd8] sm:$0xff] }
  0x2f   : > { %448 = vst.msk [vmem:[#allocation2 + $0xe8] sm:$0xff] %vm386_vm0, %v3399_v9  ;;  %v475_v51 = vld [vmem:[#allocation2 + $0x50] sm:$0xff]  ;;  %v725_v53 = vpack.c.bf16 %v719_v49, %v718_v48 }
  0x30   : > { %412 = vst.msk [vmem:[#allocation2 + $0x60] sm:$0xff] %vm386_vm0, %v443_v30  ;;  %v476_v52 = vld [vmem:[#allocation2 + $0x58] sm:$0xff] }
  0x31   : > { %601 = vmatpush.bf16.msrb.mxu1 %v3038_v40  ;;  %414 = vst.msk [vmem:[#allocation2 + $0x68] sm:$0xff] %vm386_vm0, %v445_v42  ;;  %v482_v56 = vpack.c.bf16 %v476_v52, %v475_v51  ;;  %v455_v58 = vld [vmem:[#allocation2 + $0x10] sm:$0xff] }
  0x32   : > { %395 = vst.msk [vmem:[#allocation2 + $0x20] sm:$0xff] %vm386_vm0, %v426_v25  ;;  %v456_v59 = vld [vmem:[#allocation2 + $0x18] sm:$0xff] }
  0x33   : > { %397 = vst.msk [vmem:[#allocation2 + $0x28] sm:$0xff] %vm386_vm0, %v428_v39  ;;  %v627_v60 = vld [vmem:[#allocation2 + $0xa0] sm:$0xff]  ;;  %v462_v62 = vpack.c.bf16 %v456_v59, %v455_v58 }
  0x34   : > { %450 = vst.msk [vmem:[#allocation2 + $0xf0] sm:$0xff] %vm386_vm0, %v3402_v10  ;;  %v628_v61 = vld [vmem:[#allocation2 + $0xa8] sm:$0xff] }
  0x35   : > { %399 = vst.msk [vmem:[#allocation2 + $0x30] sm:$0xff] %vm386_vm0, %v430_v41  ;;  %v720_v63 = vld [vmem:[#allocation2 + $0xe0] sm:$0xff]  ;;  %v633_v1 = vpack.c.bf16 %v628_v61, %v627_v60  ;;  %1206 = vmatpush.bf16.msra.mxu1 %v3055_v24 }
  0x36   : > { %2597 = vmatmul.msk.bf16.vlgmr.msrb.gmra.mxu1 %vm386_vm0, %v461_v47  ;;  %433 = vst.msk [vmem:[#allocation2 + $0xb0] sm:$0xff] %vm386_vm0, %v432_v54  ;;  %v721_v0 = vld [vmem:[#allocation2 + $0xe8] sm:$0xff] }
  0x37   : > { %2618 = vmatmul.msk.bf16.gmra.mxu2 %vm386_vm0, %v632_v50  ;;  %435 = vst.msk [vmem:[#allocation2 + $0xb8] sm:$0xff] %vm386_vm0, %v434_v55  ;;  %v477_v2 = vld [vmem:[#allocation2 + $0x60] sm:$0xff]  ;;  %v726_v4 = vpack.c.bf16 %v721_v0, %v720_v63 }
  0x38   : > { %452 = vst.msk [vmem:[#allocation2 + $0xf8] sm:$0xff] %vm386_vm0, %v451_v57  ;;  %v478_v3 = vld [vmem:[#allocation2 + $0x68] sm:$0xff] }
  0x39   : > { %2638 = vmatmul.msk.bf16.gmra.mxu3 %vm386_vm0, %v725_v53  ;;  %401 = vst.msk [vmem:[#allocation2 + $0x38] sm:$0xff] %vm386_vm0, %v432_v54  ;;  %v483_v5 = vpack.c.bf16 %v478_v3, %v477_v2  ;;  %v457_v6 = vld [vmem:[#allocation2 + $0x20] sm:$0xff]  ;;  %v3057_v54 = vld [vmem:[%s4049_s3 + $0x18] sm:$0xff] }
  0x3a   : > { %v458_v7 = vld [vmem:[#allocation2 + $0x28] sm:$0xff]  ;;  %1177 = vmatpush.bf16.msrb.mxu0 %v3057_v54 }
  0x3b   : > { %2578 = vmatmul.msk.bf16.gmra.mxu0 %vm386_vm0, %v482_v56  ;;  %v463_v10 = vpack.c.bf16 %v458_v7, %v457_v6  ;;  %v722_v11 = vld [vmem:[#allocation2 + $0xf0] sm:$0xff] }
  0x3c   : > { %v459_v15 = vld [vmem:[#allocation2 + $0x30] sm:$0xff] }
  0x3d   : > { %v629_v8 = vld [vmem:[#allocation2 + $0xb0] sm:$0xff] }
  0x3e   : > { %v630_v9 = vld [vmem:[#allocation2 + $0xb8] sm:$0xff] }
  0x3f   : > { %v723_v12 = vld [vmem:[#allocation2 + $0xf8] sm:$0xff]  ;;  %v634_v13 = vpack.c.bf16 %v630_v9, %v629_v8 }
  0x40   : > { %v727_v14 = vpack.c.bf16 %v723_v12, %v722_v11  ;;  %v460_v16 = vld [vmem:[#allocation2 + $0x38] sm:$0xff] }
  0x41   : > { %v464_v17 = vpack.c.bf16 %v460_v16, %v459_v15 }
  0x46   : > { %2598 = vmatmul.msk.bf16.gmra.mxu1 %vm386_vm0, %v462_v62 }
  0x47   : > { %2619 = vmatmul.msk.bf16.gmra.mxu2 %vm386_vm0, %v633_v1 }
  0x49   : > { %2639 = vmatmul.msk.bf16.gmra.mxu3 %vm386_vm0, %v726_v4 }
  0x4b   : > { %2579 = vmatmul.msk.bf16.gmra.mxu0 %vm386_vm0, %v483_v5 }
  0x56   : > { %2599 = vmatmul.msk.bf16.gmra.mxu1 %vm386_vm0, %v463_v10 }
  0x57   : > { %2620 = vmatmul.msk.bf16.gmra.mxu2 %vm386_vm0, %v634_v13 }
  0x59   : > { %2640 = vmatmul.msk.bf16.gmra.mxu3 %vm386_vm0, %v727_v14 }
  0x66   : > { %2600 = vmatmul.msk.bf16.gmra.mxu1 %vm386_vm0, %v464_v17 }
  0xa3   : > { %v3499_v20 = vpop.f32.mrf.mxu1 }
  0xa8   : > { %v538_v22 = vpop.f32.mrf.mxu0 }
  0xaa   : > { %v688_v23 = vpop.f32.mrf.mxu2 }
  0xab   : > { %v3501_v21 = vpop.f32.mrf.mxu1 }
  0xac   : > { %v781_v25 = vpop.f32.mrf.mxu3 }
  0xb0   : > { %v540_v31 = vpop.f32.mrf.mxu0 }
  0xb2   : > { %v690_v33 = vpop.f32.mrf.mxu2 }
  0xb3   : > { %v603_v26 = vpop.f32.mrf.mxu1 }
  0xb4   : > { %v604_v27 = vadd.f32 %v603_v26, %v538_v22  ;;  %v783_v36 = vpop.f32.mrf.mxu3 }
  0xb6   : > { %v708_v28 = vadd.f32 %v688_v23, %v604_v27 }
  0xb8   : > { %v801_v30 = vadd.f32 %v781_v25, %v708_v28  ;;  %v543_v38 = vpop.f32.mrf.mxu0 }
  0xba   : > { %v813_v32 = vadd.f32 %v3509_v29, %v801_v30  ;;  %v693_v45 = vpop.f32.mrf.mxu2 }
  0xbb   : > { %v605_v34 = vpop.f32.mrf.mxu1 }
  0xbc   : > { %v821_v35 = vmax.f32 %v813_v32, 0.0  ;;  %v606_v37 = vadd.f32 %v605_v34, %v540_v31  ;;  %v786_v49 = vpop.f32.mrf.mxu3 }
  0xbe   : > { %830 = vst.msk [vmem:[#allocation3] sm:$0xff] %vm829_vm1, %v821_v35  ;;  %v709_v39 = vadd.f32 %v690_v33, %v606_v37 }
  0xc0   : > { %v802_v48 = vadd.f32 %v783_v36, %v709_v39  ;;  %v545_v18 = vpop.f32.mrf.mxu0 }
  0xc2   : > { %v814_v56 = vadd.f32 %v3509_v29, %v802_v48  ;;  %v695_v24 = vpop.f32.mrf.mxu2 }
  0xc3   : > { %v608_v40 = vpop.f32.mrf.mxu1 }
  0xc4   : > { %v609_v41 = vadd.f32 %v608_v40, %v543_v38  ;;  %v822_v62 = vmax.f32 %v814_v56, 0.0  ;;  %v788_v28 = vpop.f32.mrf.mxu3 }
  0xc5   : > { %v838_v42 = vld [vmem:[#allocation3] sm:$0x1]  ;;  %v841_v43 = vld [vmem:[#allocation3 + $0x2] sm:$0x1]  ;;  %v843_v44 = vld [vmem:[#allocation3 + $0x4] sm:$0x1] }
  0xc6   : > { %840 = vst.msk [vmem:[#allocation4] sm:$0x1] %vm839_vm2, %v838_v42  ;;  %v710_v46 = vadd.f32 %v693_v45, %v609_v41  ;;  %v857_v47 = vld [vmem:[#allocation3 + $0x1] sm:$0x1]  ;;  %v860_v50 = vld [vmem:[#allocation3 + $0x3] sm:$0x1] }
  0xc7   : > { %842 = vst.msk [vmem:[#allocation4 + $0x1] sm:$0x1] %vm839_vm2, %v841_v43  ;;  %v862_v52 = vld [vmem:[#allocation3 + $0x5] sm:$0x1]  ;;  %v876_v53 = vld [vmem:[#allocation3 + $0x2] sm:$0x1] }
  0xc8   : > { %844 = vst.msk [vmem:[#allocation4 + $0x2] sm:$0x1] %vm839_vm2, %v843_v44  ;;  %v803_v51 = vadd.f32 %v786_v49, %v710_v46  ;;  %v879_v55 = vld [vmem:[#allocation3 + $0x4] sm:$0x1]  ;;  %v881_v57 = vld [vmem:[#allocation3 + $0x6] sm:$0x1]  ;;  %v548_v37 = vpop.f32.mrf.mxu0 }
  0xc9   : > { %859 = vst.msk [vmem:[#allocation4 + $0x10] sm:$0x1] %vm839_vm2, %v857_v47  ;;  %v895_v59 = vld [vmem:[#allocation3 + $0x3] sm:$0x1]  ;;  %v898_v60 = vld [vmem:[#allocation3 + $0x5] sm:$0x1] }
  0xca   : > { %861 = vst.msk [vmem:[#allocation4 + $0x11] sm:$0x1] %vm839_vm2, %v860_v50  ;;  %v815_v58 = vadd.f32 %v3509_v29, %v803_v51  ;;  %v900_v61 = vld [vmem:[#allocation3 + $0x7] sm:$0x1]  ;;  %v698_v43 = vpop.f32.mrf.mxu2 }
  0xcb   : > { %863 = vst.msk [vmem:[#allocation4 + $0x12] sm:$0x1] %vm839_vm2, %v862_v52  ;;  %v610_v17 = vpop.f32.mrf.mxu1 }
  0xcc   : > { %878 = vst.msk [vmem:[#allocation4 + $0x20] sm:$0x1] %vm839_vm2, %v876_v53  ;;  %v823_v63 = vmax.f32 %v815_v58, 0.0  ;;  %v611_v25 = vadd.f32 %v610_v17, %v545_v18  ;;  %v791_v48 = vpop.f32.mrf.mxu3  ;;  %v3060_v58 = vld [vmem:[%s4049_s3 + $0x30] sm:$0xff] }
  0xcd   : > { %880 = vst.msk [vmem:[#allocation4 + $0x21] sm:$0x1] %vm839_vm2, %v879_v55  ;;  %1281 = vmatpush.bf16.msrb.mxu3 %v3060_v58 }
  0xce   : > { %882 = vst.msk [vmem:[#allocation4 + $0x22] sm:$0x1] %vm839_vm2, %v881_v57  ;;  %v711_v32 = vadd.f32 %v695_v24, %v611_v25  ;;  %v3058_v57 = vld [vmem:[%s4049_s3 + $0x20] sm:$0xff]  ;;  %v3056_v24 = vld [vmem:[%s4049_s3 + $0x10] sm:$0xff] }
  0xcf   : > { %897 = vst.msk [vmem:[#allocation4 + $0x30] sm:$0x1] %vm839_vm2, %v895_v59  ;;  %1243 = vmatpush.bf16.msrb.mxu2 %v3058_v57  ;;  %1178 = vmatpush.bf16.msrb.mxu0 %v3056_v24 }
  0xd0   : > { %899 = vst.msk [vmem:[#allocation4 + $0x31] sm:$0x1] %vm839_vm2, %v898_v60  ;;  %v804_v38 = vadd.f32 %v788_v28, %v711_v32 }
  0xd1   : > { %901 = vst.msk [vmem:[#allocation4 + $0x32] sm:$0x1] %vm839_vm2, %v900_v61 }
  0xd2   : > { %831 = vst.msk [vmem:[#allocation3 + $0x8] sm:$0xff] %vm829_vm1, %v822_v62  ;;  %v816_v47 = vadd.f32 %v3509_v29, %v804_v38 }
  0xd3   : > { %832 = vst.msk [vmem:[#allocation3 + $0x10] sm:$0xff] %vm829_vm1, %v823_v63  ;;  %v613_v39 = vpop.f32.mrf.mxu1 }
  0xd4   : > { %v614_v41 = vadd.f32 %v613_v39, %v548_v37  ;;  %v824_v55 = vmax.f32 %v816_v47, 0.0  ;;  %v700_v37 = vpop.f32.mrf.mxu2 }
  0xd6   : > { %v712_v45 = vadd.f32 %v698_v43, %v614_v41  ;;  %833 = vst.msk [vmem:[#allocation3 + $0x18] sm:$0xff] %vm829_vm1, %v824_v55 }
  0xd8   : > { %v805_v50 = vadd.f32 %v791_v48, %v712_v45 }
  0xd9   : > { %v914_v0 = vld [vmem:[#allocation3 + $0x8] sm:$0x1]  ;;  %v917_v1 = vld [vmem:[#allocation3 + $0xa] sm:$0x1]  ;;  %v919_v2 = vld [vmem:[#allocation3 + $0xc] sm:$0x1] }
  0xda   : > { %916 = vst.msk [vmem:[#allocation4 + $0x40] sm:$0x1] %vm839_vm2, %v914_v0  ;;  %v933_v3 = vld [vmem:[#allocation3 + $0x9] sm:$0x1]  ;;  %v936_v4 = vld [vmem:[#allocation3 + $0xb] sm:$0x1]  ;;  %v817_v53 = vadd.f32 %v3509_v29, %v805_v50 }
  0xdb   : > { %918 = vst.msk [vmem:[#allocation4 + $0x41] sm:$0x1] %vm839_vm2, %v917_v1  ;;  %v938_v5 = vld [vmem:[#allocation3 + $0xd] sm:$0x1]  ;;  %v952_v6 = vld [vmem:[#allocation3 + $0xa] sm:$0x1]  ;;  %v615_v28 = vpop.f32.mrf.mxu1 }
  0xdc   : > { %920 = vst.msk [vmem:[#allocation4 + $0x42] sm:$0x1] %vm839_vm2, %v919_v2  ;;  %v955_v7 = vld [vmem:[#allocation3 + $0xc] sm:$0x1]  ;;  %v957_v8 = vld [vmem:[#allocation3 + $0xe] sm:$0x1] }
  0xdd   : > { %935 = vst.msk [vmem:[#allocation4 + $0x50] sm:$0x1] %vm839_vm2, %v933_v3  ;;  %v971_v9 = vld [vmem:[#allocation3 + $0xb] sm:$0x1]  ;;  %v974_v10 = vld [vmem:[#allocation3 + $0xd] sm:$0x1] }
  0xde   : > { %937 = vst.msk [vmem:[#allocation4 + $0x51] sm:$0x1] %vm839_vm2, %v936_v4  ;;  %v976_v11 = vld [vmem:[#allocation3 + $0xf] sm:$0x1]  ;;  %v845_v12 = vld [vmem:[#allocation3 + $0x10] sm:$0x1] }
  0xdf   : > { %939 = vst.msk [vmem:[#allocation4 + $0x52] sm:$0x1] %vm839_vm2, %v938_v5  ;;  %v847_v13 = vld [vmem:[#allocation3 + $0x12] sm:$0x1]  ;;  %v849_v14 = vld [vmem:[#allocation3 + $0x14] sm:$0x1] }
  0xe0   : > { %954 = vst.msk [vmem:[#allocation4 + $0x60] sm:$0x1] %vm839_vm2, %v952_v6  ;;  %v990_v15 = vld [vmem:[#allocation3 + $0x10] sm:$0x1]  ;;  %v993_v16 = vld [vmem:[#allocation3 + $0x12] sm:$0x1] }
  0xe1   : > { %956 = vst.msk [vmem:[#allocation4 + $0x61] sm:$0x1] %vm839_vm2, %v955_v7  ;;  %v995_v19 = vld [vmem:[#allocation3 + $0x14] sm:$0x1]  ;;  %v1009_v22 = vld [vmem:[#allocation3 + $0x11] sm:$0x1] }
  0xe2   : > { %958 = vst.msk [vmem:[#allocation4 + $0x62] sm:$0x1] %vm839_vm2, %v957_v8  ;;  %v1012_v23 = vld [vmem:[#allocation3 + $0x13] sm:$0x1]  ;;  %v1014_v26 = vld [vmem:[#allocation3 + $0x15] sm:$0x1] }
  0xe3   : > { %973 = vst.msk [vmem:[#allocation4 + $0x70] sm:$0x1] %vm839_vm2, %v971_v9  ;;  %v1028_v27 = vld [vmem:[#allocation3 + $0x12] sm:$0x1]  ;;  %v1031_v30 = vld [vmem:[#allocation3 + $0x14] sm:$0x1]  ;;  %v618_v47 = vpop.f32.mrf.mxu1 }
  0xe4   : > { %975 = vst.msk [vmem:[#allocation4 + $0x71] sm:$0x1] %vm839_vm2, %v974_v10  ;;  %v1033_v31 = vld [vmem:[#allocation3 + $0x16] sm:$0x1]  ;;  %v1047_v33 = vld [vmem:[#allocation3 + $0x13] sm:$0x1] }
  0xe5   : > { %977 = vst.msk [vmem:[#allocation4 + $0x72] sm:$0x1] %vm839_vm2, %v976_v11  ;;  %v1050_v34 = vld [vmem:[#allocation3 + $0x15] sm:$0x1]  ;;  %v1052_v35 = vld [vmem:[#allocation3 + $0x17] sm:$0x1] }
  0xe6   : > { %846 = vst.msk [vmem:[#allocation4 + $0x3] sm:$0x1] %vm839_vm2, %v845_v12  ;;  %v864_v36 = vld [vmem:[#allocation3 + $0x11] sm:$0x1]  ;;  %v866_v40 = vld [vmem:[#allocation3 + $0x13] sm:$0x1] }
  0xe7   : > { %848 = vst.msk [vmem:[#allocation4 + $0x4] sm:$0x1] %vm839_vm2, %v847_v13  ;;  %v868_v42 = vld [vmem:[#allocation3 + $0x15] sm:$0x1]  ;;  %v883_v44 = vld [vmem:[#allocation3 + $0x12] sm:$0x1] }
  0xe8   : > { %850 = vst.msk [vmem:[#allocation4 + $0x5] sm:$0x1] %vm839_vm2, %v849_v14  ;;  %v885_v46 = vld [vmem:[#allocation3 + $0x14] sm:$0x1]  ;;  %v887_v49 = vld [vmem:[#allocation3 + $0x16] sm:$0x1] }
  0xe9   : > { %992 = vst.msk [vmem:[#allocation4 + $0x80] sm:$0x1] %vm839_vm2, %v990_v15  ;;  %v902_v51 = vld [vmem:[#allocation3 + $0x13] sm:$0x1]  ;;  %v904_v52 = vld [vmem:[#allocation3 + $0x15] sm:$0x1] }
  0xea   : > { %994 = vst.msk [vmem:[#allocation4 + $0x81] sm:$0x1] %vm839_vm2, %v993_v16  ;;  %v906_v54 = vld [vmem:[#allocation3 + $0x17] sm:$0x1]  ;;  %v825_v56 = vmax.f32 %v817_v53, 0.0 }
  0xeb   : > { %996 = vst.msk [vmem:[#allocation4 + $0x82] sm:$0x1] %vm839_vm2, %v995_v19  ;;  %v921_v59 = vld [vmem:[#allocation3 + $0x18] sm:$0x1]  ;;  %v923_v60 = vld [vmem:[#allocation3 + $0x1a] sm:$0x1] }
  0xec   : > { %1011 = vst.msk [vmem:[#allocation4 + $0x90] sm:$0x1] %vm839_vm2, %v1009_v22  ;;  %v925_v61 = vld [vmem:[#allocation3 + $0x1c] sm:$0x1]  ;;  %v940_v62 = vld [vmem:[#allocation3 + $0x19] sm:$0x1] }
  0xed   : > { %1013 = vst.msk [vmem:[#allocation4 + $0x91] sm:$0x1] %vm839_vm2, %v1012_v23  ;;  %v942_v63 = vld [vmem:[#allocation3 + $0x1b] sm:$0x1]  ;;  %v944_v0 = vld [vmem:[#allocation3 + $0x1d] sm:$0x1] }
  0xee   : > { %1015 = vst.msk [vmem:[#allocation4 + $0x92] sm:$0x1] %vm839_vm2, %v1014_v26  ;;  %v959_v1 = vld [vmem:[#allocation3 + $0x1a] sm:$0x1]  ;;  %v961_v2 = vld [vmem:[#allocation3 + $0x1c] sm:$0x1] }
  0xef   : > { %1030 = vst.msk [vmem:[#allocation4 + $0xa0] sm:$0x1] %vm839_vm2, %v1028_v27  ;;  %v963_v3 = vld [vmem:[#allocation3 + $0x1e] sm:$0x1]  ;;  %v978_v4 = vld [vmem:[#allocation3 + $0x1b] sm:$0x1] }
  0xf0   : > { %1032 = vst.msk [vmem:[#allocation4 + $0xa1] sm:$0x1] %vm839_vm2, %v1031_v30  ;;  %v980_v5 = vld [vmem:[#allocation3 + $0x1d] sm:$0x1]  ;;  %v982_v6 = vld [vmem:[#allocation3 + $0x1f] sm:$0x1] }
  0xf1   : > { %1034 = vst.msk [vmem:[#allocation4 + $0xa2] sm:$0x1] %vm839_vm2, %v1033_v31  ;;  %v1066_v7 = vld [vmem:[#allocation3 + $0x18] sm:$0x1]  ;;  %v1069_v8 = vld [vmem:[#allocation3 + $0x1a] sm:$0x1]  ;;  %v550_v31 = vpop.f32.mrf.mxu0 }
  0xf2   : > { %1049 = vst.msk [vmem:[#allocation4 + $0xb0] sm:$0x1] %vm839_vm2, %v1047_v33  ;;  %v1071_v9 = vld [vmem:[#allocation3 + $0x1c] sm:$0x1]  ;;  %v1085_v10 = vld [vmem:[#allocation3 + $0x19] sm:$0x1] }
  0xf3   : > { %1051 = vst.msk [vmem:[#allocation4 + $0xb1] sm:$0x1] %vm839_vm2, %v1050_v34  ;;  %v1088_v11 = vld [vmem:[#allocation3 + $0x1b] sm:$0x1]  ;;  %v1090_v12 = vld [vmem:[#allocation3 + $0x1d] sm:$0x1]  ;;  %v616_v34 = vadd.f32 %v615_v28, %v550_v31 }
  0xf4   : > { %1053 = vst.msk [vmem:[#allocation4 + $0xb2] sm:$0x1] %vm839_vm2, %v1052_v35  ;;  %v1104_v13 = vld [vmem:[#allocation3 + $0x1a] sm:$0x1]  ;;  %v1107_v14 = vld [vmem:[#allocation3 + $0x1c] sm:$0x1] }
  0xf5   : > { %865 = vst.msk [vmem:[#allocation4 + $0x13] sm:$0x1] %vm839_vm2, %v864_v36  ;;  %v1109_v15 = vld [vmem:[#allocation3 + $0x1e] sm:$0x1]  ;;  %v1123_v16 = vld [vmem:[#allocation3 + $0x1b] sm:$0x1]  ;;  %v713_v41 = vadd.f32 %v700_v37, %v616_v34 }
  0xf6   : > { %867 = vst.msk [vmem:[#allocation4 + $0x14] sm:$0x1] %vm839_vm2, %v866_v40  ;;  %v1126_v17 = vld [vmem:[#allocation3 + $0x1d] sm:$0x1]  ;;  %v1128_v18 = vld [vmem:[#allocation3 + $0x1f] sm:$0x1]  ;;  %v793_v40 = vpop.f32.mrf.mxu3 }
  0xf7   : > { %869 = vst.msk [vmem:[#allocation4 + $0x15] sm:$0x1] %vm839_vm2, %v868_v42  ;;  %v3054_v23 = vld [vmem:[%s4049_s3] sm:$0xff] }
  0xf8   : > { %884 = vst.msk [vmem:[#allocation4 + $0x23] sm:$0x1] %vm839_vm2, %v883_v44  ;;  %1207 = vmatpush.bf16.msra.mxu1 %v3054_v23 }
  0xf9   : > { %886 = vst.msk [vmem:[#allocation4 + $0x24] sm:$0x1] %vm839_vm2, %v885_v46  ;;  %v806_v46 = vadd.f32 %v793_v40, %v713_v41 }
  0xfa   : > { %888 = vst.msk [vmem:[#allocation4 + $0x25] sm:$0x1] %vm839_vm2, %v887_v49  ;;  %v619_v49 = vadd.f32 %v618_v47, %v3499_v20 }
  0xfb   : > { %903 = vst.msk [vmem:[#allocation4 + $0x33] sm:$0x1] %vm839_vm2, %v902_v51  ;;  %v703_v51 = vpop.f32.mrf.mxu2  ;;  %v818_v55 = vadd.f32 %v3509_v29, %v806_v46  ;;  %v3065_v46 = vld [vmem:[%s4049_s3 + $0x58] sm:$0xff] }
  0xfc   : > { %905 = vst.msk [vmem:[#allocation4 + $0x34] sm:$0x1] %vm839_vm2, %v904_v52  ;;  %v714_v53 = vadd.f32 %v703_v51, %v619_v49  ;;  %v3066_v51 = vld [vmem:[%s4049_s3 + $0x60] sm:$0xff]  ;;  %1356 = vmatpush.bf16.msrb.mxu1 %v3065_v46 }
  0xfd   : > { %907 = vst.msk [vmem:[#allocation4 + $0x35] sm:$0x1] %vm839_vm2, %v906_v54 }
  0xfe   : > { %834 = vst.msk [vmem:[#allocation3 + $0x20] sm:$0xff] %vm829_vm1, %v825_v56  ;;  %v796_v56 = vpop.f32.mrf.mxu3 }
  0xff   : > { %922 = vst.msk [vmem:[#allocation4 + $0x43] sm:$0x1] %vm839_vm2, %v921_v59  ;;  %v807_v58 = vadd.f32 %v796_v56, %v714_v53  ;;  %v3062_v53 = vld [vmem:[%s4049_s3 + $0x40] sm:$0xff]  ;;  %v3064_v56 = vld [vmem:[%s4049_s3 + $0x50] sm:$0xff] }
 0x100   : > { %924 = vst.msk [vmem:[#allocation4 + $0x44] sm:$0x1] %vm839_vm2, %v923_v60  ;;  %1357 = vmatpush.bf16.msrb.mxu1 %v3064_v56 }
 0x101   : > { %926 = vst.msk [vmem:[#allocation4 + $0x45] sm:$0x1] %vm839_vm2, %v925_v61  ;;  %v819_v60 = vadd.f32 %v3509_v29, %v807_v58 }
 0x102   : > { %941 = vst.msk [vmem:[#allocation4 + $0x53] sm:$0x1] %vm839_vm2, %v940_v62  ;;  %v826_v62 = vmax.f32 %v818_v55, 0.0 }
 0x103   : > { %943 = vst.msk [vmem:[#allocation4 + $0x54] sm:$0x1] %vm839_vm2, %v942_v63  ;;  %v827_v63 = vmax.f32 %v819_v60, 0.0 }
 0x104   : > { %945 = vst.msk [vmem:[#allocation4 + $0x55] sm:$0x1] %vm839_vm2, %v944_v0 }
 0x105   : > { %960 = vst.msk [vmem:[#allocation4 + $0x63] sm:$0x1] %vm839_vm2, %v959_v1  ;;  %v851_v19 = vld [vmem:[#allocation3 + $0x20] sm:$0x1]  ;;  %v853_v22 = vld [vmem:[#allocation3 + $0x22] sm:$0x1] }
 0x106   : > { %962 = vst.msk [vmem:[#allocation4 + $0x64] sm:$0x1] %vm839_vm2, %v961_v2  ;;  %v855_v25 = vld [vmem:[#allocation3 + $0x24] sm:$0x1]  ;;  %v997_v26 = vld [vmem:[#allocation3 + $0x20] sm:$0x1]  ;;  %v798_v37 = vpop.f32.mrf.mxu3 }
 0x107   : > { %964 = vst.msk [vmem:[#allocation4 + $0x65] sm:$0x1] %vm839_vm2, %v963_v3  ;;  %v999_v27 = vld [vmem:[#allocation3 + $0x22] sm:$0x1]  ;;  %v1001_v30 = vld [vmem:[#allocation3 + $0x24] sm:$0x1] }
 0x108   : > { %979 = vst.msk [vmem:[#allocation4 + $0x73] sm:$0x1] %vm839_vm2, %v978_v4  ;;  %v1016_v32 = vld [vmem:[#allocation3 + $0x21] sm:$0x1]  ;;  %v1018_v33 = vld [vmem:[#allocation3 + $0x23] sm:$0x1] }
 0x109   : > { %981 = vst.msk [vmem:[#allocation4 + $0x74] sm:$0x1] %vm839_vm2, %v980_v5  ;;  %v1020_v35 = vld [vmem:[#allocation3 + $0x25] sm:$0x1]  ;;  %v1035_v36 = vld [vmem:[#allocation3 + $0x22] sm:$0x1] }
 0x10a   : > { %983 = vst.msk [vmem:[#allocation4 + $0x75] sm:$0x1] %vm839_vm2, %v982_v6  ;;  %v1037_v38 = vld [vmem:[#allocation3 + $0x24] sm:$0x1]  ;;  %v1039_v39 = vld [vmem:[#allocation3 + $0x26] sm:$0x1] }
 0x10b   : > { %1068 = vst.msk [vmem:[#allocation4 + $0xc0] sm:$0x1] %vm839_vm2, %v1066_v7  ;;  %v1054_v42 = vld [vmem:[#allocation3 + $0x23] sm:$0x1]  ;;  %v1056_v43 = vld [vmem:[#allocation3 + $0x25] sm:$0x1] }
 0x10c   : > { %1070 = vst.msk [vmem:[#allocation4 + $0xc1] sm:$0x1] %vm839_vm2, %v1069_v8  ;;  %v1058_v44 = vld [vmem:[#allocation3 + $0x27] sm:$0x1]  ;;  %v870_v45 = vld [vmem:[#allocation3 + $0x21] sm:$0x1] }
 0x10d   : > { %1072 = vst.msk [vmem:[#allocation4 + $0xc2] sm:$0x1] %vm839_vm2, %v1071_v9  ;;  %v872_v48 = vld [vmem:[#allocation3 + $0x23] sm:$0x1]  ;;  %v874_v50 = vld [vmem:[#allocation3 + $0x25] sm:$0x1] }
 0x10e   : > { %1087 = vst.msk [vmem:[#allocation4 + $0xd0] sm:$0x1] %vm839_vm2, %v1085_v10  ;;  %v889_v52 = vld [vmem:[#allocation3 + $0x22] sm:$0x1]  ;;  %v891_v54 = vld [vmem:[#allocation3 + $0x24] sm:$0x1] }
 0x10f   : > { %1089 = vst.msk [vmem:[#allocation4 + $0xd1] sm:$0x1] %vm839_vm2, %v1088_v11  ;;  %v893_v57 = vld [vmem:[#allocation3 + $0x26] sm:$0x1]  ;;  %v908_v59 = vld [vmem:[#allocation3 + $0x23] sm:$0x1] }
 0x110   : > { %1091 = vst.msk [vmem:[#allocation4 + $0xd2] sm:$0x1] %vm839_vm2, %v1090_v12  ;;  %v910_v20 = vld [vmem:[#allocation3 + $0x25] sm:$0x1]  ;;  %v912_v61 = vld [vmem:[#allocation3 + $0x27] sm:$0x1] }
 0x111   : > { %1106 = vst.msk [vmem:[#allocation4 + $0xe0] sm:$0x1] %vm839_vm2, %v1104_v13 }
 0x112   : > { %1108 = vst.msk [vmem:[#allocation4 + $0xe1] sm:$0x1] %vm839_vm2, %v1107_v14 }
 0x113   : > { %1110 = vst.msk [vmem:[#allocation4 + $0xe2] sm:$0x1] %vm839_vm2, %v1109_v15  ;;  %v620_v15 = vpop.f32.mrf.mxu1 }
 0x114   : > { %1125 = vst.msk [vmem:[#allocation4 + $0xf0] sm:$0x1] %vm839_vm2, %v1123_v16 }
 0x115   : > { %1127 = vst.msk [vmem:[#allocation4 + $0xf1] sm:$0x1] %vm839_vm2, %v1126_v17 }
 0x116   : > { %1129 = vst.msk [vmem:[#allocation4 + $0xf2] sm:$0x1] %vm839_vm2, %v1128_v18 }
 0x117   : > { %852 = vst.msk [vmem:[#allocation4 + $0x6] sm:$0x1] %vm839_vm2, %v851_v19 }
 0x118   : > { %854 = vst.msk [vmem:[#allocation4 + $0x7] sm:$0x1] %vm839_vm2, %v853_v22  ;;  %v621_v22 = vadd.f32 %v620_v15, %v3501_v21 }
 0x119   : > { %856 = vst.msk [vmem:[#allocation4 + $0x8] sm:$0x1] %vm839_vm2, %v855_v25  ;;  %v705_v25 = vpop.f32.mrf.mxu2 }
 0x11a   : > { %998 = vst.msk [vmem:[#allocation4 + $0x83] sm:$0x1] %vm839_vm2, %v997_v26  ;;  %v715_v34 = vadd.f32 %v705_v25, %v621_v22  ;;  %v3079_v22 = vld [vmem:[%s4049_s3 + $0xc8] sm:$0xff]  ;;  %v3081_v25 = vld [vmem:[%s4049_s3 + $0xd8] sm:$0xff] }
 0x11b   : > { %1000 = vst.msk [vmem:[#allocation4 + $0x84] sm:$0x1] %vm839_vm2, %v999_v27 }
 0x11c   : > { %1002 = vst.msk [vmem:[#allocation4 + $0x85] sm:$0x1] %vm839_vm2, %v1001_v30 }
 0x11d   : > { %1017 = vst.msk [vmem:[#allocation4 + $0x93] sm:$0x1] %vm839_vm2, %v1016_v32 }
 0x11e   : > { %1019 = vst.msk [vmem:[#allocation4 + $0x94] sm:$0x1] %vm839_vm2, %v1018_v33 }
 0x11f   : > { %1021 = vst.msk [vmem:[#allocation4 + $0x95] sm:$0x1] %vm839_vm2, %v1020_v35  ;;  %v1142_v31 = vld [vmem:[#allocation4] sm:$0xff] }
 0x120   : > { %1036 = vst.msk [vmem:[#allocation4 + $0xa3] sm:$0x1] %vm839_vm2, %v1035_v36  ;;  %v1143_v35 = vld [vmem:[#allocation4 + $0x8] sm:$0x1] }
 0x121   : > { %1038 = vst.msk [vmem:[#allocation4 + $0xa4] sm:$0x1] %vm839_vm2, %v1037_v38  ;;  %v1144_v38 = vpack.c.bf16 %v1143_v35, %v1142_v31 }
 0x122   : > { %1040 = vst.msk [vmem:[#allocation4 + $0xa5] sm:$0x1] %vm839_vm2, %v1039_v39 }
 0x123   : > { %1055 = vst.msk [vmem:[#allocation4 + $0xb3] sm:$0x1] %vm839_vm2, %v1054_v42  ;;  %v3067_v42 = vld [vmem:[%s4049_s3 + $0x68] sm:$0xff]  ;;  %2658 = vmatmul.msk.bf16.vlgmr.msra.gmra.mxu1 %vm829_vm1, %v1144_v38 }
 0x124   : > { %1057 = vst.msk [vmem:[#allocation4 + $0xb4] sm:$0x1] %vm839_vm2, %v1056_v43  ;;  %1394 = vmatpush.bf16.msra.mxu2 %v3067_v42 }
 0x125   : > { %1059 = vst.msk [vmem:[#allocation4 + $0xb5] sm:$0x1] %vm839_vm2, %v1058_v44  ;;  %v3063_v44 = vld [vmem:[%s4049_s3 + $0x48] sm:$0xff] }
 0x126   : > { %871 = vst.msk [vmem:[#allocation4 + $0x16] sm:$0x1] %vm839_vm2, %v870_v45  ;;  %v3069_v45 = vld [vmem:[%s4049_s3 + $0x78] sm:$0xff]  ;;  %1318 = vmatpush.bf16.msra.mxu0 %v3063_v44 }
 0x127   : > { %873 = vst.msk [vmem:[#allocation4 + $0x17] sm:$0x1] %vm839_vm2, %v872_v48  ;;  %1432 = vmatpush.bf16.msra.mxu3 %v3069_v45 }
 0x128   : > { %875 = vst.msk [vmem:[#allocation4 + $0x18] sm:$0x1] %vm839_vm2, %v874_v50  ;;  %v808_v50 = vadd.f32 %v798_v37, %v715_v34  ;;  %1395 = vmatpush.bf16.msra.mxu2 %v3066_v51 }
 0x129   : > { %890 = vst.msk [vmem:[#allocation4 + $0x26] sm:$0x1] %vm839_vm2, %v889_v52 }
 0x12a   : > { %892 = vst.msk [vmem:[#allocation4 + $0x27] sm:$0x1] %vm839_vm2, %v891_v54  ;;  %v3068_v54 = vld [vmem:[%s4049_s3 + $0x70] sm:$0xff]  ;;  %1319 = vmatpush.bf16.msra.mxu0 %v3062_v53 }
 0x12b   : > { %894 = vst.msk [vmem:[#allocation4 + $0x28] sm:$0x1] %vm839_vm2, %v893_v57  ;;  %v3075_v57 = vld [vmem:[%s4049_s3 + $0xa8] sm:$0xff]  ;;  %1433 = vmatpush.bf16.msra.mxu3 %v3068_v54 }
 0x12c   : > { %909 = vst.msk [vmem:[#allocation4 + $0x36] sm:$0x1] %vm839_vm2, %v908_v59  ;;  %v3071_v59 = vld [vmem:[%s4049_s3 + $0x88] sm:$0xff] }
 0x12d   : > { %911 = vst.msk [vmem:[#allocation4 + $0x37] sm:$0x1] %vm839_vm2, %v910_v20  ;;  %v3077_v20 = vld [vmem:[%s4049_s3 + $0xb8] sm:$0xff] }
 0x12e   : > { %913 = vst.msk [vmem:[#allocation4 + $0x38] sm:$0x1] %vm839_vm2, %v912_v61  ;;  %v1149_v27 = vld [vmem:[#allocation4 + $0x10] sm:$0xff]  ;;  %v820_v61 = vadd.f32 %v3509_v29, %v808_v50  ;;  %v3074_v29 = vld [vmem:[%s4049_s3 + $0xa0] sm:$0xff] }
 0x12f   : > { %835 = vst.msk [vmem:[#allocation3 + $0x28] sm:$0xff] %vm829_vm1, %v826_v62  ;;  %v1150_v30 = vld [vmem:[#allocation4 + $0x18] sm:$0x1] }
 0x130   : > { %836 = vst.msk [vmem:[#allocation3 + $0x30] sm:$0xff] %vm829_vm1, %v827_v63  ;;  %v1151_v21 = vpack.c.bf16 %v1150_v30, %v1149_v27  ;;  %v3073_v62 = vld [vmem:[%s4049_s3 + $0x98] sm:$0xff]  ;;  %v3078_v27 = vld [vmem:[%s4049_s3 + $0xc0] sm:$0xff]  ;;  %v3080_v30 = vld [vmem:[%s4049_s3 + $0xd0] sm:$0xff] }
 0x131   : > { %v1214_v32 = vld [vmem:[#allocation4 + $0x20] sm:$0xff]  ;;  %1508 = vmatpush.bf16.msra.mxu1 %v3073_v62 }
 0x132   : > { %v1215_v36 = vld [vmem:[#allocation4 + $0x28] sm:$0x1]  ;;  %2649 = vmatmul.msk.bf16.vlgmr.msrb.gmra.mxu0 %vm829_vm1, %v1151_v21 }
 0x133   : > { %v1216_v39 = vpack.c.bf16 %v1215_v36, %v1214_v32  ;;  %1470 = vmatpush.bf16.msrb.mxu0 %v3071_v59 }
 0x134   : > { %v1252_v40 = vld [vmem:[#allocation4 + $0x30] sm:$0xff] }
 0x135   : > { %v1253_v41 = vld [vmem:[#allocation4 + $0x38] sm:$0x1]  ;;  %2667 = vmatmul.msk.bf16.vlgmr.msrb.gmra.mxu2 %vm829_vm1, %v1216_v39 }
 0x136   : > { %v927_v0 = vld [vmem:[#allocation3 + $0x28] sm:$0x1]  ;;  %v929_v1 = vld [vmem:[#allocation3 + $0x2a] sm:$0x1]  ;;  %v931_v2 = vld [vmem:[#allocation3 + $0x2c] sm:$0x1]  ;;  %v1254_v43 = vpack.c.bf16 %v1253_v41, %v1252_v40  ;;  %1546 = vmatpush.bf16.msrb.mxu2 %v3075_v57 }
 0x137   : > { %928 = vst.msk [vmem:[#allocation4 + $0x46] sm:$0x1] %vm839_vm2, %v927_v0  ;;  %v946_v3 = vld [vmem:[#allocation3 + $0x29] sm:$0x1]  ;;  %v948_v4 = vld [vmem:[#allocation3 + $0x2b] sm:$0x1] }
 0x138   : > { %930 = vst.msk [vmem:[#allocation4 + $0x47] sm:$0x1] %vm839_vm2, %v929_v1  ;;  %v950_v5 = vld [vmem:[#allocation3 + $0x2d] sm:$0x1]  ;;  %v965_v6 = vld [vmem:[#allocation3 + $0x2a] sm:$0x1]  ;;  %2676 = vmatmul.msk.bf16.vlgmr.msrb.gmra.mxu3 %vm829_vm1, %v1254_v43 }
 0x139   : > { %932 = vst.msk [vmem:[#allocation4 + $0x48] sm:$0x1] %vm839_vm2, %v931_v2  ;;  %v967_v7 = vld [vmem:[#allocation3 + $0x2c] sm:$0x1]  ;;  %v969_v8 = vld [vmem:[#allocation3 + $0x2e] sm:$0x1]  ;;  %1584 = vmatpush.bf16.msrb.mxu3 %v3077_v20 }
 0x13a   : > { %947 = vst.msk [vmem:[#allocation4 + $0x56] sm:$0x1] %vm839_vm2, %v946_v3  ;;  %v984_v9 = vld [vmem:[#allocation3 + $0x2b] sm:$0x1]  ;;  %v986_v10 = vld [vmem:[#allocation3 + $0x2d] sm:$0x1]  ;;  %1547 = vmatpush.bf16.msrb.mxu2 %v3074_v29 }
 0x13b   : > { %949 = vst.msk [vmem:[#allocation4 + $0x57] sm:$0x1] %vm839_vm2, %v948_v4  ;;  %v988_v11 = vld [vmem:[#allocation3 + $0x2f] sm:$0x1]  ;;  %v1073_v12 = vld [vmem:[#allocation3 + $0x28] sm:$0x1] }
 0x13c   : > { %951 = vst.msk [vmem:[#allocation4 + $0x58] sm:$0x1] %vm839_vm2, %v950_v5  ;;  %v1075_v13 = vld [vmem:[#allocation3 + $0x2a] sm:$0x1]  ;;  %v1077_v14 = vld [vmem:[#allocation3 + $0x2c] sm:$0x1] }
 0x13d   : > { %966 = vst.msk [vmem:[#allocation4 + $0x66] sm:$0x1] %vm839_vm2, %v965_v6  ;;  %v1092_v16 = vld [vmem:[#allocation3 + $0x29] sm:$0x1]  ;;  %v1094_v17 = vld [vmem:[#allocation3 + $0x2b] sm:$0x1] }
 0x13e   : > { %968 = vst.msk [vmem:[#allocation4 + $0x67] sm:$0x1] %vm839_vm2, %v967_v7  ;;  %v1096_v18 = vld [vmem:[#allocation3 + $0x2d] sm:$0x1]  ;;  %v1111_v19 = vld [vmem:[#allocation3 + $0x2a] sm:$0x1] }
 0x13f   : > { %970 = vst.msk [vmem:[#allocation4 + $0x68] sm:$0x1] %vm839_vm2, %v969_v8  ;;  %v1113_v23 = vld [vmem:[#allocation3 + $0x2c] sm:$0x1]  ;;  %v1115_v24 = vld [vmem:[#allocation3 + $0x2e] sm:$0x1] }
 0x140   : > { %985 = vst.msk [vmem:[#allocation4 + $0x76] sm:$0x1] %vm839_vm2, %v984_v9  ;;  %v1130_v26 = vld [vmem:[#allocation3 + $0x2b] sm:$0x1]  ;;  %v1132_v28 = vld [vmem:[#allocation3 + $0x2d] sm:$0x1] }
 0x141   : > { %987 = vst.msk [vmem:[#allocation4 + $0x77] sm:$0x1] %vm839_vm2, %v986_v10  ;;  %v1134_v33 = vld [vmem:[#allocation3 + $0x2f] sm:$0x1]  ;;  %v1003_v47 = vld [vmem:[#allocation3 + $0x30] sm:$0x1] }
 0x142   : > { %989 = vst.msk [vmem:[#allocation4 + $0x78] sm:$0x1] %vm839_vm2, %v988_v11  ;;  %v1005_v48 = vld [vmem:[#allocation3 + $0x32] sm:$0x1]  ;;  %v1007_v49 = vld [vmem:[#allocation3 + $0x34] sm:$0x1] }
 0x143   : > { %1074 = vst.msk [vmem:[#allocation4 + $0xc3] sm:$0x1] %vm839_vm2, %v1073_v12  ;;  %v1022_v52 = vld [vmem:[#allocation3 + $0x31] sm:$0x1]  ;;  %v1024_v55 = vld [vmem:[#allocation3 + $0x33] sm:$0x1] }
 0x144   : > { %1076 = vst.msk [vmem:[#allocation4 + $0xc4] sm:$0x1] %vm839_vm2, %v1075_v13  ;;  %v1026_v58 = vld [vmem:[#allocation3 + $0x35] sm:$0x1]  ;;  %v1041_v60 = vld [vmem:[#allocation3 + $0x32] sm:$0x1] }
 0x145   : > { %1078 = vst.msk [vmem:[#allocation4 + $0xc5] sm:$0x1] %vm839_vm2, %v1077_v14  ;;  %v1043_v63 = vld [vmem:[#allocation3 + $0x34] sm:$0x1]  ;;  %v1045_v0 = vld [vmem:[#allocation3 + $0x36] sm:$0x1] }
 0x146   : > { %1093 = vst.msk [vmem:[#allocation4 + $0xd3] sm:$0x1] %vm839_vm2, %v1092_v16  ;;  %v1060_v1 = vld [vmem:[#allocation3 + $0x33] sm:$0x1]  ;;  %v1062_v2 = vld [vmem:[#allocation3 + $0x35] sm:$0x1] }
 0x147   : > { %1095 = vst.msk [vmem:[#allocation4 + $0xd4] sm:$0x1] %vm839_vm2, %v1094_v17  ;;  %v3070_v3 = vld [vmem:[%s4049_s3 + $0x80] sm:$0xff]  ;;  %v3076_v4 = vld [vmem:[%s4049_s3 + $0xb0] sm:$0xff]  ;;  %v828_v6 = vmax.f32 %v820_v61, 0.0  ;;  %v3083_v17 = vld [vmem:[%s4049_s3 + $0xe8] sm:$0xff] }
 0x148   : > { %1097 = vst.msk [vmem:[#allocation4 + $0xd5] sm:$0x1] %vm839_vm2, %v1096_v18  ;;  %v1064_v5 = vld [vmem:[#allocation3 + $0x37] sm:$0x1]  ;;  %v1290_v7 = vld [vmem:[#allocation4 + $0x40] sm:$0xff]  ;;  %1471 = vmatpush.bf16.msrb.mxu0 %v3070_v3  ;;  %1585 = vmatpush.bf16.msrb.mxu3 %v3076_v4 }
 0x149   : > { %1112 = vst.msk [vmem:[#allocation4 + $0xe3] sm:$0x1] %vm839_vm2, %v1111_v19  ;;  %v3072_v8 = vld [vmem:[%s4049_s3 + $0x90] sm:$0xff]  ;;  %v1291_v9 = vld [vmem:[#allocation4 + $0x48] sm:$0x1]  ;;  %v1366_v12 = vld [vmem:[#allocation4 + $0x60] sm:$0xff] }
 0x14a   : > { %1114 = vst.msk [vmem:[#allocation4 + $0xe4] sm:$0x1] %vm839_vm2, %v1113_v23  ;;  %v1329_v10 = vld [vmem:[#allocation4 + $0x58] sm:$0x1]  ;;  %v1328_v11 = vld [vmem:[#allocation4 + $0x50] sm:$0xff]  ;;  %v1292_v16 = vpack.c.bf16 %v1291_v9, %v1290_v7  ;;  %1509 = vmatpush.bf16.msra.mxu1 %v3072_v8 }
 0x14b   : > { %1116 = vst.msk [vmem:[#allocation4 + $0xe5] sm:$0x1] %vm839_vm2, %v1115_v24  ;;  %v1367_v13 = vld [vmem:[#allocation4 + $0x68] sm:$0x1]  ;;  %v1404_v14 = vld [vmem:[#allocation4 + $0x70] sm:$0xff]  ;;  %v1330_v18 = vpack.c.bf16 %v1329_v10, %v1328_v11  ;;  %v3085_v23 = vld [vmem:[%s4049_s3 + $0xf8] sm:$0xff] }
 0x14c   : > { %1131 = vst.msk [vmem:[#allocation4 + $0xf3] sm:$0x1] %vm839_vm2, %v1130_v26  ;;  %v1405_v15 = vld [vmem:[#allocation4 + $0x78] sm:$0x1]  ;;  %v1368_v19 = vpack.c.bf16 %v1367_v13, %v1366_v12  ;;  %2685 = vmatmul.msk.bf16.vlgmr.msra.gmra.mxu0 %vm829_vm1, %v1292_v16  ;;  %v3082_v26 = vld [vmem:[%s4049_s3 + $0xe0] sm:$0xff] }
 0x14d   : > { %1133 = vst.msk [vmem:[#allocation4 + $0xf4] sm:$0x1] %vm839_vm2, %v1132_v28  ;;  %v1406_v24 = vpack.c.bf16 %v1405_v15, %v1404_v14  ;;  %2694 = vmatmul.msk.bf16.vlgmr.msrb.gmra.mxu1 %vm829_vm1, %v1330_v18  ;;  %1622 = vmatpush.bf16.msra.mxu0 %v3079_v22  ;;  %v3084_v28 = vld [vmem:[%s4049_s3 + $0xf0] sm:$0xff] }
 0x14e   : > { %1135 = vst.msk [vmem:[#allocation4 + $0xf5] sm:$0x1] %vm839_vm2, %v1134_v33  ;;  %2703 = vmatmul.msk.bf16.vlgmr.msra.gmra.mxu2 %vm829_vm1, %v1368_v19  ;;  %1660 = vmatpush.bf16.msrb.mxu1 %v3081_v25 }
 0x14f   : > { %1004 = vst.msk [vmem:[#allocation4 + $0x86] sm:$0x1] %vm839_vm2, %v1003_v47  ;;  %2712 = vmatmul.msk.bf16.vlgmr.msra.gmra.mxu3 %vm829_vm1, %v1406_v24  ;;  %1698 = vmatpush.bf16.msra.mxu2 %v3083_v17 }
 0x150   : > { %1006 = vst.msk [vmem:[#allocation4 + $0x87] sm:$0x1] %vm839_vm2, %v1005_v48  ;;  %1736 = vmatpush.bf16.msra.mxu3 %v3085_v23 }
 0x151   : > { %1008 = vst.msk [vmem:[#allocation4 + $0x88] sm:$0x1] %vm839_vm2, %v1007_v49  ;;  %1623 = vmatpush.bf16.msra.mxu0 %v3078_v27 }
 0x152   : > { %1023 = vst.msk [vmem:[#allocation4 + $0x96] sm:$0x1] %vm839_vm2, %v1022_v52  ;;  %1661 = vmatpush.bf16.msrb.mxu1 %v3080_v30 }
 0x153   : > { %1025 = vst.msk [vmem:[#allocation4 + $0x97] sm:$0x1] %vm839_vm2, %v1024_v55  ;;  %1699 = vmatpush.bf16.msra.mxu2 %v3082_v26 }
 0x154   : > { %1027 = vst.msk [vmem:[#allocation4 + $0x98] sm:$0x1] %vm839_vm2, %v1026_v58  ;;  %1737 = vmatpush.bf16.msra.mxu3 %v3084_v28 }
 0x155   : > { %1042 = vst.msk [vmem:[#allocation4 + $0xa6] sm:$0x1] %vm839_vm2, %v1041_v60 }
 0x156   : > { %1044 = vst.msk [vmem:[#allocation4 + $0xa7] sm:$0x1] %vm839_vm2, %v1043_v63 }
 0x157   : > { %1046 = vst.msk [vmem:[#allocation4 + $0xa8] sm:$0x1] %vm839_vm2, %v1045_v0  ;;  %v1442_v35 = vld [vmem:[#allocation4 + $0x80] sm:$0xff] }
 0x158   : > { %1061 = vst.msk [vmem:[#allocation4 + $0xb6] sm:$0x1] %vm839_vm2, %v1060_v1  ;;  %v1443_v36 = vld [vmem:[#allocation4 + $0x88] sm:$0x1] }
 0x159   : > { %1063 = vst.msk [vmem:[#allocation4 + $0xb7] sm:$0x1] %vm839_vm2, %v1062_v2  ;;  %v1444_v48 = vpack.c.bf16 %v1443_v36, %v1442_v35 }
 0x15a   : > { %1065 = vst.msk [vmem:[#allocation4 + $0xb8] sm:$0x1] %vm839_vm2, %v1064_v5  ;;  %v1480_v38 = vld [vmem:[#allocation4 + $0x90] sm:$0xff] }
 0x15b   : > { %837 = vst.msk [vmem:[#allocation3 + $0x38] sm:$0xff] %vm829_vm1, %v828_v6  ;;  %v1481_v39 = vld [vmem:[#allocation4 + $0x98] sm:$0x1] }
 0x15c   : > { %v1482_v50 = vpack.c.bf16 %v1481_v39, %v1480_v38  ;;  %2721 = vmatmul.msk.bf16.vlgmr.msrb.gmra.mxu0 %vm829_vm1, %v1444_v48  ;;  %v3093_v48 = vld [vmem:[%s4051_s5 + $0x38] sm:$0xff] }
 0x15d   : > { %v1518_v43 = vld [vmem:[#allocation4 + $0xa0] sm:$0xff]  ;;  %1834 = vmatpush.bf16.msrb.mxu0 %v3093_v48 }
 0x15e   : > { %v1519_v41 = vld [vmem:[#allocation4 + $0xa8] sm:$0x1]  ;;  %2730 = vmatmul.msk.bf16.vlgmr.msra.gmra.mxu1 %vm829_vm1, %v1482_v50  ;;  %v3097_v50 = vld [vmem:[%s4051_s5 + $0x58] sm:$0xff] }
 0x15f   : > { %v1520_v51 = vpack.c.bf16 %v1519_v41, %v1518_v43 }
 0x160   : > { %v1556_v44 = vld [vmem:[#allocation4 + $0xb0] sm:$0xff] }
 0x161   : > { %v1557_v46 = vld [vmem:[#allocation4 + $0xb8] sm:$0x1]  ;;  %2739 = vmatmul.msk.bf16.vlgmr.msrb.gmra.mxu2 %vm829_vm1, %v1520_v51 }
 0x162   : > { %v1079_v31 = vld [vmem:[#allocation3 + $0x38] sm:$0x1]  ;;  %v1081_v32 = vld [vmem:[#allocation3 + $0x3a] sm:$0x1]  ;;  %v1083_v33 = vld [vmem:[#allocation3 + $0x3c] sm:$0x1]  ;;  %v1558_v53 = vpack.c.bf16 %v1557_v46, %v1556_v44  ;;  %1924 = vmatpush.bf16.msrb.mxu2 %v3097_v50 }
 0x163   : > { %1080 = vst.msk [vmem:[#allocation4 + $0xc6] sm:$0x1] %vm839_vm2, %v1079_v31  ;;  %v1098_v34 = vld [vmem:[#allocation3 + $0x39] sm:$0x1]  ;;  %v1100_v21 = vld [vmem:[#allocation3 + $0x3b] sm:$0x1] }
 0x164   : > { %1082 = vst.msk [vmem:[#allocation4 + $0xc7] sm:$0x1] %vm839_vm2, %v1081_v32  ;;  %v1102_v37 = vld [vmem:[#allocation3 + $0x3d] sm:$0x1]  ;;  %v1117_v40 = vld [vmem:[#allocation3 + $0x3a] sm:$0x1]  ;;  %2748 = vmatmul.msk.bf16.vlgmr.msrb.gmra.mxu3 %vm829_vm1, %v1558_v53 }
 0x165   : > { %1084 = vst.msk [vmem:[#allocation4 + $0xc8] sm:$0x1] %vm839_vm2, %v1083_v33  ;;  %v1119_v42 = vld [vmem:[#allocation3 + $0x3c] sm:$0x1]  ;;  %v1121_v45 = vld [vmem:[#allocation3 + $0x3e] sm:$0x1] }
 0x166   : > { %1099 = vst.msk [vmem:[#allocation4 + $0xd6] sm:$0x1] %vm839_vm2, %v1098_v34  ;;  %v1136_v47 = vld [vmem:[#allocation3 + $0x3b] sm:$0x1]  ;;  %v1138_v49 = vld [vmem:[#allocation3 + $0x3d] sm:$0x1] }
 0x167   : > { %1101 = vst.msk [vmem:[#allocation4 + $0xd7] sm:$0x1] %vm839_vm2, %v1100_v21  ;;  %v1140_v52 = vld [vmem:[#allocation3 + $0x3f] sm:$0x1] }
 0x168   : > { %1103 = vst.msk [vmem:[#allocation4 + $0xd8] sm:$0x1] %vm839_vm2, %v1102_v37 }
 0x169   : > { %1118 = vst.msk [vmem:[#allocation4 + $0xe6] sm:$0x1] %vm839_vm2, %v1117_v40 }
 0x16a   : > { %1120 = vst.msk [vmem:[#allocation4 + $0xe7] sm:$0x1] %vm839_vm2, %v1119_v42 }
 0x16b   : > { %1122 = vst.msk [vmem:[#allocation4 + $0xe8] sm:$0x1] %vm839_vm2, %v1121_v45  ;;  %v1594_v54 = vld [vmem:[#allocation4 + $0xc0] sm:$0xff] }
 0x16c   : > { %1137 = vst.msk [vmem:[#allocation4 + $0xf6] sm:$0x1] %vm839_vm2, %v1136_v47  ;;  %v1595_v55 = vld [vmem:[#allocation4 + $0xc8] sm:$0x1] }
 0x16d   : > { %1139 = vst.msk [vmem:[#allocation4 + $0xf7] sm:$0x1] %vm839_vm2, %v1138_v49  ;;  %v1596_v61 = vpack.c.bf16 %v1595_v55, %v1594_v54  ;;  %v3089_v49 = vld [vmem:[%s4051_s5 + $0x18] sm:$0xff]  ;;  %v3092_v54 = vld [vmem:[%s4051_s5 + $0x30] sm:$0xff] }
 0x16e   : > { %1141 = vst.msk [vmem:[#allocation4 + $0xf8] sm:$0x1] %vm839_vm2, %v1140_v52  ;;  %v1632_v56 = vld [vmem:[#allocation4 + $0xd0] sm:$0xff]  ;;  %v3101_v52 = vld [vmem:[%s4051_s5 + $0x78] sm:$0xff]  ;;  %1874 = vmatpush.bf16.msra.mxu1 %v3089_v49  ;;  %1835 = vmatpush.bf16.msrb.mxu0 %v3092_v54 }
 0x16f   : > { %v1633_v57 = vld [vmem:[#allocation4 + $0xd8] sm:$0x1]  ;;  %2757 = vmatmul.msk.bf16.vlgmr.msra.gmra.mxu0 %vm829_vm1, %v1596_v61  ;;  %v3088_v55 = vld [vmem:[%s4051_s5 + $0x10] sm:$0xff]  ;;  %1975 = vmatpush.bf16.msrb.mxu3 %v3101_v52 }
 0x170   : > { %v1634_v62 = vpack.c.bf16 %v1633_v57, %v1632_v56  ;;  %v3096_v56 = vld [vmem:[%s4051_s5 + $0x50] sm:$0xff]  ;;  %v3121_v49 = vld [vmem:[%s4051_s5 + $0x118] sm:$0xff] }
 0x171   : > { %v1670_v58 = vld [vmem:[#allocation4 + $0xe0] sm:$0xff]  ;;  %v3100_v57 = vld [vmem:[%s4051_s5 + $0x70] sm:$0xff]  ;;  %1925 = vmatpush.bf16.msrb.mxu2 %v3096_v56  ;;  %v3119_v56 = vld [vmem:[%s4051_s5 + $0x108] sm:$0xff] }
 0x172   : > { %v1671_v59 = vld [vmem:[#allocation4 + $0xe8] sm:$0x1]  ;;  %2766 = vmatmul.msk.bf16.vlgmr.msrb.gmra.mxu1 %vm829_vm1, %v1634_v62  ;;  %v3191_v62 = vld [vmem:[%s4050_s4] ss:$0 sm:$0xff] }
 0x173   : > { %v1672_v63 = vpack.c.bf16 %v1671_v59, %v1670_v58  ;;  %1875 = vmatpush.bf16.msra.mxu1 %v3088_v55  ;;  %1976 = vmatpush.bf16.msrb.mxu3 %v3100_v57  ;;  %v3120_v55 = vld [vmem:[%s4051_s5 + $0x110] sm:$0xff]  ;;  %v3118_v57 = vld [vmem:[%s4051_s5 + $0x100] sm:$0xff] }
 0x174   : > { %v1708_v20 = vld [vmem:[#allocation4 + $0xf0] sm:$0xff] }
 0x175   : > { %v1709_v60 = vld [vmem:[#allocation4 + $0xf8] sm:$0x1]  ;;  %2775 = vmatmul.msk.bf16.vlgmr.msra.gmra.mxu2 %vm829_vm1, %v1672_v63 }
 0x176   : > { %v1710_v0 = vpack.c.bf16 %v1709_v60, %v1708_v20 }
 0x178   : > { %2784 = vmatmul.msk.bf16.vlgmr.msra.gmra.mxu3 %vm829_vm1, %v1710_v0  ;;  %v3091_v0 = vld [vmem:[%s4051_s5 + $0x28] sm:$0xff] }
 0x179   : > { %1836 = vmatpush.bf16.msrb.mxu0 %v3091_v0 }
 0x1a0   : > { %v1209_v29 = vpop.f32.mrf.mxu1 }
 0x1a8   : > { %v1211_v5 = vpop.f32.mrf.mxu1 }
 0x1af   : > { %v1180_v1 = vpop.f32.mrf.mxu0 }
 0x1b0   : > { %v1210_v10 = vadd.f32 %v1209_v29, %v1180_v1  ;;  %v3087_v1 = vld [vmem:[%s4051_s5 + $0x8] sm:$0xff] }
 0x1b1   : > { %v3095_v29 = vld [vmem:[%s4051_s5 + $0x48] sm:$0xff]  ;;  %1876 = vmatpush.bf16.msra.mxu1 %v3087_v1 }
 0x1b2   : > { %1926 = vmatpush.bf16.msrb.mxu2 %v3095_v29 }
 0x1b7   : > { %v1182_v4 = vpop.f32.mrf.mxu0 }
 0x1b8   : > { %v1245_v2 = vpop.f32.mrf.mxu2  ;;  %v1212_v17 = vadd.f32 %v1211_v5, %v1182_v4 }
 0x1b9   : > { %v1250_v11 = vadd.f32 %v1245_v2, %v1210_v10  ;;  %v3099_v2 = vld [vmem:[%s4051_s5 + $0x68] sm:$0xff]  ;;  %v3098_v10 = vld [vmem:[%s4051_s5 + $0x60] sm:$0xff] }
 0x1ba   : > { %1977 = vmatpush.bf16.msrb.mxu3 %v3099_v2  ;;  %v2964_v2 = vld [vmem:[%s4053_s7 + $0x30] sm:$0xf] }
 0x1bb   : > { %v1283_v3 = vpop.f32.mrf.mxu3 }
 0x1bc   : > { %v1288_v13 = vadd.f32 %v1283_v3, %v1250_v11 }
 0x1be   : > { %1978 = vmatpush.bf16.msrb.mxu3 %v3098_v10  ;;  %v3126_v10 = vld [vmem:[%s4053_s7 + $0x24] sm:$0xf] }
 0x1c0   : > { %v1247_v6 = vpop.f32.mrf.mxu2 }
 0x1c1   : > { %v1251_v19 = vadd.f32 %v1247_v6, %v1212_v17  ;;  %v3090_v6 = vld [vmem:[%s4051_s5 + $0x20] sm:$0xff]  ;;  %v3117_v17 = vld [vmem:[%s4051_s5 + $0xf8] sm:$0xff] }
 0x1c2   : > { %1837 = vmatpush.bf16.msrb.mxu0 %v3090_v6  ;;  %2179 = vmatpush.bf16.msra.mxu3 %v3117_v17  ;;  %v2966_v6 = vld [vmem:[%s4053_s7 + $0x38] sm:$0xf0] }
 0x1c3   : > { %v1285_v7 = vpop.f32.mrf.mxu3 }
 0x1c4   : > { %v1289_v24 = vadd.f32 %v1285_v7, %v1251_v19  ;;  %v3086_v7 = vld [vmem:[%s4051_s5] sm:$0xff] }
 0x1c5   : > { %1877 = vmatpush.bf16.msra.mxu1 %v3086_v7  ;;  %v2956_v7 = vld [vmem:[%s4053_s7 + $0x20] sm:$0xf] }
 0x1c9   : > { %v1321_v8 = vpop.f32.mrf.mxu0 }
 0x1ca   : > { %v1359_v9 = vpop.f32.mrf.mxu1  ;;  %v1326_v18 = vadd.f32 %v1321_v8, %v1288_v13  ;;  %v3105_v13 = vld [vmem:[%s4051_s5 + $0x98] sm:$0xff] }
 0x1cb   : > { %2026 = vmatpush.bf16.msra.mxu0 %v3105_v13 }
 0x1cc   : > { %v1364_v22 = vadd.f32 %v1359_v9, %v1326_v18  ;;  %v3094_v9 = vld [vmem:[%s4051_s5 + $0x40] sm:$0xff] }
 0x1cd   : > { %1927 = vmatpush.bf16.msrb.mxu2 %v3094_v9 }
 0x1d1   : > { %v1397_v12 = vpop.f32.mrf.mxu2  ;;  %v1323_v15 = vpop.f32.mrf.mxu0 }
 0x1d2   : > { %v1435_v14 = vpop.f32.mrf.mxu3  ;;  %v1361_v16 = vpop.f32.mrf.mxu1  ;;  %v1402_v25 = vadd.f32 %v1397_v12, %v1364_v22  ;;  %v1327_v30 = vadd.f32 %v1323_v15, %v1289_v24  ;;  %v3108_v24 = vld [vmem:[%s4051_s5 + $0xb0] sm:$0xff] }
 0x1d4   : > { %v1440_v31 = vadd.f32 %v1435_v14, %v1402_v25  ;;  %v1365_v32 = vadd.f32 %v1361_v16, %v1327_v30  ;;  %v3109_v14 = vld [vmem:[%s4051_s5 + $0xb8] sm:$0xff]  ;;  %v3112_v25 = vld [vmem:[%s4051_s5 + $0xd0] sm:$0xff]  ;;  %v3103_v30 = vld [vmem:[%s4051_s5 + $0x88] sm:$0xff] }
 0x1d5   : > { %v3113_v16 = vld [vmem:[%s4051_s5 + $0xd8] sm:$0xff]  ;;  %2077 = vmatpush.bf16.msrb.mxu1 %v3109_v14 }
 0x1d6   : > { %2128 = vmatpush.bf16.msra.mxu2 %v3113_v16 }
 0x1d9   : > { %v1399_v23 = vpop.f32.mrf.mxu2  ;;  %v1473_v27 = vpop.f32.mrf.mxu0  ;;  %2078 = vmatpush.bf16.msrb.mxu1 %v3108_v24 }
 0x1da   : > { %v1437_v26 = vpop.f32.mrf.mxu3  ;;  %v1478_v33 = vadd.f32 %v1473_v27, %v1440_v31  ;;  %v1403_v21 = vadd.f32 %v1399_v23, %v1365_v32  ;;  %v3104_v23 = vld [vmem:[%s4051_s5 + $0x90] sm:$0xff]  ;;  %v3107_v31 = vld [vmem:[%s4051_s5 + $0xa8] sm:$0xff]  ;;  %2129 = vmatpush.bf16.msra.mxu2 %v3112_v25 }
 0x1db   : > { %v1511_v28 = vpop.f32.mrf.mxu1  ;;  %2027 = vmatpush.bf16.msra.mxu0 %v3104_v23 }
 0x1dc   : > { %v1516_v38 = vadd.f32 %v1511_v28, %v1478_v33  ;;  %v1441_v39 = vadd.f32 %v1437_v26, %v1403_v21  ;;  %v3116_v26 = vld [vmem:[%s4051_s5 + $0xf0] sm:$0xff]  ;;  %v3111_v33 = vld [vmem:[%s4051_s5 + $0xc8] sm:$0xff] }
 0x1dd   : > { %2180 = vmatpush.bf16.msra.mxu3 %v3116_v26  ;;  %2079 = vmatpush.bf16.msrb.mxu1 %v3107_v31  ;;  %v2950_v26 = vld [vmem:[%s4053_s7 + $0x18] sm:$0xf0]  ;;  %v3122_v31 = vld [vmem:[%s4053_s7 + $0x4] sm:$0xf] }
 0x1de   : > { %2130 = vmatpush.bf16.msra.mxu2 %v3111_v33  ;;  %v3137_v33 = vld [vmem:[%s4055_s9 + $0x38] sm:$0xff] }
 0x1df   : > { %2028 = vmatpush.bf16.msra.mxu0 %v3103_v30 }
 0x1e1   : > { %v1475_v36 = vpop.f32.mrf.mxu0 }
 0x1e2   : > { %v1479_v41 = vadd.f32 %v1475_v36, %v1441_v39 }
 0x1e3   : > { %v1513_v37 = vpop.f32.mrf.mxu1 }
 0x1e4   : > { %v1549_v34 = vpop.f32.mrf.mxu2  ;;  %v1517_v46 = vadd.f32 %v1513_v37, %v1479_v41  ;;  %v3102_v37 = vld [vmem:[%s4051_s5 + $0x80] sm:$0xff] }
 0x1e5   : > { %v1554_v40 = vadd.f32 %v1549_v34, %v1516_v38  ;;  %v3115_v34 = vld [vmem:[%s4051_s5 + $0xe8] sm:$0xff]  ;;  %v3106_v38 = vld [vmem:[%s4051_s5 + $0xa0] sm:$0xff]  ;;  %2029 = vmatpush.bf16.msra.mxu0 %v3102_v37  ;;  %v3144_v37 = vld [vmem:[%s4055_s9 + $0x70] sm:$0xff] }
 0x1e6   : > { %2181 = vmatpush.bf16.msra.mxu3 %v3115_v34  ;;  %v3114_v41 = vld [vmem:[%s4051_s5 + $0xe0] sm:$0xff]  ;;  %2080 = vmatpush.bf16.msrb.mxu1 %v3106_v38 }
 0x1e7   : > { %v1587_v35 = vpop.f32.mrf.mxu3 }
 0x1e8   : > { %v1592_v43 = vadd.f32 %v1587_v35, %v1554_v40  ;;  %v3110_v40 = vld [vmem:[%s4051_s5 + $0xc0] sm:$0xff] }
 0x1e9   : > { %2131 = vmatpush.bf16.msra.mxu2 %v3110_v40 }
 0x1ea   : > { %2182 = vmatpush.bf16.msra.mxu3 %v3114_v41 }
 0x1ec   : > { %v1551_v42 = vpop.f32.mrf.mxu2  ;;  %v1625_v45 = vpop.f32.mrf.mxu0 }
 0x1ed   : > { %v1630_v47 = vadd.f32 %v1625_v45, %v1592_v43  ;;  %v1555_v53 = vadd.f32 %v1551_v42, %v1517_v46 }
 0x1ef   : > { %v1589_v44 = vpop.f32.mrf.mxu3  ;;  %v1663_v51 = vpop.f32.mrf.mxu1 }
 0x1f0   : > { %v1668_v58 = vadd.f32 %v1663_v51, %v1630_v47  ;;  %v1593_v20 = vadd.f32 %v1589_v44, %v1555_v53 }
 0x1f4   : > { %v1627_v63 = vpop.f32.mrf.mxu0 }
 0x1f5   : > { %v1631_v4 = vadd.f32 %v1627_v63, %v1593_v20 }
 0x1f7   : > { %v1665_v8 = vpop.f32.mrf.mxu1 }
 0x1f8   : > { %v1701_v59 = vpop.f32.mrf.mxu2  ;;  %v1669_v12 = vadd.f32 %v1665_v8, %v1631_v4  ;;  %v3128_v4 = vld [vmem:[%s4053_s7 + $0x34] sm:$0xf]  ;;  %v3127_v8 = vld [vmem:[%s4053_s7 + $0x24] sm:$0xf0] }
 0x1f9   : > { %v1706_v60 = vadd.f32 %v1701_v59, %v1668_v58  ;;  %v2969_v9 = vor.u32 %v3128_v4, %v2966_v6  ;;  %v3140_v4 = vld [vmem:[%s4055_s9 + $0x50] sm:$0xff]  ;;  %v3139_v6 = vld [vmem:[%s4055_s9 + $0x48] sm:$0xff] }
 0x1fb   : > { %v1739_v61 = vpop.f32.mrf.mxu3 }
 0x1fc   : > { %v1744_v3 = vadd.f32 %v1739_v61, %v1706_v60 }
 0x1fe   : > { %v1750_v5 = vadd.f32 %v3191_v62, %v1744_v3  ;;  %v3129_v3 = vld [vmem:[%s4053_s7 + $0x34] sm:$0xf0] }
 0x200   : > { %v1752_v11 = vmax.f32 %v1750_v5, 0.0  ;;  %v1703_v15 = vpop.f32.mrf.mxu2  ;;  %v2965_v5 = vor.u32 %v3129_v3, %v2964_v2  ;;  %v3131_v3 = vld [vmem:[%s4055_s9 + $0x8] sm:$0xff] }
 0x201   : > { %v1707_v18 = vadd.f32 %v1703_v15, %v1669_v12  ;;  %v2957_v12 = vor.u32 %v3127_v8, %v2956_v7  ;;  %v3138_v7 = vld [vmem:[%s4055_s9 + $0x40] sm:$0xff] }
 0x202   : > { %1754 = vst.msk [vmem:[#allocation5] sm:$0xff] %vm386_vm0, %v1752_v11  ;;  %v2958_v11 = vld [vmem:[%s4053_s7 + $0x28] sm:$0xf0]  ;;  %v2252_v8 = vld [vmem:[%s4054_s8] sm:$0x3] }
 0x203   : > { %v1741_v19 = vpop.f32.mrf.mxu3  ;;  %v2961_v13 = vor.u32 %v3126_v10, %v2958_v11 }
 0x204   : > { %v1745_v22 = vadd.f32 %v1741_v19, %v1707_v18  ;;  %v2948_v18 = vld [vmem:[%s4053_s7 + $0x10] sm:$0xf]  ;;  %v3125_v19 = vld [vmem:[%s4053_s7 + $0x14] sm:$0xf0] }
 0x205   : > { %v2949_v25 = vor.u32 %v3125_v19, %v2948_v18 }
 0x206   : > { %v1751_v27 = vadd.f32 %v3191_v62, %v1745_v22  ;;  %v3124_v22 = vld [vmem:[%s4053_s7 + $0x14] sm:$0xf] }
 0x207   : > { %v2953_v30 = vor.u32 %v3124_v22, %v2950_v26 }
 0x208   : > { %v1753_v28 = vmax.f32 %v1751_v27, 0.0  ;;  %v2940_v27 = vld [vmem:[%s4053_s7] sm:$0xf] }
 0x209   : > { %v1757_v32 = vld [vmem:[#allocation5] sm:$0x1]  ;;  %v1759_v21 = vld [vmem:[#allocation5 + $0x1] sm:$0x1]  ;;  %v1762_v35 = vld [vmem:[#allocation5 + $0x2] sm:$0x1] }
 0x20a   : > { %1756 = vst.msk [vmem:[#allocation5 + $0x8] sm:$0x1] %vm1755_vm3, %v1753_v28  ;;  %v1765_v36 = vld [vmem:[#allocation5 + $0x3] sm:$0x1]  ;;  %v1768_v39 = vld [vmem:[#allocation5 + $0x4] sm:$0x1] }
 0x20b   : > { %1758 = vst.msk [vmem:[#allocation6] sm:$0x1] %vm1755_vm3, %v1757_v32  ;;  %v1771_v42 = vld [vmem:[#allocation5 + $0x5] sm:$0x1]  ;;  %v1774_v43 = vld [vmem:[#allocation5 + $0x6] sm:$0x1] }
 0x20c   : > { %1761 = vst.msk [vmem:[#allocation6 + $0x1] sm:$0x1] %vm1755_vm3, %v1759_v21  ;;  %v1777_v44 = vld [vmem:[#allocation5 + $0x7] sm:$0x1]  ;;  %v3123_v28 = vld [vmem:[%s4053_s7 + $0x4] sm:$0xf0] }
 0x20d   : > { %1764 = vst.msk [vmem:[#allocation6 + $0x2] sm:$0x1] %vm1755_vm3, %v1762_v35  ;;  %v2942_v32 = vld [vmem:[%s4053_s7 + $0x8] sm:$0xf0]  ;;  %v2941_v34 = vor.u32 %v3123_v28, %v2940_v27  ;;  %v3145_v21 = vld [vmem:[%s4055_s9 + $0x78] sm:$0xff] }
 0x20e   : > { %1767 = vst.msk [vmem:[#allocation6 + $0x3] sm:$0x1] %vm1755_vm3, %v1765_v36  ;;  %v2945_v35 = vor.u32 %v3122_v31, %v2942_v32  ;;  %v3136_v36 = vld [vmem:[%s4055_s9 + $0x30] sm:$0xff] }
 0x20f   : > { %1770 = vst.msk [vmem:[#allocation6 + $0x4] sm:$0x1] %vm1755_vm3, %v1768_v39 }
 0x210   : > { %1773 = vst.msk [vmem:[#allocation6 + $0x5] sm:$0x1] %vm1755_vm3, %v1771_v42  ;;  %v3135_v42 = vld [vmem:[%s4055_s9 + $0x28] sm:$0xff] }
 0x211   : > { %v1780_v45 = vld [vmem:[#allocation5 + $0x8] sm:$0x1]  ;;  %1776 = vst.msk [vmem:[#allocation6 + $0x6] sm:$0x1] %vm1755_vm3, %v1774_v43 }
 0x212   : > { %1782 = vst.msk [vmem:[#allocation6 + $0x8] sm:$0x1] %vm1755_vm3, %v1780_v45  ;;  %v1783_v46 = vld [vmem:[#allocation6] sm:$0x1]  ;;  %v3143_v45 = vld [vmem:[%s4055_s9 + $0x68] sm:$0xff] }
 0x213   : > { %1779 = vst.msk [vmem:[#allocation6 + $0x7] sm:$0x1] %vm1755_vm3, %v1777_v44  ;;  %v1793_v47 = vld [vmem:[#allocation6 + $0x1] sm:$0x1]  ;;  %v1784_v48 = vpack.c.bf16 %v1783_v46, %v1783_v46 }
 0x214   : > { %v1794_v50 = vpack.c.bf16 %v1793_v47, %v1793_v47  ;;  %v1883_v51 = vld [vmem:[#allocation6 + $0x2] sm:$0x1]  ;;  %v3134_v47 = vld [vmem:[%s4055_s9 + $0x20] sm:$0xff] }
 0x215   : > { %2818 = vmatmul.msk.bf16.vlgmr.msra.gmra.mxu1 %vm386_vm0, %v1784_v48  ;;  %v1884_v52 = vpack.c.bf16 %v1883_v51, %v1883_v51  ;;  %v1934_v53 = vld [vmem:[#allocation6 + $0x3] sm:$0x1]  ;;  %v3142_v48 = vld [vmem:[%s4055_s9 + $0x60] sm:$0xff] }
 0x216   : > { %2801 = vmatmul.msk.bf16.vlgmr.msrb.gmra.mxu0 %vm386_vm0, %v1794_v50  ;;  %v1935_v54 = vpack.c.bf16 %v1934_v53, %v1934_v53  ;;  %v1985_v59 = vld [vmem:[#allocation6 + $0x4] sm:$0x1]  ;;  %2305 = vmatpush.bf16.msra.mxu1 %v2965_v5  ;;  %v3130_v5 = vld [vmem:[%s4055_s9] sm:$0xff] }
 0x217   : > { %2835 = vmatmul.msk.bf16.vlgmr.msrb.gmra.mxu2 %vm386_vm0, %v1884_v52  ;;  %2230 = vmatpush.bf16.msrb.mxu0 %v3121_v49  ;;  %v2036_v58 = vld [vmem:[#allocation6 + $0x5] sm:$0x1]  ;;  %v1986_v62 = vpack.c.bf16 %v1985_v59, %v1985_v59  ;;  %v3133_v52 = vld [vmem:[%s4055_s9 + $0x18] sm:$0xff] }
 0x218   : > { %2852 = vmatmul.msk.bf16.vlgmr.msrb.gmra.mxu3 %vm386_vm0, %v1935_v54  ;;  %v2087_v20 = vld [vmem:[#allocation6 + $0x6] sm:$0x1]  ;;  %v2037_v60 = vpack.c.bf16 %v2036_v58, %v2036_v58  ;;  %2318 = vmatpush.bf16.msrb.mxu2 %v2969_v9  ;;  %v2294_v9 = vperm.slane %v2252_v8, 0 }
 0x219   : > { %v2088_v63 = vpack.c.bf16 %v2087_v20, %v2087_v20  ;;  %v2189_v1 = vld [vmem:[#allocation6 + $0x8] sm:$0x1]  ;;  %2460 = vmatpush.bf16.msrb.mxu3 %v3137_v33  ;;  %v3132_v58 = vld [vmem:[%s4055_s9 + $0x10] sm:$0xff] }
 0x21a   : > { %v2138_v61 = vld [vmem:[#allocation6 + $0x7] sm:$0x1]  ;;  %v2190_v29 = vpack.c.bf16 %v2189_v1, %v2189_v1  ;;  %2306 = vmatpush.bf16.msra.mxu1 %v2957_v12 }
 0x21b   : > { %2231 = vmatpush.bf16.msrb.mxu0 %v3120_v55  ;;  %v2139_v0 = vpack.c.bf16 %v2138_v61, %v2138_v61  ;;  %v3141_v55 = vld [vmem:[%s4055_s9 + $0x58] sm:$0xff] }
 0x21c   : > { %2319 = vmatpush.bf16.msrb.mxu2 %v2961_v13  ;;  %v2295_v13 = vperm.slane %v2252_v8, 1 }
 0x21d   : > { %2461 = vmatpush.bf16.msrb.mxu3 %v3136_v36 }
 0x21e   : > { %2307 = vmatpush.bf16.msra.mxu1 %v2949_v25 }
 0x21f   : > { %2232 = vmatpush.bf16.msrb.mxu0 %v3119_v56 }
 0x220   : > { %2320 = vmatpush.bf16.msrb.mxu2 %v2953_v30 }
 0x221   : > { %2462 = vmatpush.bf16.msrb.mxu3 %v3135_v42 }
 0x222   : > { %2308 = vmatpush.bf16.msra.mxu1 %v2941_v34 }
 0x223   : > { %2233 = vmatpush.bf16.msrb.mxu0 %v3118_v57 }
 0x224   : > { %2321 = vmatpush.bf16.msrb.mxu2 %v2945_v35 }
 0x225   : > { %2886 = vmatmul.msk.bf16.vlgmr.msrb.gmra.mxu1 %vm386_vm0, %v2037_v60  ;;  %2463 = vmatpush.bf16.msrb.mxu3 %v3134_v47 }
 0x226   : > { %2869 = vmatmul.msk.bf16.vlgmr.msra.gmra.mxu0 %vm386_vm0, %v1986_v62  ;;  %v2240_v62 = vld [vmem:[%s4052_s6] sm:$0x1] }
 0x227   : > { %2903 = vmatmul.msk.bf16.vlgmr.msra.gmra.mxu2 %vm386_vm0, %v2088_v63  ;;  %2473 = vmatpush.bf16.msra.mxu0 %v3145_v21 }
 0x228   : > { %2920 = vmatmul.msk.bf16.vlgmr.msra.gmra.mxu3 %vm386_vm0, %v2139_v0 }
 0x229   : > { %2464 = vmatpush.bf16.msrb.mxu3 %v3133_v52 }
 0x22b   : > { %2474 = vmatpush.bf16.msra.mxu0 %v3144_v37 }
 0x22d   : > { %2465 = vmatpush.bf16.msrb.mxu3 %v3132_v58 }
 0x22f   : > { %2475 = vmatpush.bf16.msra.mxu0 %v3143_v45 }
 0x231   : > { %2466 = vmatpush.bf16.msrb.mxu3 %v3131_v3 }
 0x233   : > { %2476 = vmatpush.bf16.msra.mxu0 %v3142_v48 }
 0x235   : > { %2467 = vmatpush.bf16.msrb.mxu3 %v3130_v5 }
 0x236   : > { %2937 = vmatmul.msk.bf16.vlgmr.msrb.gmra.mxu0 %vm386_vm0, %v2190_v29 }
 0x237   : > { %2477 = vmatpush.bf16.msra.mxu0 %v3141_v55 }
 0x23b   : > { %2478 = vmatpush.bf16.msra.mxu0 %v3140_v4 }
 0x23f   : > { %2479 = vmatpush.bf16.msra.mxu0 %v3139_v6 }
 0x243   : > { %2480 = vmatpush.bf16.msra.mxu0 %v3138_v7 }
 0x292   : > { %v1879_v14 = vpop.f32.mrf.mxu1 }
 0x293   : > { %v1839_v15 = vpop.f32.mrf.mxu0 }
 0x294   : > { %v1880_v38 = vadd.f32 %v1879_v14, %v1839_v15 }
 0x29a   : > { %v1929_v16 = vpop.f32.mrf.mxu2  ;;  %v1881_v17 = vpop.f32.mrf.mxu1 }
 0x29b   : > { %v1980_v23 = vpop.f32.mrf.mxu3  ;;  %v1841_v24 = vpop.f32.mrf.mxu0  ;;  %v1933_v39 = vadd.f32 %v1929_v16, %v1880_v38 }
 0x29d   : > { %v1984_v46 = vadd.f32 %v1980_v23, %v1933_v39  ;;  %v2363_v23 = vld [vmem:[%s4056_s10] sm:$0x1] }
 0x2a2   : > { %v1931_v40 = vpop.f32.mrf.mxu2  ;;  %v2082_v41 = vpop.f32.mrf.mxu1 }
 0x2a3   : > { %v1982_v43 = vpop.f32.mrf.mxu3  ;;  %v2031_v44 = vpop.f32.mrf.mxu0 }
 0x2a4   : > { %v2035_v49 = vadd.f32 %v2031_v44, %v1984_v46 }
 0x2a6   : > { %v2086_v56 = vadd.f32 %v2082_v41, %v2035_v49 }
 0x2aa   : > { %v2133_v50 = vpop.f32.mrf.mxu2  ;;  %v2084_v51 = vpop.f32.mrf.mxu1 }
 0x2ab   : > { %v2184_v53 = vpop.f32.mrf.mxu3  ;;  %v2033_v54 = vpop.f32.mrf.mxu0  ;;  %v2137_v57 = vadd.f32 %v2133_v50, %v2086_v56 }
 0x2ad   : > { %v2188_v59 = vadd.f32 %v2184_v53, %v2137_v57 }
 0x2b2   : > { %v2135_v20 = vpop.f32.mrf.mxu2 }
 0x2b3   : > { %v2186_v60 = vpop.f32.mrf.mxu3  ;;  %v2235_v61 = vpop.f32.mrf.mxu0 }
 0x2b4   : > { %v2239_v63 = vadd.f32 %v2235_v61, %v2188_v59 }
 0x2b6   : > { %v2241_v0 = vadd.f32 %v2240_v62, %v2239_v63 }
 0x2b8   : > { %v2242_v1 = vmax.f32 %v2241_v0, 0.0 }
 0x2ba   : > { %v2243_v29 = vpack.c.bf16 %v2242_v1, %v2242_v1 }
 0x2bb   : > { %v2237_v2 = vpop.f32.mrf.mxu0 }
 0x2bc   : > { %2970 = vmatmul.msk.bf16.vlgmr.msra.gmra.mxu1 %vm386_vm0, %v2243_v29  ;;  %2971 = vmatmul.msk.bf16.vlgmr.msrb.gmra.mxu2 %vm386_vm0, %v2243_v29 }
 0x339   : > { %v2310_v10 = vpop.f32.mrf.mxu1 }
 0x33a   : > { %v2311_v11 = vadd.f32 %v2310_v10, %v2294_v9 }
 0x33c   : > { %v2327_v12 = vmax.f32 %v2311_v11, 0.0 }
 0x33e   : > { %v2329_v14 = vpack.c.bf16 %v2327_v12, %v2327_v12 }
 0x33f   : > { %v2323_v15 = vpop.f32.mrf.mxu2 }
 0x340   : > { %v2324_v16 = vadd.f32 %v2323_v15, %v2295_v13  ;;  %2468 = vmatmul.bf16.vlgmr.msrb.gmra.mxu3 %v2329_v14 }
 0x341   : > { %v2312_v17 = vpop.f32.mrf.mxu1 }
 0x342   : > { %v2328_v18 = vmax.f32 %v2324_v16, 0.0 }
 0x344   : > { %v2330_v19 = vpack.c.bf16 %v2328_v18, %v2328_v18 }
 0x346   : > { %2481 = vmatmul.bf16.vlgmr.msra.gmra.mxu0 %v2330_v19 }
 0x347   : > { %v2325_v22 = vpop.f32.mrf.mxu2 }
 0x3c3   : > { %v2469_v24 = vpop.f32.mrf.mxu3  ;;  %v2482_v25 = vpop.f32.mrf.mxu0 }
 0x3c4   : > { %v2470_v26 = vadd.f32 %v2469_v24, %v2363_v23 }
 0x3c6   : > { %v2483_v27 = vadd.f32 %v2482_v25, %v2470_v26 }
 0x3c8   : > { %2487 = vst.msk [vmem:[%s378_s26] sm:$0x1] %vm2486_vm4, %v2483_v27 }
 0x3c9   : > { %3219 = shalt.err (!%p3216_p3)
}
 0x3ca   : > { %3151 = dma.vmem_to_hbm [thread:$0]  (%p3354_p5), %s2500_s29, 16, %s2502_s30, %s2489_s12  }
 0x3cb   : > { %v2471_v28 = vpop.f32.mrf.mxu3  ;;  %v2484_v30 = vpop.f32.mrf.mxu0 }
 0x3cc PF: > { %p3157_p4 = scmp.ge.s32.totalorder %s3254_s20, 2  ;;  %s2513_s15 = sand.u32 1, %s3242_s17  }
 0x3cd   : > { %s2514_s19 = scalar_lea.sflag [#allocation8], %s2513_s15 }
 0x3ce   : > { %p3154_p7 = pnand %p3157_p4, %p3358_p6 }
 0x3d0   : > { %p3155_p8 = pneg %p3154_p7 }
 0x3d2   : > { %3237 = dma.done.wait (%p3155_p8), %s2514_s19, 16  }
 0x3d3   : > { %3239 = vsyncadd (%p3155_p8), %s2514_s19, 4294967280  ;;  %s4063_s26 = sld [smem:[#allocation10_spill]]  ;;  %p21_p5 = scmp.ge.s32.totalorder %s3341_s23, 4  }
 0x3d4   : > { %s4064_s19 = sld [smem:[#allocation11_spill]]  ;;  %s4065_s17 = smov %s3246_s18 }
 0x3d5   : > { %s4067_s20 = smov %s3341_s23  ;;  %23 = sbr.rel (!%p21_p5) target bundleno = 3 (0x3), region = 125 }
 0x3d9   : > { %s4066_s18 = smov %s4063_s26 }
 0x3da   :  { %2519 = vsyncpa [#allocation8], 1 }
 0x3db   :  { %2521 = vsyncpa [#allocation8 + $0x1], 1 }

</bundles_post_ra>
